<compile_context>
chip_gen: v6e
topology: v6e:2x2x1
jax: 0.10.0
libtpu: 0.0.40
codegen_flags: <defaults>
</compile_context>

<pallas_src>
import math
import numpy as np
import jax
import jax.numpy as jnp
from jax import lax
from jax.experimental import pallas as pl
from jax.experimental.pallas import tpu as pltpu

# Small synthetic configuration (input_features=F, seq_len=T, n_heads=H,
# n_layers=L, d_model=D).
B, T, F, D, H, L = 2, 16, 8, 32, 4, 2
HD = D // H          # head dim
EPS = 1e-5           # nn.LayerNorm default eps


def _pick_bblk(batch):
    # v7x has 2 TensorCores/chip: keep the "parallel" grid axis length a
    # multiple of 2 so both cores get a step.  v5e/v6e have 1 TC: fold the
    # whole batch into one grid step (fewer ~0.35 us grid-step overheads and
    # more MXU rows per matmul).
    try:
        kind = jax.devices()[0].device_kind.lower()
    except Exception:
        kind = ""
    if "v7" in kind and batch % 2 == 0:
        return batch // 2
    return batch


BBLK = _pick_bblk(B)     # batch elements fused per grid step
M = BBLK * T             # activation-slab rows per grid step
G = B // BBLK            # grid length


def _layernorm(y, g, b):
    mu = jnp.mean(y, axis=-1, keepdims=True)
    var = jnp.mean(jnp.square(y - mu), axis=-1, keepdims=True)
    return (y - mu) * lax.rsqrt(var + EPS) * g + b


# NT contraction: contract the last dim of both operands (q . k^T without a
# materialized per-head transpose).
_NT_DIMS = (((1,), (1,)), ((), ()))


# ---------------------------------------------------------------------------
# Fused kernel: one grid step == BBLK batch elements as a (BBLK*T, D) slab.
# ---------------------------------------------------------------------------
def fused_encoder_kernel(x_ref, w_emb_ref, pe_ref,
                         wqkv_ref, bqkv_ref, wo_ref, bo_ref,
                         ln1g_ref, ln1b_ref,
                         w1_ref, b1_ref, w2_ref, b2_ref,
                         ln2g_ref, ln2b_ref, o_ref):
    # x_ref: (M, F)  ->  o_ref: (M, D).  pe_ref already has the input-embedding
    # bias folded in and is tiled to the slab; the Q third of wqkv/bqkv is
    # pre-scaled by 1/sqrt(HD) at init.
    h = (jnp.dot(x_ref[...], w_emb_ref[...],
                 preferred_element_type=jnp.float32) + pe_ref[...])     # (M, D)

    for l in range(L):                          # static unroll over layers
        # ---- residual block 1: LayerNorm(h + MHA(h)) ----------------------
        # Fused QKV projection: one (M,D)x(D,3D) MXU pass.
        qkv = (jnp.dot(h, wqkv_ref[l], preferred_element_type=jnp.float32)
               + bqkv_ref[l])                                           # (M, 3D)
        wo_l = wo_ref[l]                                                # (D, D)
        attn = None
        for hh in range(H):                     # static unroll over heads
            q_h = qkv[:, hh * HD:(hh + 1) * HD]                         # (M, HD)
            k_h = qkv[:, D + hh * HD:D + (hh + 1) * HD]                 # (M, HD)
            v_h = qkv[:, 2 * D + hh * HD:2 * D + (hh + 1) * HD]         # (M, HD)
            # Attention over time T within each batch element; per-batch
            # sub-slabs are 16-row (sublane-tile aligned) slices -> free.
            ctx_parts = []
            for b in range(BBLK):
                r0 = b * T
                qb = q_h[r0:r0 + T]
                kb = k_h[r0:r0 + T]
                vb = v_h[r0:r0 + T]
                s = lax.dot_general(qb, kb, _NT_DIMS,
                                    preferred_element_type=jnp.float32)  # (T,T)
                s = s - jnp.max(s, axis=-1, keepdims=True)
                p = jnp.exp(s)
                p = p * pl.reciprocal(jnp.sum(p, axis=-1, keepdims=True),
                                      approx=False)      # softmax over keys
                ctx_parts.append(jnp.dot(p, vb,
                                         preferred_element_type=jnp.float32))
            ctx = (ctx_parts[0] if BBLK == 1
                   else jnp.concatenate(ctx_parts, axis=0))             # (M, HD)
            # Per-head output-projection accumulation -> no lane-axis concat
            # of heads; first head initializes the accumulator (no zero-fill).
            head_out = jnp.dot(ctx, wo_l[hh * HD:(hh + 1) * HD, :],
                               preferred_element_type=jnp.float32)      # (M, D)
            attn = head_out if attn is None else attn + head_out
        # dropout == identity in eval mode
        h = _layernorm(h + attn + bo_ref[l], ln1g_ref[l], ln1b_ref[l])

        # ---- residual block 2: LayerNorm(h + FFN(h)) -----------------------
        f1 = jnp.maximum(
            jnp.dot(h, w1_ref[l], preferred_element_type=jnp.float32)
            + b1_ref[l], 0.0)
        f2 = (jnp.dot(f1, w2_ref[l], preferred_element_type=jnp.float32)
              + b2_ref[l])
        h = _layernorm(h + f2, ln2g_ref[l], ln2b_ref[l])

    o_ref[...] = h


# ---------------------------------------------------------------------------
# pallas_call wrapper (single fused call, grid over batch blocks)
# ---------------------------------------------------------------------------
def _const2(shape):
    return pl.BlockSpec(shape, lambda i: (0, 0))


def _const3(shape):
    return pl.BlockSpec(shape, lambda i: (0, 0, 0))


def encoder_layer_forward(x, p):
    # Host-side batch-blocking: (B,T,F) -> (G, BBLK*T, F) so each grid step
    # sees a lane-dense 2-D slab (metadata-only reshape outside the kernel).
    xg = x.reshape(G, M, F)
    in_specs = [
        pl.BlockSpec((None, M, F), lambda i: (i, 0, 0)),     # x slab
        _const2((F, D)), _const2((M, D)),                    # w_emb, pe(+b_emb)
        _const3((L, D, 3 * D)), _const3((L, 1, 3 * D)),      # wqkv, bqkv
        _const3((L, D, D)), _const3((L, 1, D)),              # wo, bo
        _const3((L, 1, D)), _const3((L, 1, D)),              # ln1 gamma/beta
        _const3((L, D, D)), _const3((L, 1, D)),              # w1, b1
        _const3((L, D, D)), _const3((L, 1, D)),              # w2, b2
        _const3((L, 1, D)), _const3((L, 1, D)),              # ln2 gamma/beta
    ]
    out = pl.pallas_call(
        fused_encoder_kernel,
        out_shape=jax.ShapeDtypeStruct((G, M, D), jnp.float32),
        grid=(G,),
        in_specs=in_specs,
        out_specs=pl.BlockSpec((None, M, D), lambda i: (i, 0, 0)),
        compiler_params=pltpu.CompilerParams(
            dimension_semantics=("parallel",)),   # both TCs on v7x; neutral elsewhere
    )(xg, p['w_emb'], p['pe'],
      p['wqkv'], p['bqkv'], p['wo'], p['bo'], p['ln1_g'], p['ln1_b'],
      p['w1'], p['b1'], p['w2'], p['b2'], p['ln2_g'], p['ln2_b'])
    return out.reshape(B, T, D)


# ---------------------------------------------------------------------------
# Deterministic synthetic parameters (per-layer weights stacked along L).
# NOTE: when loading real torch weights, Conv1d(F,D,1) stores weight as
# (D,F,1) -> transpose to (F,D); same for the FFN conv weights.
# ---------------------------------------------------------------------------
def init_params(key):
    keys = jax.random.split(key, 2 + L * 6)
    scale = 0.05
    w_emb = scale * jax.random.normal(keys[0], (F, D), jnp.float32)
    b_emb = scale * jax.random.normal(keys[1], (1, D), jnp.float32)

    # sinusoidal positional encoding buffer (max_len = seq_len = T)
    pos = np.arange(T, dtype=np.float32)[:, None]
    div = np.exp(np.arange(0, D, 2, dtype=np.float32) * (-math.log(10000.0) / D))
    pe = np.zeros((T, D), np.float32)
    pe[:, 0::2] = np.sin(pos * div)
    pe[:, 1::2] = np.cos(pos * div)
    # Fold the input-embedding bias into PE and tile to the (BBLK*T, D) slab.
    pe_slab = jnp.tile(jnp.asarray(pe) + b_emb, (BBLK, 1))

    ki = 2
    qscale = 1.0 / math.sqrt(HD)
    wqkv, wo, w1, w2 = [], [], [], []
    for _ in range(L):
        ws = []
        for _n in range(6):     # wq, wk, wv, wo, w1, w2
            ws.append(scale * jax.random.normal(keys[ki], (D, D), jnp.float32))
            ki += 1
        # Fused QKV with the 1/sqrt(HD) attention scale folded into Q columns.
        wqkv.append(jnp.concatenate([ws[0] * qscale, ws[1], ws[2]], axis=1))
        wo.append(ws[3]); w1.append(ws[4]); w2.append(ws[5])

    params = {
        'w_emb': w_emb,
        'pe': pe_slab,                                      # (BBLK*T, D)
        'wqkv': jnp.stack(wqkv),                            # (L, D, 3D)
        'wo': jnp.stack(wo),                                # (L, D, D)
        'w1': jnp.stack(w1),                                # (L, D, D)
        'w2': jnp.stack(w2),                                # (L, D, D)
        # Q third of bqkv would also carry the 1/sqrt(HD) scale (zeros here).
        'bqkv': jnp.zeros((L, 1, 3 * D), jnp.float32),
        'bo': jnp.zeros((L, 1, D), jnp.float32),
        'b1': jnp.zeros((L, 1, D), jnp.float32),
        'b2': jnp.zeros((L, 1, D), jnp.float32),
        'ln1_g': jnp.ones((L, 1, D), jnp.float32),
        'ln1_b': jnp.zeros((L, 1, D), jnp.float32),
        'ln2_g': jnp.ones((L, 1, D), jnp.float32),
        'ln2_b': jnp.zeros((L, 1, D), jnp.float32),
    }
    return params


if __name__ == "__main__":
    key = jax.random.PRNGKey(0)
    kx, kp = jax.random.split(key)
    x = jax.random.normal(kx, (B, T, F), jnp.float32)   # (batch, seq_len, input_features)
    params = init_params(kp)

    out = jax.jit(lambda xx: encoder_layer_forward(xx, params))(x)
    out = jax.block_until_ready(out)

    assert out.shape == (B, T, D), out.shape
    assert bool(jnp.all(jnp.isfinite(out)))
    print("KERNEL_OK")
</pallas_src>

<mosaic_0001>
module attributes {stable_mosaic.version = 11 : i64} {
  func.func @fused_encoder_kernel(%arg0: i32, %arg1: memref<1x32x8xf32, #tpu.memory_space<vmem>>, %arg2: memref<8x32xf32, #tpu.memory_space<vmem>>, %arg3: memref<32x32xf32, #tpu.memory_space<vmem>>, %arg4: memref<2x32x96xf32, #tpu.memory_space<vmem>>, %arg5: memref<2x1x96xf32, #tpu.memory_space<vmem>>, %arg6: memref<2x32x32xf32, #tpu.memory_space<vmem>>, %arg7: memref<2x1x32xf32, #tpu.memory_space<vmem>>, %arg8: memref<2x1x32xf32, #tpu.memory_space<vmem>>, %arg9: memref<2x1x32xf32, #tpu.memory_space<vmem>>, %arg10: memref<2x32x32xf32, #tpu.memory_space<vmem>>, %arg11: memref<2x1x32xf32, #tpu.memory_space<vmem>>, %arg12: memref<2x32x32xf32, #tpu.memory_space<vmem>>, %arg13: memref<2x1x32xf32, #tpu.memory_space<vmem>>, %arg14: memref<2x1x32xf32, #tpu.memory_space<vmem>>, %arg15: memref<2x1x32xf32, #tpu.memory_space<vmem>>, %arg16: memref<1x32x32xf32, #tpu.memory_space<vmem>>) attributes {dimension_semantics = [#tpu.dimension_semantics<parallel>], iteration_bounds = array<i64: 1>, scalar_prefetch = 0 : i64, scratch_operands = 0 : i64, tpu.core_type = #tpu.core_type<tc>, window_params = [{transform_indices = @transform_0, window_bounds = array<i64: 1, 32, 8>}, {pipeline_mode = #tpu.pipeline_mode<synchronous>, transform_indices = @transform_1, window_bounds = array<i64: 8, 32>}, {pipeline_mode = #tpu.pipeline_mode<synchronous>, transform_indices = @transform_2, window_bounds = array<i64: 32, 32>}, {pipeline_mode = #tpu.pipeline_mode<synchronous>, transform_indices = @transform_3, window_bounds = array<i64: 2, 32, 96>}, {pipeline_mode = #tpu.pipeline_mode<synchronous>, transform_indices = @transform_4, window_bounds = array<i64: 2, 1, 96>}, {pipeline_mode = #tpu.pipeline_mode<synchronous>, transform_indices = @transform_5, window_bounds = array<i64: 2, 32, 32>}, {pipeline_mode = #tpu.pipeline_mode<synchronous>, transform_indices = @transform_6, window_bounds = array<i64: 2, 1, 32>}, {pipeline_mode = #tpu.pipeline_mode<synchronous>, transform_indices = @transform_7, window_bounds = array<i64: 2, 1, 32>}, {pipeline_mode = #tpu.pipeline_mode<synchronous>, transform_indices = @transform_8, window_bounds = array<i64: 2, 1, 32>}, {pipeline_mode = #tpu.pipeline_mode<synchronous>, transform_indices = @transform_9, window_bounds = array<i64: 2, 32, 32>}, {pipeline_mode = #tpu.pipeline_mode<synchronous>, transform_indices = @transform_10, window_bounds = array<i64: 2, 1, 32>}, {pipeline_mode = #tpu.pipeline_mode<synchronous>, transform_indices = @transform_11, window_bounds = array<i64: 2, 32, 32>}, {pipeline_mode = #tpu.pipeline_mode<synchronous>, transform_indices = @transform_12, window_bounds = array<i64: 2, 1, 32>}, {pipeline_mode = #tpu.pipeline_mode<synchronous>, transform_indices = @transform_13, window_bounds = array<i64: 2, 1, 32>}, {pipeline_mode = #tpu.pipeline_mode<synchronous>, transform_indices = @transform_14, window_bounds = array<i64: 2, 1, 32>}, {transform_indices = @transform_15, window_bounds = array<i64: 1, 32, 32>}]} {
    %c0 = arith.constant 0 : index
    %c0_0 = arith.constant 0 : index
    %c0_1 = arith.constant 0 : index
    %0 = vector.load %arg1[%c0, %c0_0, %c0_1] : memref<1x32x8xf32, #tpu.memory_space<vmem>>, vector<1x32x8xf32>
    %1 = vector.shape_cast %0 : vector<1x32x8xf32> to vector<32x8xf32>
    %c0_2 = arith.constant 0 : index
    %c0_3 = arith.constant 0 : index
    %2 = vector.load %arg2[%c0_2, %c0_3] : memref<8x32xf32, #tpu.memory_space<vmem>>, vector<8x32xf32>
    %cst = arith.constant dense<0.000000e+00> : vector<32x32xf32>
    %3 = tpu.matmul %1, %2, %cst {dimension_numbers = #tpu.dot_dimension_numbers<[1], [0], [0], [1], [0, 0, 1, 1], [], []>} : vector<32x8xf32>, vector<8x32xf32>, vector<32x32xf32> -> vector<32x32xf32>
    %c0_4 = arith.constant 0 : index
    %c0_5 = arith.constant 0 : index
    %4 = vector.load %arg3[%c0_4, %c0_5] : memref<32x32xf32, #tpu.memory_space<vmem>>, vector<32x32xf32>
    %5 = arith.addf %3, %4 : vector<32x32xf32>
    %c0_6 = arith.constant 0 : index
    %c0_7 = arith.constant 0 : index
    %c0_8 = arith.constant 0 : index
    %6 = vector.load %arg4[%c0_6, %c0_7, %c0_8] : memref<2x32x96xf32, #tpu.memory_space<vmem>>, vector<1x32x96xf32>
    %7 = vector.shape_cast %6 : vector<1x32x96xf32> to vector<32x96xf32>
    %cst_9 = arith.constant dense<0.000000e+00> : vector<32x96xf32>
    %8 = tpu.matmul %5, %7, %cst_9 {dimension_numbers = #tpu.dot_dimension_numbers<[1], [0], [0], [1], [0, 0, 1, 1], [], []>} : vector<32x32xf32>, vector<32x96xf32>, vector<32x96xf32> -> vector<32x96xf32>
    %c0_10 = arith.constant 0 : index
    %c0_11 = arith.constant 0 : index
    %c0_12 = arith.constant 0 : index
    %9 = vector.load %arg5[%c0_10, %c0_11, %c0_12] : memref<2x1x96xf32, #tpu.memory_space<vmem>>, vector<1x1x96xf32>
    %10 = vector.shape_cast %9 : vector<1x1x96xf32> to vector<1x96xf32>
    %11 = vector.broadcast %10 : vector<1x96xf32> to vector<32x96xf32>
    %12 = arith.addf %8, %11 : vector<32x96xf32>
    %c0_13 = arith.constant 0 : index
    %c0_14 = arith.constant 0 : index
    %c0_15 = arith.constant 0 : index
    %13 = vector.load %arg6[%c0_13, %c0_14, %c0_15] : memref<2x32x32xf32, #tpu.memory_space<vmem>>, vector<1x32x32xf32>
    %14 = vector.shape_cast %13 : vector<1x32x32xf32> to vector<32x32xf32>
    %15 = vector.extract_strided_slice %12 {offsets = [0, 0], sizes = [32, 8], strides = [1, 1]} : vector<32x96xf32> to vector<32x8xf32>
    %16 = vector.extract_strided_slice %12 {offsets = [0, 32], sizes = [32, 8], strides = [1, 1]} : vector<32x96xf32> to vector<32x8xf32>
    %17 = vector.extract_strided_slice %12 {offsets = [0, 64], sizes = [32, 8], strides = [1, 1]} : vector<32x96xf32> to vector<32x8xf32>
    %18 = vector.extract_strided_slice %15 {offsets = [0, 0], sizes = [16, 8], strides = [1, 1]} : vector<32x8xf32> to vector<16x8xf32>
    %19 = vector.extract_strided_slice %16 {offsets = [0, 0], sizes = [16, 8], strides = [1, 1]} : vector<32x8xf32> to vector<16x8xf32>
    %20 = vector.extract_strided_slice %17 {offsets = [0, 0], sizes = [16, 8], strides = [1, 1]} : vector<32x8xf32> to vector<16x8xf32>
    %cst_16 = arith.constant dense<0.000000e+00> : vector<16x16xf32>
    %21 = tpu.matmul %18, %19, %cst_16 {dimension_numbers = #tpu.dot_dimension_numbers<[1], [1], [0], [0], [0, 0, 1, 0], [], []>} : vector<16x8xf32>, vector<16x8xf32>, vector<16x16xf32> -> vector<16x16xf32>
    %cst_17 = arith.constant dense<0xFF800000> : vector<16xf32>
    %22 = vector.multi_reduction <maximumf>, %21, %cst_17 [1] : vector<16x16xf32> to vector<16xf32>
    %23 = vector.shape_cast %22 : vector<16xf32> to vector<16x1xf32>
    %24 = vector.broadcast %23 : vector<16x1xf32> to vector<16x16xf32>
    %25 = arith.subf %21, %24 : vector<16x16xf32>
    %26 = math.exp %25 : vector<16x16xf32>
    %cst_18 = arith.constant dense<0.000000e+00> : vector<16xf32>
    %27 = vector.multi_reduction <add>, %26, %cst_18 [1] : vector<16x16xf32> to vector<16xf32>
    %28 = vector.shape_cast %27 : vector<16xf32> to vector<16x1xf32>
    %29 = tpu.reciprocal %28 : vector<16x1xf32> -> vector<16x1xf32>
    %30 = vector.broadcast %29 : vector<16x1xf32> to vector<16x16xf32>
    %31 = arith.mulf %26, %30 : vector<16x16xf32>
    %cst_19 = arith.constant dense<0.000000e+00> : vector<16x8xf32>
    %32 = tpu.matmul %31, %20, %cst_19 {dimension_numbers = #tpu.dot_dimension_numbers<[1], [0], [0], [1], [0, 0, 1, 1], [], []>} : vector<16x16xf32>, vector<16x8xf32>, vector<16x8xf32> -> vector<16x8xf32>
    %33 = vector.extract_strided_slice %15 {offsets = [16, 0], sizes = [16, 8], strides = [1, 1]} : vector<32x8xf32> to vector<16x8xf32>
    %34 = vector.extract_strided_slice %16 {offsets = [16, 0], sizes = [16, 8], strides = [1, 1]} : vector<32x8xf32> to vector<16x8xf32>
    %35 = vector.extract_strided_slice %17 {offsets = [16, 0], sizes = [16, 8], strides = [1, 1]} : vector<32x8xf32> to vector<16x8xf32>
    %cst_20 = arith.constant dense<0.000000e+00> : vector<16x16xf32>
    %36 = tpu.matmul %33, %34, %cst_20 {dimension_numbers = #tpu.dot_dimension_numbers<[1], [1], [0], [0], [0, 0, 1, 0], [], []>} : vector<16x8xf32>, vector<16x8xf32>, vector<16x16xf32> -> vector<16x16xf32>
    %cst_21 = arith.constant dense<0xFF800000> : vector<16xf32>
    %37 = vector.multi_reduction <maximumf>, %36, %cst_21 [1] : vector<16x16xf32> to vector<16xf32>
    %38 = vector.shape_cast %37 : vector<16xf32> to vector<16x1xf32>
    %39 = vector.broadcast %38 : vector<16x1xf32> to vector<16x16xf32>
    %40 = arith.subf %36, %39 : vector<16x16xf32>
    %41 = math.exp %40 : vector<16x16xf32>
    %cst_22 = arith.constant dense<0.000000e+00> : vector<16xf32>
    %42 = vector.multi_reduction <add>, %41, %cst_22 [1] : vector<16x16xf32> to vector<16xf32>
    %43 = vector.shape_cast %42 : vector<16xf32> to vector<16x1xf32>
    %44 = tpu.reciprocal %43 : vector<16x1xf32> -> vector<16x1xf32>
    %45 = vector.broadcast %44 : vector<16x1xf32> to vector<16x16xf32>
    %46 = arith.mulf %41, %45 : vector<16x16xf32>
    %cst_23 = arith.constant dense<0.000000e+00> : vector<16x8xf32>
    %47 = tpu.matmul %46, %35, %cst_23 {dimension_numbers = #tpu.dot_dimension_numbers<[1], [0], [0], [1], [0, 0, 1, 1], [], []>} : vector<16x16xf32>, vector<16x8xf32>, vector<16x8xf32> -> vector<16x8xf32>
    %48 = tpu.concatenate %32, %47 in 0 : vector<16x8xf32>, vector<16x8xf32> -> vector<32x8xf32>
    %49 = vector.extract_strided_slice %14 {offsets = [0, 0], sizes = [8, 32], strides = [1, 1]} : vector<32x32xf32> to vector<8x32xf32>
    %cst_24 = arith.constant dense<0.000000e+00> : vector<32x32xf32>
    %50 = tpu.matmul %48, %49, %cst_24 {dimension_numbers = #tpu.dot_dimension_numbers<[1], [0], [0], [1], [0, 0, 1, 1], [], []>} : vector<32x8xf32>, vector<8x32xf32>, vector<32x32xf32> -> vector<32x32xf32>
    %51 = vector.extract_strided_slice %12 {offsets = [0, 8], sizes = [32, 8], strides = [1, 1]} : vector<32x96xf32> to vector<32x8xf32>
    %52 = vector.extract_strided_slice %12 {offsets = [0, 40], sizes = [32, 8], strides = [1, 1]} : vector<32x96xf32> to vector<32x8xf32>
    %53 = vector.extract_strided_slice %12 {offsets = [0, 72], sizes = [32, 8], strides = [1, 1]} : vector<32x96xf32> to vector<32x8xf32>
    %54 = vector.extract_strided_slice %51 {offsets = [0, 0], sizes = [16, 8], strides = [1, 1]} : vector<32x8xf32> to vector<16x8xf32>
    %55 = vector.extract_strided_slice %52 {offsets = [0, 0], sizes = [16, 8], strides = [1, 1]} : vector<32x8xf32> to vector<16x8xf32>
    %56 = vector.extract_strided_slice %53 {offsets = [0, 0], sizes = [16, 8], strides = [1, 1]} : vector<32x8xf32> to vector<16x8xf32>
    %cst_25 = arith.constant dense<0.000000e+00> : vector<16x16xf32>
    %57 = tpu.matmul %54, %55, %cst_25 {dimension_numbers = #tpu.dot_dimension_numbers<[1], [1], [0], [0], [0, 0, 1, 0], [], []>} : vector<16x8xf32>, vector<16x8xf32>, vector<16x16xf32> -> vector<16x16xf32>
    %cst_26 = arith.constant dense<0xFF800000> : vector<16xf32>
    %58 = vector.multi_reduction <maximumf>, %57, %cst_26 [1] : vector<16x16xf32> to vector<16xf32>
    %59 = vector.shape_cast %58 : vector<16xf32> to vector<16x1xf32>
    %60 = vector.broadcast %59 : vector<16x1xf32> to vector<16x16xf32>
    %61 = arith.subf %57, %60 : vector<16x16xf32>
    %62 = math.exp %61 : vector<16x16xf32>
    %cst_27 = arith.constant dense<0.000000e+00> : vector<16xf32>
    %63 = vector.multi_reduction <add>, %62, %cst_27 [1] : vector<16x16xf32> to vector<16xf32>
    %64 = vector.shape_cast %63 : vector<16xf32> to vector<16x1xf32>
    %65 = tpu.reciprocal %64 : vector<16x1xf32> -> vector<16x1xf32>
    %66 = vector.broadcast %65 : vector<16x1xf32> to vector<16x16xf32>
    %67 = arith.mulf %62, %66 : vector<16x16xf32>
    %cst_28 = arith.constant dense<0.000000e+00> : vector<16x8xf32>
    %68 = tpu.matmul %67, %56, %cst_28 {dimension_numbers = #tpu.dot_dimension_numbers<[1], [0], [0], [1], [0, 0, 1, 1], [], []>} : vector<16x16xf32>, vector<16x8xf32>, vector<16x8xf32> -> vector<16x8xf32>
    %69 = vector.extract_strided_slice %51 {offsets = [16, 0], sizes = [16, 8], strides = [1, 1]} : vector<32x8xf32> to vector<16x8xf32>
    %70 = vector.extract_strided_slice %52 {offsets = [16, 0], sizes = [16, 8], strides = [1, 1]} : vector<32x8xf32> to vector<16x8xf32>
    %71 = vector.extract_strided_slice %53 {offsets = [16, 0], sizes = [16, 8], strides = [1, 1]} : vector<32x8xf32> to vector<16x8xf32>
    %cst_29 = arith.constant dense<0.000000e+00> : vector<16x16xf32>
    %72 = tpu.matmul %69, %70, %cst_29 {dimension_numbers = #tpu.dot_dimension_numbers<[1], [1], [0], [0], [0, 0, 1, 0], [], []>} : vector<16x8xf32>, vector<16x8xf32>, vector<16x16xf32> -> vector<16x16xf32>
    %cst_30 = arith.constant dense<0xFF800000> : vector<16xf32>
    %73 = vector.multi_reduction <maximumf>, %72, %cst_30 [1] : vector<16x16xf32> to vector<16xf32>
    %74 = vector.shape_cast %73 : vector<16xf32> to vector<16x1xf32>
    %75 = vector.broadcast %74 : vector<16x1xf32> to vector<16x16xf32>
    %76 = arith.subf %72, %75 : vector<16x16xf32>
    %77 = math.exp %76 : vector<16x16xf32>
    %cst_31 = arith.constant dense<0.000000e+00> : vector<16xf32>
    %78 = vector.multi_reduction <add>, %77, %cst_31 [1] : vector<16x16xf32> to vector<16xf32>
    %79 = vector.shape_cast %78 : vector<16xf32> to vector<16x1xf32>
    %80 = tpu.reciprocal %79 : vector<16x1xf32> -> vector<16x1xf32>
    %81 = vector.broadcast %80 : vector<16x1xf32> to vector<16x16xf32>
    %82 = arith.mulf %77, %81 : vector<16x16xf32>
    %cst_32 = arith.constant dense<0.000000e+00> : vector<16x8xf32>
    %83 = tpu.matmul %82, %71, %cst_32 {dimension_numbers = #tpu.dot_dimension_numbers<[1], [0], [0], [1], [0, 0, 1, 1], [], []>} : vector<16x16xf32>, vector<16x8xf32>, vector<16x8xf32> -> vector<16x8xf32>
    %84 = tpu.concatenate %68, %83 in 0 : vector<16x8xf32>, vector<16x8xf32> -> vector<32x8xf32>
    %85 = vector.extract_strided_slice %14 {offsets = [8, 0], sizes = [8, 32], strides = [1, 1]} : vector<32x32xf32> to vector<8x32xf32>
    %cst_33 = arith.constant dense<0.000000e+00> : vector<32x32xf32>
    %86 = tpu.matmul %84, %85, %cst_33 {dimension_numbers = #tpu.dot_dimension_numbers<[1], [0], [0], [1], [0, 0, 1, 1], [], []>} : vector<32x8xf32>, vector<8x32xf32>, vector<32x32xf32> -> vector<32x32xf32>
    %87 = arith.addf %50, %86 : vector<32x32xf32>
    %88 = vector.extract_strided_slice %12 {offsets = [0, 16], sizes = [32, 8], strides = [1, 1]} : vector<32x96xf32> to vector<32x8xf32>
    %89 = vector.extract_strided_slice %12 {offsets = [0, 48], sizes = [32, 8], strides = [1, 1]} : vector<32x96xf32> to vector<32x8xf32>
    %90 = vector.extract_strided_slice %12 {offsets = [0, 80], sizes = [32, 8], strides = [1, 1]} : vector<32x96xf32> to vector<32x8xf32>
    %91 = vector.extract_strided_slice %88 {offsets = [0, 0], sizes = [16, 8], strides = [1, 1]} : vector<32x8xf32> to vector<16x8xf32>
    %92 = vector.extract_strided_slice %89 {offsets = [0, 0], sizes = [16, 8], strides = [1, 1]} : vector<32x8xf32> to vector<16x8xf32>
    %93 = vector.extract_strided_slice %90 {offsets = [0, 0], sizes = [16, 8], strides = [1, 1]} : vector<32x8xf32> to vector<16x8xf32>
    %cst_34 = arith.constant dense<0.000000e+00> : vector<16x16xf32>
    %94 = tpu.matmul %91, %92, %cst_34 {dimension_numbers = #tpu.dot_dimension_numbers<[1], [1], [0], [0], [0, 0, 1, 0], [], []>} : vector<16x8xf32>, vector<16x8xf32>, vector<16x16xf32> -> vector<16x16xf32>
    %cst_35 = arith.constant dense<0xFF800000> : vector<16xf32>
    %95 = vector.multi_reduction <maximumf>, %94, %cst_35 [1] : vector<16x16xf32> to vector<16xf32>
    %96 = vector.shape_cast %95 : vector<16xf32> to vector<16x1xf32>
    %97 = vector.broadcast %96 : vector<16x1xf32> to vector<16x16xf32>
    %98 = arith.subf %94, %97 : vector<16x16xf32>
    %99 = math.exp %98 : vector<16x16xf32>
    %cst_36 = arith.constant dense<0.000000e+00> : vector<16xf32>
    %100 = vector.multi_reduction <add>, %99, %cst_36 [1] : vector<16x16xf32> to vector<16xf32>
    %101 = vector.shape_cast %100 : vector<16xf32> to vector<16x1xf32>
    %102 = tpu.reciprocal %101 : vector<16x1xf32> -> vector<16x1xf32>
    %103 = vector.broadcast %102 : vector<16x1xf32> to vector<16x16xf32>
    %104 = arith.mulf %99, %103 : vector<16x16xf32>
    %cst_37 = arith.constant dense<0.000000e+00> : vector<16x8xf32>
    %105 = tpu.matmul %104, %93, %cst_37 {dimension_numbers = #tpu.dot_dimension_numbers<[1], [0], [0], [1], [0, 0, 1, 1], [], []>} : vector<16x16xf32>, vector<16x8xf32>, vector<16x8xf32> -> vector<16x8xf32>
    %106 = vector.extract_strided_slice %88 {offsets = [16, 0], sizes = [16, 8], strides = [1, 1]} : vector<32x8xf32> to vector<16x8xf32>
    %107 = vector.extract_strided_slice %89 {offsets = [16, 0], sizes = [16, 8], strides = [1, 1]} : vector<32x8xf32> to vector<16x8xf32>
    %108 = vector.extract_strided_slice %90 {offsets = [16, 0], sizes = [16, 8], strides = [1, 1]} : vector<32x8xf32> to vector<16x8xf32>
    %cst_38 = arith.constant dense<0.000000e+00> : vector<16x16xf32>
    %109 = tpu.matmul %106, %107, %cst_38 {dimension_numbers = #tpu.dot_dimension_numbers<[1], [1], [0], [0], [0, 0, 1, 0], [], []>} : vector<16x8xf32>, vector<16x8xf32>, vector<16x16xf32> -> vector<16x16xf32>
    %cst_39 = arith.constant dense<0xFF800000> : vector<16xf32>
    %110 = vector.multi_reduction <maximumf>, %109, %cst_39 [1] : vector<16x16xf32> to vector<16xf32>
    %111 = vector.shape_cast %110 : vector<16xf32> to vector<16x1xf32>
    %112 = vector.broadcast %111 : vector<16x1xf32> to vector<16x16xf32>
    %113 = arith.subf %109, %112 : vector<16x16xf32>
    %114 = math.exp %113 : vector<16x16xf32>
    %cst_40 = arith.constant dense<0.000000e+00> : vector<16xf32>
    %115 = vector.multi_reduction <add>, %114, %cst_40 [1] : vector<16x16xf32> to vector<16xf32>
    %116 = vector.shape_cast %115 : vector<16xf32> to vector<16x1xf32>
    %117 = tpu.reciprocal %116 : vector<16x1xf32> -> vector<16x1xf32>
    %118 = vector.broadcast %117 : vector<16x1xf32> to vector<16x16xf32>
    %119 = arith.mulf %114, %118 : vector<16x16xf32>
    %cst_41 = arith.constant dense<0.000000e+00> : vector<16x8xf32>
    %120 = tpu.matmul %119, %108, %cst_41 {dimension_numbers = #tpu.dot_dimension_numbers<[1], [0], [0], [1], [0, 0, 1, 1], [], []>} : vector<16x16xf32>, vector<16x8xf32>, vector<16x8xf32> -> vector<16x8xf32>
    %121 = tpu.concatenate %105, %120 in 0 : vector<16x8xf32>, vector<16x8xf32> -> vector<32x8xf32>
    %122 = vector.extract_strided_slice %14 {offsets = [16, 0], sizes = [8, 32], strides = [1, 1]} : vector<32x32xf32> to vector<8x32xf32>
    %cst_42 = arith.constant dense<0.000000e+00> : vector<32x32xf32>
    %123 = tpu.matmul %121, %122, %cst_42 {dimension_numbers = #tpu.dot_dimension_numbers<[1], [0], [0], [1], [0, 0, 1, 1], [], []>} : vector<32x8xf32>, vector<8x32xf32>, vector<32x32xf32> -> vector<32x32xf32>
    %124 = arith.addf %87, %123 : vector<32x32xf32>
    %125 = vector.extract_strided_slice %12 {offsets = [0, 24], sizes = [32, 8], strides = [1, 1]} : vector<32x96xf32> to vector<32x8xf32>
    %126 = vector.extract_strided_slice %12 {offsets = [0, 56], sizes = [32, 8], strides = [1, 1]} : vector<32x96xf32> to vector<32x8xf32>
    %127 = vector.extract_strided_slice %12 {offsets = [0, 88], sizes = [32, 8], strides = [1, 1]} : vector<32x96xf32> to vector<32x8xf32>
    %128 = vector.extract_strided_slice %125 {offsets = [0, 0], sizes = [16, 8], strides = [1, 1]} : vector<32x8xf32> to vector<16x8xf32>
    %129 = vector.extract_strided_slice %126 {offsets = [0, 0], sizes = [16, 8], strides = [1, 1]} : vector<32x8xf32> to vector<16x8xf32>
    %130 = vector.extract_strided_slice %127 {offsets = [0, 0], sizes = [16, 8], strides = [1, 1]} : vector<32x8xf32> to vector<16x8xf32>
    %cst_43 = arith.constant dense<0.000000e+00> : vector<16x16xf32>
    %131 = tpu.matmul %128, %129, %cst_43 {dimension_numbers = #tpu.dot_dimension_numbers<[1], [1], [0], [0], [0, 0, 1, 0], [], []>} : vector<16x8xf32>, vector<16x8xf32>, vector<16x16xf32> -> vector<16x16xf32>
    %cst_44 = arith.constant dense<0xFF800000> : vector<16xf32>
    %132 = vector.multi_reduction <maximumf>, %131, %cst_44 [1] : vector<16x16xf32> to vector<16xf32>
    %133 = vector.shape_cast %132 : vector<16xf32> to vector<16x1xf32>
    %134 = vector.broadcast %133 : vector<16x1xf32> to vector<16x16xf32>
    %135 = arith.subf %131, %134 : vector<16x16xf32>
    %136 = math.exp %135 : vector<16x16xf32>
    %cst_45 = arith.constant dense<0.000000e+00> : vector<16xf32>
    %137 = vector.multi_reduction <add>, %136, %cst_45 [1] : vector<16x16xf32> to vector<16xf32>
    %138 = vector.shape_cast %137 : vector<16xf32> to vector<16x1xf32>
    %139 = tpu.reciprocal %138 : vector<16x1xf32> -> vector<16x1xf32>
    %140 = vector.broadcast %139 : vector<16x1xf32> to vector<16x16xf32>
    %141 = arith.mulf %136, %140 : vector<16x16xf32>
    %cst_46 = arith.constant dense<0.000000e+00> : vector<16x8xf32>
    %142 = tpu.matmul %141, %130, %cst_46 {dimension_numbers = #tpu.dot_dimension_numbers<[1], [0], [0], [1], [0, 0, 1, 1], [], []>} : vector<16x16xf32>, vector<16x8xf32>, vector<16x8xf32> -> vector<16x8xf32>
    %143 = vector.extract_strided_slice %125 {offsets = [16, 0], sizes = [16, 8], strides = [1, 1]} : vector<32x8xf32> to vector<16x8xf32>
    %144 = vector.extract_strided_slice %126 {offsets = [16, 0], sizes = [16, 8], strides = [1, 1]} : vector<32x8xf32> to vector<16x8xf32>
    %145 = vector.extract_strided_slice %127 {offsets = [16, 0], sizes = [16, 8], strides = [1, 1]} : vector<32x8xf32> to vector<16x8xf32>
    %cst_47 = arith.constant dense<0.000000e+00> : vector<16x16xf32>
    %146 = tpu.matmul %143, %144, %cst_47 {dimension_numbers = #tpu.dot_dimension_numbers<[1], [1], [0], [0], [0, 0, 1, 0], [], []>} : vector<16x8xf32>, vector<16x8xf32>, vector<16x16xf32> -> vector<16x16xf32>
    %cst_48 = arith.constant dense<0xFF800000> : vector<16xf32>
    %147 = vector.multi_reduction <maximumf>, %146, %cst_48 [1] : vector<16x16xf32> to vector<16xf32>
    %148 = vector.shape_cast %147 : vector<16xf32> to vector<16x1xf32>
    %149 = vector.broadcast %148 : vector<16x1xf32> to vector<16x16xf32>
    %150 = arith.subf %146, %149 : vector<16x16xf32>
    %151 = math.exp %150 : vector<16x16xf32>
    %cst_49 = arith.constant dense<0.000000e+00> : vector<16xf32>
    %152 = vector.multi_reduction <add>, %151, %cst_49 [1] : vector<16x16xf32> to vector<16xf32>
    %153 = vector.shape_cast %152 : vector<16xf32> to vector<16x1xf32>
    %154 = tpu.reciprocal %153 : vector<16x1xf32> -> vector<16x1xf32>
    %155 = vector.broadcast %154 : vector<16x1xf32> to vector<16x16xf32>
    %156 = arith.mulf %151, %155 : vector<16x16xf32>
    %cst_50 = arith.constant dense<0.000000e+00> : vector<16x8xf32>
    %157 = tpu.matmul %156, %145, %cst_50 {dimension_numbers = #tpu.dot_dimension_numbers<[1], [0], [0], [1], [0, 0, 1, 1], [], []>} : vector<16x16xf32>, vector<16x8xf32>, vector<16x8xf32> -> vector<16x8xf32>
    %158 = tpu.concatenate %142, %157 in 0 : vector<16x8xf32>, vector<16x8xf32> -> vector<32x8xf32>
    %159 = vector.extract_strided_slice %14 {offsets = [24, 0], sizes = [8, 32], strides = [1, 1]} : vector<32x32xf32> to vector<8x32xf32>
    %cst_51 = arith.constant dense<0.000000e+00> : vector<32x32xf32>
    %160 = tpu.matmul %158, %159, %cst_51 {dimension_numbers = #tpu.dot_dimension_numbers<[1], [0], [0], [1], [0, 0, 1, 1], [], []>} : vector<32x8xf32>, vector<8x32xf32>, vector<32x32xf32> -> vector<32x32xf32>
    %161 = arith.addf %124, %160 : vector<32x32xf32>
    %162 = arith.addf %5, %161 : vector<32x32xf32>
    %c0_52 = arith.constant 0 : index
    %c0_53 = arith.constant 0 : index
    %c0_54 = arith.constant 0 : index
    %163 = vector.load %arg7[%c0_52, %c0_53, %c0_54] : memref<2x1x32xf32, #tpu.memory_space<vmem>>, vector<1x1x32xf32>
    %164 = vector.shape_cast %163 : vector<1x1x32xf32> to vector<1x32xf32>
    %165 = vector.broadcast %164 : vector<1x32xf32> to vector<32x32xf32>
    %166 = arith.addf %162, %165 : vector<32x32xf32>
    %c0_55 = arith.constant 0 : index
    %c0_56 = arith.constant 0 : index
    %c0_57 = arith.constant 0 : index
    %167 = vector.load %arg8[%c0_55, %c0_56, %c0_57] : memref<2x1x32xf32, #tpu.memory_space<vmem>>, vector<1x1x32xf32>
    %168 = vector.shape_cast %167 : vector<1x1x32xf32> to vector<1x32xf32>
    %c0_58 = arith.constant 0 : index
    %c0_59 = arith.constant 0 : index
    %c0_60 = arith.constant 0 : index
    %169 = vector.load %arg9[%c0_58, %c0_59, %c0_60] : memref<2x1x32xf32, #tpu.memory_space<vmem>>, vector<1x1x32xf32>
    %170 = vector.shape_cast %169 : vector<1x1x32xf32> to vector<1x32xf32>
    %cst_61 = arith.constant dense<0.000000e+00> : vector<32xf32>
    %171 = vector.multi_reduction <add>, %166, %cst_61 [1] : vector<32x32xf32> to vector<32xf32>
    %172 = vector.shape_cast %171 : vector<32xf32> to vector<32x1xf32>
    %cst_62 = arith.constant 3.200000e+01 : f32
    %173 = vector.broadcast %cst_62 : f32 to vector<32x1xf32>
    %174 = arith.divf %172, %173 : vector<32x1xf32>
    %175 = vector.broadcast %174 : vector<32x1xf32> to vector<32x32xf32>
    %176 = arith.subf %166, %175 : vector<32x32xf32>
    %177 = arith.mulf %176, %176 : vector<32x32xf32>
    %cst_63 = arith.constant dense<0.000000e+00> : vector<32xf32>
    %178 = vector.multi_reduction <add>, %177, %cst_63 [1] : vector<32x32xf32> to vector<32xf32>
    %179 = vector.shape_cast %178 : vector<32xf32> to vector<32x1xf32>
    %cst_64 = arith.constant 3.200000e+01 : f32
    %180 = vector.broadcast %cst_64 : f32 to vector<32x1xf32>
    %181 = arith.divf %179, %180 : vector<32x1xf32>
    %182 = vector.broadcast %174 : vector<32x1xf32> to vector<32x32xf32>
    %183 = arith.subf %166, %182 : vector<32x32xf32>
    %cst_65 = arith.constant 9.99999974E-6 : f32
    %184 = vector.broadcast %cst_65 : f32 to vector<32x1xf32>
    %185 = arith.addf %181, %184 : vector<32x1xf32>
    %186 = math.rsqrt %185 : vector<32x1xf32>
    %187 = vector.broadcast %186 : vector<32x1xf32> to vector<32x32xf32>
    %188 = arith.mulf %183, %187 : vector<32x32xf32>
    %189 = vector.broadcast %168 : vector<1x32xf32> to vector<32x32xf32>
    %190 = arith.mulf %188, %189 : vector<32x32xf32>
    %191 = vector.broadcast %170 : vector<1x32xf32> to vector<32x32xf32>
    %192 = arith.addf %190, %191 : vector<32x32xf32>
    %c0_66 = arith.constant 0 : index
    %c0_67 = arith.constant 0 : index
    %c0_68 = arith.constant 0 : index
    %193 = vector.load %arg10[%c0_66, %c0_67, %c0_68] : memref<2x32x32xf32, #tpu.memory_space<vmem>>, vector<1x32x32xf32>
    %194 = vector.shape_cast %193 : vector<1x32x32xf32> to vector<32x32xf32>
    %cst_69 = arith.constant dense<0.000000e+00> : vector<32x32xf32>
    %195 = tpu.matmul %192, %194, %cst_69 {dimension_numbers = #tpu.dot_dimension_numbers<[1], [0], [0], [1], [0, 0, 1, 1], [], []>} : vector<32x32xf32>, vector<32x32xf32>, vector<32x32xf32> -> vector<32x32xf32>
    %c0_70 = arith.constant 0 : index
    %c0_71 = arith.constant 0 : index
    %c0_72 = arith.constant 0 : index
    %196 = vector.load %arg11[%c0_70, %c0_71, %c0_72] : memref<2x1x32xf32, #tpu.memory_space<vmem>>, vector<1x1x32xf32>
    %197 = vector.shape_cast %196 : vector<1x1x32xf32> to vector<1x32xf32>
    %198 = vector.broadcast %197 : vector<1x32xf32> to vector<32x32xf32>
    %199 = arith.addf %195, %198 : vector<32x32xf32>
    %cst_73 = arith.constant 0.000000e+00 : f32
    %200 = vector.broadcast %cst_73 : f32 to vector<32x32xf32>
    %201 = arith.maximumf %199, %200 : vector<32x32xf32>
    %c0_74 = arith.constant 0 : index
    %c0_75 = arith.constant 0 : index
    %c0_76 = arith.constant 0 : index
    %202 = vector.load %arg12[%c0_74, %c0_75, %c0_76] : memref<2x32x32xf32, #tpu.memory_space<vmem>>, vector<1x32x32xf32>
    %203 = vector.shape_cast %202 : vector<1x32x32xf32> to vector<32x32xf32>
    %cst_77 = arith.constant dense<0.000000e+00> : vector<32x32xf32>
    %204 = tpu.matmul %201, %203, %cst_77 {dimension_numbers = #tpu.dot_dimension_numbers<[1], [0], [0], [1], [0, 0, 1, 1], [], []>} : vector<32x32xf32>, vector<32x32xf32>, vector<32x32xf32> -> vector<32x32xf32>
    %c0_78 = arith.constant 0 : index
    %c0_79 = arith.constant 0 : index
    %c0_80 = arith.constant 0 : index
    %205 = vector.load %arg13[%c0_78, %c0_79, %c0_80] : memref<2x1x32xf32, #tpu.memory_space<vmem>>, vector<1x1x32xf32>
    %206 = vector.shape_cast %205 : vector<1x1x32xf32> to vector<1x32xf32>
    %207 = vector.broadcast %206 : vector<1x32xf32> to vector<32x32xf32>
    %208 = arith.addf %204, %207 : vector<32x32xf32>
    %209 = arith.addf %192, %208 : vector<32x32xf32>
    %c0_81 = arith.constant 0 : index
    %c0_82 = arith.constant 0 : index
    %c0_83 = arith.constant 0 : index
    %210 = vector.load %arg14[%c0_81, %c0_82, %c0_83] : memref<2x1x32xf32, #tpu.memory_space<vmem>>, vector<1x1x32xf32>
    %211 = vector.shape_cast %210 : vector<1x1x32xf32> to vector<1x32xf32>
    %c0_84 = arith.constant 0 : index
    %c0_85 = arith.constant 0 : index
    %c0_86 = arith.constant 0 : index
    %212 = vector.load %arg15[%c0_84, %c0_85, %c0_86] : memref<2x1x32xf32, #tpu.memory_space<vmem>>, vector<1x1x32xf32>
    %213 = vector.shape_cast %212 : vector<1x1x32xf32> to vector<1x32xf32>
    %cst_87 = arith.constant dense<0.000000e+00> : vector<32xf32>
    %214 = vector.multi_reduction <add>, %209, %cst_87 [1] : vector<32x32xf32> to vector<32xf32>
    %215 = vector.shape_cast %214 : vector<32xf32> to vector<32x1xf32>
    %cst_88 = arith.constant 3.200000e+01 : f32
    %216 = vector.broadcast %cst_88 : f32 to vector<32x1xf32>
    %217 = arith.divf %215, %216 : vector<32x1xf32>
    %218 = vector.broadcast %217 : vector<32x1xf32> to vector<32x32xf32>
    %219 = arith.subf %209, %218 : vector<32x32xf32>
    %220 = arith.mulf %219, %219 : vector<32x32xf32>
    %cst_89 = arith.constant dense<0.000000e+00> : vector<32xf32>
    %221 = vector.multi_reduction <add>, %220, %cst_89 [1] : vector<32x32xf32> to vector<32xf32>
    %222 = vector.shape_cast %221 : vector<32xf32> to vector<32x1xf32>
    %cst_90 = arith.constant 3.200000e+01 : f32
    %223 = vector.broadcast %cst_90 : f32 to vector<32x1xf32>
    %224 = arith.divf %222, %223 : vector<32x1xf32>
    %225 = vector.broadcast %217 : vector<32x1xf32> to vector<32x32xf32>
    %226 = arith.subf %209, %225 : vector<32x32xf32>
    %cst_91 = arith.constant 9.99999974E-6 : f32
    %227 = vector.broadcast %cst_91 : f32 to vector<32x1xf32>
    %228 = arith.addf %224, %227 : vector<32x1xf32>
    %229 = math.rsqrt %228 : vector<32x1xf32>
    %230 = vector.broadcast %229 : vector<32x1xf32> to vector<32x32xf32>
    %231 = arith.mulf %226, %230 : vector<32x32xf32>
    %232 = vector.broadcast %211 : vector<1x32xf32> to vector<32x32xf32>
    %233 = arith.mulf %231, %232 : vector<32x32xf32>
    %234 = vector.broadcast %213 : vector<1x32xf32> to vector<32x32xf32>
    %235 = arith.addf %233, %234 : vector<32x32xf32>
    %c1 = arith.constant 1 : index
    %c0_92 = arith.constant 0 : index
    %c0_93 = arith.constant 0 : index
    %236 = vector.load %arg4[%c1, %c0_92, %c0_93] : memref<2x32x96xf32, #tpu.memory_space<vmem>>, vector<1x32x96xf32>
    %237 = vector.shape_cast %236 : vector<1x32x96xf32> to vector<32x96xf32>
    %cst_94 = arith.constant dense<0.000000e+00> : vector<32x96xf32>
    %238 = tpu.matmul %235, %237, %cst_94 {dimension_numbers = #tpu.dot_dimension_numbers<[1], [0], [0], [1], [0, 0, 1, 1], [], []>} : vector<32x32xf32>, vector<32x96xf32>, vector<32x96xf32> -> vector<32x96xf32>
    %c1_95 = arith.constant 1 : index
    %c0_96 = arith.constant 0 : index
    %c0_97 = arith.constant 0 : index
    %239 = vector.load %arg5[%c1_95, %c0_96, %c0_97] : memref<2x1x96xf32, #tpu.memory_space<vmem>>, vector<1x1x96xf32>
    %240 = vector.shape_cast %239 : vector<1x1x96xf32> to vector<1x96xf32>
    %241 = vector.broadcast %240 : vector<1x96xf32> to vector<32x96xf32>
    %242 = arith.addf %238, %241 : vector<32x96xf32>
    %c1_98 = arith.constant 1 : index
    %c0_99 = arith.constant 0 : index
    %c0_100 = arith.constant 0 : index
    %243 = vector.load %arg6[%c1_98, %c0_99, %c0_100] : memref<2x32x32xf32, #tpu.memory_space<vmem>>, vector<1x32x32xf32>
    %244 = vector.shape_cast %243 : vector<1x32x32xf32> to vector<32x32xf32>
    %245 = vector.extract_strided_slice %242 {offsets = [0, 0], sizes = [32, 8], strides = [1, 1]} : vector<32x96xf32> to vector<32x8xf32>
    %246 = vector.extract_strided_slice %242 {offsets = [0, 32], sizes = [32, 8], strides = [1, 1]} : vector<32x96xf32> to vector<32x8xf32>
    %247 = vector.extract_strided_slice %242 {offsets = [0, 64], sizes = [32, 8], strides = [1, 1]} : vector<32x96xf32> to vector<32x8xf32>
    %248 = vector.extract_strided_slice %245 {offsets = [0, 0], sizes = [16, 8], strides = [1, 1]} : vector<32x8xf32> to vector<16x8xf32>
    %249 = vector.extract_strided_slice %246 {offsets = [0, 0], sizes = [16, 8], strides = [1, 1]} : vector<32x8xf32> to vector<16x8xf32>
    %250 = vector.extract_strided_slice %247 {offsets = [0, 0], sizes = [16, 8], strides = [1, 1]} : vector<32x8xf32> to vector<16x8xf32>
    %cst_101 = arith.constant dense<0.000000e+00> : vector<16x16xf32>
    %251 = tpu.matmul %248, %249, %cst_101 {dimension_numbers = #tpu.dot_dimension_numbers<[1], [1], [0], [0], [0, 0, 1, 0], [], []>} : vector<16x8xf32>, vector<16x8xf32>, vector<16x16xf32> -> vector<16x16xf32>
    %cst_102 = arith.constant dense<0xFF800000> : vector<16xf32>
    %252 = vector.multi_reduction <maximumf>, %251, %cst_102 [1] : vector<16x16xf32> to vector<16xf32>
    %253 = vector.shape_cast %252 : vector<16xf32> to vector<16x1xf32>
    %254 = vector.broadcast %253 : vector<16x1xf32> to vector<16x16xf32>
    %255 = arith.subf %251, %254 : vector<16x16xf32>
    %256 = math.exp %255 : vector<16x16xf32>
    %cst_103 = arith.constant dense<0.000000e+00> : vector<16xf32>
    %257 = vector.multi_reduction <add>, %256, %cst_103 [1] : vector<16x16xf32> to vector<16xf32>
    %258 = vector.shape_cast %257 : vector<16xf32> to vector<16x1xf32>
    %259 = tpu.reciprocal %258 : vector<16x1xf32> -> vector<16x1xf32>
    %260 = vector.broadcast %259 : vector<16x1xf32> to vector<16x16xf32>
    %261 = arith.mulf %256, %260 : vector<16x16xf32>
    %cst_104 = arith.constant dense<0.000000e+00> : vector<16x8xf32>
    %262 = tpu.matmul %261, %250, %cst_104 {dimension_numbers = #tpu.dot_dimension_numbers<[1], [0], [0], [1], [0, 0, 1, 1], [], []>} : vector<16x16xf32>, vector<16x8xf32>, vector<16x8xf32> -> vector<16x8xf32>
    %263 = vector.extract_strided_slice %245 {offsets = [16, 0], sizes = [16, 8], strides = [1, 1]} : vector<32x8xf32> to vector<16x8xf32>
    %264 = vector.extract_strided_slice %246 {offsets = [16, 0], sizes = [16, 8], strides = [1, 1]} : vector<32x8xf32> to vector<16x8xf32>
    %265 = vector.extract_strided_slice %247 {offsets = [16, 0], sizes = [16, 8], strides = [1, 1]} : vector<32x8xf32> to vector<16x8xf32>
    %cst_105 = arith.constant dense<0.000000e+00> : vector<16x16xf32>
    %266 = tpu.matmul %263, %264, %cst_105 {dimension_numbers = #tpu.dot_dimension_numbers<[1], [1], [0], [0], [0, 0, 1, 0], [], []>} : vector<16x8xf32>, vector<16x8xf32>, vector<16x16xf32> -> vector<16x16xf32>
    %cst_106 = arith.constant dense<0xFF800000> : vector<16xf32>
    %267 = vector.multi_reduction <maximumf>, %266, %cst_106 [1] : vector<16x16xf32> to vector<16xf32>
    %268 = vector.shape_cast %267 : vector<16xf32> to vector<16x1xf32>
    %269 = vector.broadcast %268 : vector<16x1xf32> to vector<16x16xf32>
    %270 = arith.subf %266, %269 : vector<16x16xf32>
    %271 = math.exp %270 : vector<16x16xf32>
    %cst_107 = arith.constant dense<0.000000e+00> : vector<16xf32>
    %272 = vector.multi_reduction <add>, %271, %cst_107 [1] : vector<16x16xf32> to vector<16xf32>
    %273 = vector.shape_cast %272 : vector<16xf32> to vector<16x1xf32>
    %274 = tpu.reciprocal %273 : vector<16x1xf32> -> vector<16x1xf32>
    %275 = vector.broadcast %274 : vector<16x1xf32> to vector<16x16xf32>
    %276 = arith.mulf %271, %275 : vector<16x16xf32>
    %cst_108 = arith.constant dense<0.000000e+00> : vector<16x8xf32>
    %277 = tpu.matmul %276, %265, %cst_108 {dimension_numbers = #tpu.dot_dimension_numbers<[1], [0], [0], [1], [0, 0, 1, 1], [], []>} : vector<16x16xf32>, vector<16x8xf32>, vector<16x8xf32> -> vector<16x8xf32>
    %278 = tpu.concatenate %262, %277 in 0 : vector<16x8xf32>, vector<16x8xf32> -> vector<32x8xf32>
    %279 = vector.extract_strided_slice %244 {offsets = [0, 0], sizes = [8, 32], strides = [1, 1]} : vector<32x32xf32> to vector<8x32xf32>
    %cst_109 = arith.constant dense<0.000000e+00> : vector<32x32xf32>
    %280 = tpu.matmul %278, %279, %cst_109 {dimension_numbers = #tpu.dot_dimension_numbers<[1], [0], [0], [1], [0, 0, 1, 1], [], []>} : vector<32x8xf32>, vector<8x32xf32>, vector<32x32xf32> -> vector<32x32xf32>
    %281 = vector.extract_strided_slice %242 {offsets = [0, 8], sizes = [32, 8], strides = [1, 1]} : vector<32x96xf32> to vector<32x8xf32>
    %282 = vector.extract_strided_slice %242 {offsets = [0, 40], sizes = [32, 8], strides = [1, 1]} : vector<32x96xf32> to vector<32x8xf32>
    %283 = vector.extract_strided_slice %242 {offsets = [0, 72], sizes = [32, 8], strides = [1, 1]} : vector<32x96xf32> to vector<32x8xf32>
    %284 = vector.extract_strided_slice %281 {offsets = [0, 0], sizes = [16, 8], strides = [1, 1]} : vector<32x8xf32> to vector<16x8xf32>
    %285 = vector.extract_strided_slice %282 {offsets = [0, 0], sizes = [16, 8], strides = [1, 1]} : vector<32x8xf32> to vector<16x8xf32>
    %286 = vector.extract_strided_slice %283 {offsets = [0, 0], sizes = [16, 8], strides = [1, 1]} : vector<32x8xf32> to vector<16x8xf32>
    %cst_110 = arith.constant dense<0.000000e+00> : vector<16x16xf32>
    %287 = tpu.matmul %284, %285, %cst_110 {dimension_numbers = #tpu.dot_dimension_numbers<[1], [1], [0], [0], [0, 0, 1, 0], [], []>} : vector<16x8xf32>, vector<16x8xf32>, vector<16x16xf32> -> vector<16x16xf32>
    %cst_111 = arith.constant dense<0xFF800000> : vector<16xf32>
    %288 = vector.multi_reduction <maximumf>, %287, %cst_111 [1] : vector<16x16xf32> to vector<16xf32>
    %289 = vector.shape_cast %288 : vector<16xf32> to vector<16x1xf32>
    %290 = vector.broadcast %289 : vector<16x1xf32> to vector<16x16xf32>
    %291 = arith.subf %287, %290 : vector<16x16xf32>
    %292 = math.exp %291 : vector<16x16xf32>
    %cst_112 = arith.constant dense<0.000000e+00> : vector<16xf32>
    %293 = vector.multi_reduction <add>, %292, %cst_112 [1] : vector<16x16xf32> to vector<16xf32>
    %294 = vector.shape_cast %293 : vector<16xf32> to vector<16x1xf32>
    %295 = tpu.reciprocal %294 : vector<16x1xf32> -> vector<16x1xf32>
    %296 = vector.broadcast %295 : vector<16x1xf32> to vector<16x16xf32>
    %297 = arith.mulf %292, %296 : vector<16x16xf32>
    %cst_113 = arith.constant dense<0.000000e+00> : vector<16x8xf32>
    %298 = tpu.matmul %297, %286, %cst_113 {dimension_numbers = #tpu.dot_dimension_numbers<[1], [0], [0], [1], [0, 0, 1, 1], [], []>} : vector<16x16xf32>, vector<16x8xf32>, vector<16x8xf32> -> vector<16x8xf32>
    %299 = vector.extract_strided_slice %281 {offsets = [16, 0], sizes = [16, 8], strides = [1, 1]} : vector<32x8xf32> to vector<16x8xf32>
    %300 = vector.extract_strided_slice %282 {offsets = [16, 0], sizes = [16, 8], strides = [1, 1]} : vector<32x8xf32> to vector<16x8xf32>
    %301 = vector.extract_strided_slice %283 {offsets = [16, 0], sizes = [16, 8], strides = [1, 1]} : vector<32x8xf32> to vector<16x8xf32>
    %cst_114 = arith.constant dense<0.000000e+00> : vector<16x16xf32>
    %302 = tpu.matmul %299, %300, %cst_114 {dimension_numbers = #tpu.dot_dimension_numbers<[1], [1], [0], [0], [0, 0, 1, 0], [], []>} : vector<16x8xf32>, vector<16x8xf32>, vector<16x16xf32> -> vector<16x16xf32>
    %cst_115 = arith.constant dense<0xFF800000> : vector<16xf32>
    %303 = vector.multi_reduction <maximumf>, %302, %cst_115 [1] : vector<16x16xf32> to vector<16xf32>
    %304 = vector.shape_cast %303 : vector<16xf32> to vector<16x1xf32>
    %305 = vector.broadcast %304 : vector<16x1xf32> to vector<16x16xf32>
    %306 = arith.subf %302, %305 : vector<16x16xf32>
    %307 = math.exp %306 : vector<16x16xf32>
    %cst_116 = arith.constant dense<0.000000e+00> : vector<16xf32>
    %308 = vector.multi_reduction <add>, %307, %cst_116 [1] : vector<16x16xf32> to vector<16xf32>
    %309 = vector.shape_cast %308 : vector<16xf32> to vector<16x1xf32>
    %310 = tpu.reciprocal %309 : vector<16x1xf32> -> vector<16x1xf32>
    %311 = vector.broadcast %310 : vector<16x1xf32> to vector<16x16xf32>
    %312 = arith.mulf %307, %311 : vector<16x16xf32>
    %cst_117 = arith.constant dense<0.000000e+00> : vector<16x8xf32>
    %313 = tpu.matmul %312, %301, %cst_117 {dimension_numbers = #tpu.dot_dimension_numbers<[1], [0], [0], [1], [0, 0, 1, 1], [], []>} : vector<16x16xf32>, vector<16x8xf32>, vector<16x8xf32> -> vector<16x8xf32>
    %314 = tpu.concatenate %298, %313 in 0 : vector<16x8xf32>, vector<16x8xf32> -> vector<32x8xf32>
    %315 = vector.extract_strided_slice %244 {offsets = [8, 0], sizes = [8, 32], strides = [1, 1]} : vector<32x32xf32> to vector<8x32xf32>
    %cst_118 = arith.constant dense<0.000000e+00> : vector<32x32xf32>
    %316 = tpu.matmul %314, %315, %cst_118 {dimension_numbers = #tpu.dot_dimension_numbers<[1], [0], [0], [1], [0, 0, 1, 1], [], []>} : vector<32x8xf32>, vector<8x32xf32>, vector<32x32xf32> -> vector<32x32xf32>
    %317 = arith.addf %280, %316 : vector<32x32xf32>
    %318 = vector.extract_strided_slice %242 {offsets = [0, 16], sizes = [32, 8], strides = [1, 1]} : vector<32x96xf32> to vector<32x8xf32>
    %319 = vector.extract_strided_slice %242 {offsets = [0, 48], sizes = [32, 8], strides = [1, 1]} : vector<32x96xf32> to vector<32x8xf32>
    %320 = vector.extract_strided_slice %242 {offsets = [0, 80], sizes = [32, 8], strides = [1, 1]} : vector<32x96xf32> to vector<32x8xf32>
    %321 = vector.extract_strided_slice %318 {offsets = [0, 0], sizes = [16, 8], strides = [1, 1]} : vector<32x8xf32> to vector<16x8xf32>
    %322 = vector.extract_strided_slice %319 {offsets = [0, 0], sizes = [16, 8], strides = [1, 1]} : vector<32x8xf32> to vector<16x8xf32>
    %323 = vector.extract_strided_slice %320 {offsets = [0, 0], sizes = [16, 8], strides = [1, 1]} : vector<32x8xf32> to vector<16x8xf32>
    %cst_119 = arith.constant dense<0.000000e+00> : vector<16x16xf32>
    %324 = tpu.matmul %321, %322, %cst_119 {dimension_numbers = #tpu.dot_dimension_numbers<[1], [1], [0], [0], [0, 0, 1, 0], [], []>} : vector<16x8xf32>, vector<16x8xf32>, vector<16x16xf32> -> vector<16x16xf32>
    %cst_120 = arith.constant dense<0xFF800000> : vector<16xf32>
    %325 = vector.multi_reduction <maximumf>, %324, %cst_120 [1] : vector<16x16xf32> to vector<16xf32>
    %326 = vector.shape_cast %325 : vector<16xf32> to vector<16x1xf32>
    %327 = vector.broadcast %326 : vector<16x1xf32> to vector<16x16xf32>
    %328 = arith.subf %324, %327 : vector<16x16xf32>
    %329 = math.exp %328 : vector<16x16xf32>
    %cst_121 = arith.constant dense<0.000000e+00> : vector<16xf32>
    %330 = vector.multi_reduction <add>, %329, %cst_121 [1] : vector<16x16xf32> to vector<16xf32>
    %331 = vector.shape_cast %330 : vector<16xf32> to vector<16x1xf32>
    %332 = tpu.reciprocal %331 : vector<16x1xf32> -> vector<16x1xf32>
    %333 = vector.broadcast %332 : vector<16x1xf32> to vector<16x16xf32>
    %334 = arith.mulf %329, %333 : vector<16x16xf32>
    %cst_122 = arith.constant dense<0.000000e+00> : vector<16x8xf32>
    %335 = tpu.matmul %334, %323, %cst_122 {dimension_numbers = #tpu.dot_dimension_numbers<[1], [0], [0], [1], [0, 0, 1, 1], [], []>} : vector<16x16xf32>, vector<16x8xf32>, vector<16x8xf32> -> vector<16x8xf32>
    %336 = vector.extract_strided_slice %318 {offsets = [16, 0], sizes = [16, 8], strides = [1, 1]} : vector<32x8xf32> to vector<16x8xf32>
    %337 = vector.extract_strided_slice %319 {offsets = [16, 0], sizes = [16, 8], strides = [1, 1]} : vector<32x8xf32> to vector<16x8xf32>
    %338 = vector.extract_strided_slice %320 {offsets = [16, 0], sizes = [16, 8], strides = [1, 1]} : vector<32x8xf32> to vector<16x8xf32>
    %cst_123 = arith.constant dense<0.000000e+00> : vector<16x16xf32>
    %339 = tpu.matmul %336, %337, %cst_123 {dimension_numbers = #tpu.dot_dimension_numbers<[1], [1], [0], [0], [0, 0, 1, 0], [], []>} : vector<16x8xf32>, vector<16x8xf32>, vector<16x16xf32> -> vector<16x16xf32>
    %cst_124 = arith.constant dense<0xFF800000> : vector<16xf32>
    %340 = vector.multi_reduction <maximumf>, %339, %cst_124 [1] : vector<16x16xf32> to vector<16xf32>
    %341 = vector.shape_cast %340 : vector<16xf32> to vector<16x1xf32>
    %342 = vector.broadcast %341 : vector<16x1xf32> to vector<16x16xf32>
    %343 = arith.subf %339, %342 : vector<16x16xf32>
    %344 = math.exp %343 : vector<16x16xf32>
    %cst_125 = arith.constant dense<0.000000e+00> : vector<16xf32>
    %345 = vector.multi_reduction <add>, %344, %cst_125 [1] : vector<16x16xf32> to vector<16xf32>
    %346 = vector.shape_cast %345 : vector<16xf32> to vector<16x1xf32>
    %347 = tpu.reciprocal %346 : vector<16x1xf32> -> vector<16x1xf32>
    %348 = vector.broadcast %347 : vector<16x1xf32> to vector<16x16xf32>
    %349 = arith.mulf %344, %348 : vector<16x16xf32>
    %cst_126 = arith.constant dense<0.000000e+00> : vector<16x8xf32>
    %350 = tpu.matmul %349, %338, %cst_126 {dimension_numbers = #tpu.dot_dimension_numbers<[1], [0], [0], [1], [0, 0, 1, 1], [], []>} : vector<16x16xf32>, vector<16x8xf32>, vector<16x8xf32> -> vector<16x8xf32>
    %351 = tpu.concatenate %335, %350 in 0 : vector<16x8xf32>, vector<16x8xf32> -> vector<32x8xf32>
    %352 = vector.extract_strided_slice %244 {offsets = [16, 0], sizes = [8, 32], strides = [1, 1]} : vector<32x32xf32> to vector<8x32xf32>
    %cst_127 = arith.constant dense<0.000000e+00> : vector<32x32xf32>
    %353 = tpu.matmul %351, %352, %cst_127 {dimension_numbers = #tpu.dot_dimension_numbers<[1], [0], [0], [1], [0, 0, 1, 1], [], []>} : vector<32x8xf32>, vector<8x32xf32>, vector<32x32xf32> -> vector<32x32xf32>
    %354 = arith.addf %317, %353 : vector<32x32xf32>
    %355 = vector.extract_strided_slice %242 {offsets = [0, 24], sizes = [32, 8], strides = [1, 1]} : vector<32x96xf32> to vector<32x8xf32>
    %356 = vector.extract_strided_slice %242 {offsets = [0, 56], sizes = [32, 8], strides = [1, 1]} : vector<32x96xf32> to vector<32x8xf32>
    %357 = vector.extract_strided_slice %242 {offsets = [0, 88], sizes = [32, 8], strides = [1, 1]} : vector<32x96xf32> to vector<32x8xf32>
    %358 = vector.extract_strided_slice %355 {offsets = [0, 0], sizes = [16, 8], strides = [1, 1]} : vector<32x8xf32> to vector<16x8xf32>
    %359 = vector.extract_strided_slice %356 {offsets = [0, 0], sizes = [16, 8], strides = [1, 1]} : vector<32x8xf32> to vector<16x8xf32>
    %360 = vector.extract_strided_slice %357 {offsets = [0, 0], sizes = [16, 8], strides = [1, 1]} : vector<32x8xf32> to vector<16x8xf32>
    %cst_128 = arith.constant dense<0.000000e+00> : vector<16x16xf32>
    %361 = tpu.matmul %358, %359, %cst_128 {dimension_numbers = #tpu.dot_dimension_numbers<[1], [1], [0], [0], [0, 0, 1, 0], [], []>} : vector<16x8xf32>, vector<16x8xf32>, vector<16x16xf32> -> vector<16x16xf32>
    %cst_129 = arith.constant dense<0xFF800000> : vector<16xf32>
    %362 = vector.multi_reduction <maximumf>, %361, %cst_129 [1] : vector<16x16xf32> to vector<16xf32>
    %363 = vector.shape_cast %362 : vector<16xf32> to vector<16x1xf32>
    %364 = vector.broadcast %363 : vector<16x1xf32> to vector<16x16xf32>
    %365 = arith.subf %361, %364 : vector<16x16xf32>
    %366 = math.exp %365 : vector<16x16xf32>
    %cst_130 = arith.constant dense<0.000000e+00> : vector<16xf32>
    %367 = vector.multi_reduction <add>, %366, %cst_130 [1] : vector<16x16xf32> to vector<16xf32>
    %368 = vector.shape_cast %367 : vector<16xf32> to vector<16x1xf32>
    %369 = tpu.reciprocal %368 : vector<16x1xf32> -> vector<16x1xf32>
    %370 = vector.broadcast %369 : vector<16x1xf32> to vector<16x16xf32>
    %371 = arith.mulf %366, %370 : vector<16x16xf32>
    %cst_131 = arith.constant dense<0.000000e+00> : vector<16x8xf32>
    %372 = tpu.matmul %371, %360, %cst_131 {dimension_numbers = #tpu.dot_dimension_numbers<[1], [0], [0], [1], [0, 0, 1, 1], [], []>} : vector<16x16xf32>, vector<16x8xf32>, vector<16x8xf32> -> vector<16x8xf32>
    %373 = vector.extract_strided_slice %355 {offsets = [16, 0], sizes = [16, 8], strides = [1, 1]} : vector<32x8xf32> to vector<16x8xf32>
    %374 = vector.extract_strided_slice %356 {offsets = [16, 0], sizes = [16, 8], strides = [1, 1]} : vector<32x8xf32> to vector<16x8xf32>
    %375 = vector.extract_strided_slice %357 {offsets = [16, 0], sizes = [16, 8], strides = [1, 1]} : vector<32x8xf32> to vector<16x8xf32>
    %cst_132 = arith.constant dense<0.000000e+00> : vector<16x16xf32>
    %376 = tpu.matmul %373, %374, %cst_132 {dimension_numbers = #tpu.dot_dimension_numbers<[1], [1], [0], [0], [0, 0, 1, 0], [], []>} : vector<16x8xf32>, vector<16x8xf32>, vector<16x16xf32> -> vector<16x16xf32>
    %cst_133 = arith.constant dense<0xFF800000> : vector<16xf32>
    %377 = vector.multi_reduction <maximumf>, %376, %cst_133 [1] : vector<16x16xf32> to vector<16xf32>
    %378 = vector.shape_cast %377 : vector<16xf32> to vector<16x1xf32>
    %379 = vector.broadcast %378 : vector<16x1xf32> to vector<16x16xf32>
    %380 = arith.subf %376, %379 : vector<16x16xf32>
    %381 = math.exp %380 : vector<16x16xf32>
    %cst_134 = arith.constant dense<0.000000e+00> : vector<16xf32>
    %382 = vector.multi_reduction <add>, %381, %cst_134 [1] : vector<16x16xf32> to vector<16xf32>
    %383 = vector.shape_cast %382 : vector<16xf32> to vector<16x1xf32>
    %384 = tpu.reciprocal %383 : vector<16x1xf32> -> vector<16x1xf32>
    %385 = vector.broadcast %384 : vector<16x1xf32> to vector<16x16xf32>
    %386 = arith.mulf %381, %385 : vector<16x16xf32>
    %cst_135 = arith.constant dense<0.000000e+00> : vector<16x8xf32>
    %387 = tpu.matmul %386, %375, %cst_135 {dimension_numbers = #tpu.dot_dimension_numbers<[1], [0], [0], [1], [0, 0, 1, 1], [], []>} : vector<16x16xf32>, vector<16x8xf32>, vector<16x8xf32> -> vector<16x8xf32>
    %388 = tpu.concatenate %372, %387 in 0 : vector<16x8xf32>, vector<16x8xf32> -> vector<32x8xf32>
    %389 = vector.extract_strided_slice %244 {offsets = [24, 0], sizes = [8, 32], strides = [1, 1]} : vector<32x32xf32> to vector<8x32xf32>
    %cst_136 = arith.constant dense<0.000000e+00> : vector<32x32xf32>
    %390 = tpu.matmul %388, %389, %cst_136 {dimension_numbers = #tpu.dot_dimension_numbers<[1], [0], [0], [1], [0, 0, 1, 1], [], []>} : vector<32x8xf32>, vector<8x32xf32>, vector<32x32xf32> -> vector<32x32xf32>
    %391 = arith.addf %354, %390 : vector<32x32xf32>
    %392 = arith.addf %235, %391 : vector<32x32xf32>
    %c1_137 = arith.constant 1 : index
    %c0_138 = arith.constant 0 : index
    %c0_139 = arith.constant 0 : index
    %393 = vector.load %arg7[%c1_137, %c0_138, %c0_139] : memref<2x1x32xf32, #tpu.memory_space<vmem>>, vector<1x1x32xf32>
    %394 = vector.shape_cast %393 : vector<1x1x32xf32> to vector<1x32xf32>
    %395 = vector.broadcast %394 : vector<1x32xf32> to vector<32x32xf32>
    %396 = arith.addf %392, %395 : vector<32x32xf32>
    %c1_140 = arith.constant 1 : index
    %c0_141 = arith.constant 0 : index
    %c0_142 = arith.constant 0 : index
    %397 = vector.load %arg8[%c1_140, %c0_141, %c0_142] : memref<2x1x32xf32, #tpu.memory_space<vmem>>, vector<1x1x32xf32>
    %398 = vector.shape_cast %397 : vector<1x1x32xf32> to vector<1x32xf32>
    %c1_143 = arith.constant 1 : index
    %c0_144 = arith.constant 0 : index
    %c0_145 = arith.constant 0 : index
    %399 = vector.load %arg9[%c1_143, %c0_144, %c0_145] : memref<2x1x32xf32, #tpu.memory_space<vmem>>, vector<1x1x32xf32>
    %400 = vector.shape_cast %399 : vector<1x1x32xf32> to vector<1x32xf32>
    %cst_146 = arith.constant dense<0.000000e+00> : vector<32xf32>
    %401 = vector.multi_reduction <add>, %396, %cst_146 [1] : vector<32x32xf32> to vector<32xf32>
    %402 = vector.shape_cast %401 : vector<32xf32> to vector<32x1xf32>
    %cst_147 = arith.constant 3.200000e+01 : f32
    %403 = vector.broadcast %cst_147 : f32 to vector<32x1xf32>
    %404 = arith.divf %402, %403 : vector<32x1xf32>
    %405 = vector.broadcast %404 : vector<32x1xf32> to vector<32x32xf32>
    %406 = arith.subf %396, %405 : vector<32x32xf32>
    %407 = arith.mulf %406, %406 : vector<32x32xf32>
    %cst_148 = arith.constant dense<0.000000e+00> : vector<32xf32>
    %408 = vector.multi_reduction <add>, %407, %cst_148 [1] : vector<32x32xf32> to vector<32xf32>
    %409 = vector.shape_cast %408 : vector<32xf32> to vector<32x1xf32>
    %cst_149 = arith.constant 3.200000e+01 : f32
    %410 = vector.broadcast %cst_149 : f32 to vector<32x1xf32>
    %411 = arith.divf %409, %410 : vector<32x1xf32>
    %412 = vector.broadcast %404 : vector<32x1xf32> to vector<32x32xf32>
    %413 = arith.subf %396, %412 : vector<32x32xf32>
    %cst_150 = arith.constant 9.99999974E-6 : f32
    %414 = vector.broadcast %cst_150 : f32 to vector<32x1xf32>
    %415 = arith.addf %411, %414 : vector<32x1xf32>
    %416 = math.rsqrt %415 : vector<32x1xf32>
    %417 = vector.broadcast %416 : vector<32x1xf32> to vector<32x32xf32>
    %418 = arith.mulf %413, %417 : vector<32x32xf32>
    %419 = vector.broadcast %398 : vector<1x32xf32> to vector<32x32xf32>
    %420 = arith.mulf %418, %419 : vector<32x32xf32>
    %421 = vector.broadcast %400 : vector<1x32xf32> to vector<32x32xf32>
    %422 = arith.addf %420, %421 : vector<32x32xf32>
    %c1_151 = arith.constant 1 : index
    %c0_152 = arith.constant 0 : index
    %c0_153 = arith.constant 0 : index
    %423 = vector.load %arg10[%c1_151, %c0_152, %c0_153] : memref<2x32x32xf32, #tpu.memory_space<vmem>>, vector<1x32x32xf32>
    %424 = vector.shape_cast %423 : vector<1x32x32xf32> to vector<32x32xf32>
    %cst_154 = arith.constant dense<0.000000e+00> : vector<32x32xf32>
    %425 = tpu.matmul %422, %424, %cst_154 {dimension_numbers = #tpu.dot_dimension_numbers<[1], [0], [0], [1], [0, 0, 1, 1], [], []>} : vector<32x32xf32>, vector<32x32xf32>, vector<32x32xf32> -> vector<32x32xf32>
    %c1_155 = arith.constant 1 : index
    %c0_156 = arith.constant 0 : index
    %c0_157 = arith.constant 0 : index
    %426 = vector.load %arg11[%c1_155, %c0_156, %c0_157] : memref<2x1x32xf32, #tpu.memory_space<vmem>>, vector<1x1x32xf32>
    %427 = vector.shape_cast %426 : vector<1x1x32xf32> to vector<1x32xf32>
    %428 = vector.broadcast %427 : vector<1x32xf32> to vector<32x32xf32>
    %429 = arith.addf %425, %428 : vector<32x32xf32>
    %cst_158 = arith.constant 0.000000e+00 : f32
    %430 = vector.broadcast %cst_158 : f32 to vector<32x32xf32>
    %431 = arith.maximumf %429, %430 : vector<32x32xf32>
    %c1_159 = arith.constant 1 : index
    %c0_160 = arith.constant 0 : index
    %c0_161 = arith.constant 0 : index
    %432 = vector.load %arg12[%c1_159, %c0_160, %c0_161] : memref<2x32x32xf32, #tpu.memory_space<vmem>>, vector<1x32x32xf32>
    %433 = vector.shape_cast %432 : vector<1x32x32xf32> to vector<32x32xf32>
    %cst_162 = arith.constant dense<0.000000e+00> : vector<32x32xf32>
    %434 = tpu.matmul %431, %433, %cst_162 {dimension_numbers = #tpu.dot_dimension_numbers<[1], [0], [0], [1], [0, 0, 1, 1], [], []>} : vector<32x32xf32>, vector<32x32xf32>, vector<32x32xf32> -> vector<32x32xf32>
    %c1_163 = arith.constant 1 : index
    %c0_164 = arith.constant 0 : index
    %c0_165 = arith.constant 0 : index
    %435 = vector.load %arg13[%c1_163, %c0_164, %c0_165] : memref<2x1x32xf32, #tpu.memory_space<vmem>>, vector<1x1x32xf32>
    %436 = vector.shape_cast %435 : vector<1x1x32xf32> to vector<1x32xf32>
    %437 = vector.broadcast %436 : vector<1x32xf32> to vector<32x32xf32>
    %438 = arith.addf %434, %437 : vector<32x32xf32>
    %439 = arith.addf %422, %438 : vector<32x32xf32>
    %c1_166 = arith.constant 1 : index
    %c0_167 = arith.constant 0 : index
    %c0_168 = arith.constant 0 : index
    %440 = vector.load %arg14[%c1_166, %c0_167, %c0_168] : memref<2x1x32xf32, #tpu.memory_space<vmem>>, vector<1x1x32xf32>
    %441 = vector.shape_cast %440 : vector<1x1x32xf32> to vector<1x32xf32>
    %c1_169 = arith.constant 1 : index
    %c0_170 = arith.constant 0 : index
    %c0_171 = arith.constant 0 : index
    %442 = vector.load %arg15[%c1_169, %c0_170, %c0_171] : memref<2x1x32xf32, #tpu.memory_space<vmem>>, vector<1x1x32xf32>
    %443 = vector.shape_cast %442 : vector<1x1x32xf32> to vector<1x32xf32>
    %cst_172 = arith.constant dense<0.000000e+00> : vector<32xf32>
    %444 = vector.multi_reduction <add>, %439, %cst_172 [1] : vector<32x32xf32> to vector<32xf32>
    %445 = vector.shape_cast %444 : vector<32xf32> to vector<32x1xf32>
    %cst_173 = arith.constant 3.200000e+01 : f32
    %446 = vector.broadcast %cst_173 : f32 to vector<32x1xf32>
    %447 = arith.divf %445, %446 : vector<32x1xf32>
    %448 = vector.broadcast %447 : vector<32x1xf32> to vector<32x32xf32>
    %449 = arith.subf %439, %448 : vector<32x32xf32>
    %450 = arith.mulf %449, %449 : vector<32x32xf32>
    %cst_174 = arith.constant dense<0.000000e+00> : vector<32xf32>
    %451 = vector.multi_reduction <add>, %450, %cst_174 [1] : vector<32x32xf32> to vector<32xf32>
    %452 = vector.shape_cast %451 : vector<32xf32> to vector<32x1xf32>
    %cst_175 = arith.constant 3.200000e+01 : f32
    %453 = vector.broadcast %cst_175 : f32 to vector<32x1xf32>
    %454 = arith.divf %452, %453 : vector<32x1xf32>
    %455 = vector.broadcast %447 : vector<32x1xf32> to vector<32x32xf32>
    %456 = arith.subf %439, %455 : vector<32x32xf32>
    %cst_176 = arith.constant 9.99999974E-6 : f32
    %457 = vector.broadcast %cst_176 : f32 to vector<32x1xf32>
    %458 = arith.addf %454, %457 : vector<32x1xf32>
    %459 = math.rsqrt %458 : vector<32x1xf32>
    %460 = vector.broadcast %459 : vector<32x1xf32> to vector<32x32xf32>
    %461 = arith.mulf %456, %460 : vector<32x32xf32>
    %462 = vector.broadcast %441 : vector<1x32xf32> to vector<32x32xf32>
    %463 = arith.mulf %461, %462 : vector<32x32xf32>
    %464 = vector.broadcast %443 : vector<1x32xf32> to vector<32x32xf32>
    %465 = arith.addf %463, %464 : vector<32x32xf32>
    %c0_177 = arith.constant 0 : index
    %c0_178 = arith.constant 0 : index
    %c0_179 = arith.constant 0 : index
    %466 = vector.load %arg16[%c0_177, %c0_178, %c0_179] : memref<1x32x32xf32, #tpu.memory_space<vmem>>, vector<1x32x32xf32>
    %467 = vector.shape_cast %466 : vector<1x32x32xf32> to vector<32x32xf32>
    %468 = vector.shape_cast %465 : vector<32x32xf32> to vector<1x32x32xf32>
    tpu.vector_store %arg16[%c0_177, %c0_178, %c0_179], %468 {strides = array<i32>} : memref<1x32x32xf32, #tpu.memory_space<vmem>>, vector<1x32x32xf32>,
    return
  }
  func.func @transform_0(%arg0: i32) -> (i32, i32, i32) {
    %c0_i32 = arith.constant 0 : i32
    %c0_i32_0 = arith.constant 0 : i32
    %c0_i32_1 = arith.constant 0 : i32
    return %arg0, %c0_i32, %c0_i32_0 : i32, i32, i32
  }
  func.func @transform_1(%arg0: i32) -> (i32, i32) {
    %c0_i32 = arith.constant 0 : i32
    %c0_i32_0 = arith.constant 0 : i32
    %c0_i32_1 = arith.constant 0 : i32
    return %c0_i32, %c0_i32_0 : i32, i32
  }
  func.func @transform_2(%arg0: i32) -> (i32, i32) {
    %c0_i32 = arith.constant 0 : i32
    %c0_i32_0 = arith.constant 0 : i32
    %c0_i32_1 = arith.constant 0 : i32
    return %c0_i32, %c0_i32_0 : i32, i32
  }
  func.func @transform_3(%arg0: i32) -> (i32, i32, i32) {
    %c0_i32 = arith.constant 0 : i32
    %c0_i32_0 = arith.constant 0 : i32
    %c0_i32_1 = arith.constant 0 : i32
    %c0_i32_2 = arith.constant 0 : i32
    return %c0_i32, %c0_i32_0, %c0_i32_1 : i32, i32, i32
  }
  func.func @transform_4(%arg0: i32) -> (i32, i32, i32) {
    %c0_i32 = arith.constant 0 : i32
    %c0_i32_0 = arith.constant 0 : i32
    %c0_i32_1 = arith.constant 0 : i32
    %c0_i32_2 = arith.constant 0 : i32
    return %c0_i32, %c0_i32_0, %c0_i32_1 : i32, i32, i32
  }
  func.func @transform_5(%arg0: i32) -> (i32, i32, i32) {
    %c0_i32 = arith.constant 0 : i32
    %c0_i32_0 = arith.constant 0 : i32
    %c0_i32_1 = arith.constant 0 : i32
    %c0_i32_2 = arith.constant 0 : i32
    return %c0_i32, %c0_i32_0, %c0_i32_1 : i32, i32, i32
  }
  func.func @transform_6(%arg0: i32) -> (i32, i32, i32) {
    %c0_i32 = arith.constant 0 : i32
    %c0_i32_0 = arith.constant 0 : i32
    %c0_i32_1 = arith.constant 0 : i32
    %c0_i32_2 = arith.constant 0 : i32
    return %c0_i32, %c0_i32_0, %c0_i32_1 : i32, i32, i32
  }
  func.func @transform_7(%arg0: i32) -> (i32, i32, i32) {
    %c0_i32 = arith.constant 0 : i32
    %c0_i32_0 = arith.constant 0 : i32
    %c0_i32_1 = arith.constant 0 : i32
    %c0_i32_2 = arith.constant 0 : i32
    return %c0_i32, %c0_i32_0, %c0_i32_1 : i32, i32, i32
  }
  func.func @transform_8(%arg0: i32) -> (i32, i32, i32) {
    %c0_i32 = arith.constant 0 : i32
    %c0_i32_0 = arith.constant 0 : i32
    %c0_i32_1 = arith.constant 0 : i32
    %c0_i32_2 = arith.constant 0 : i32
    return %c0_i32, %c0_i32_0, %c0_i32_1 : i32, i32, i32
  }
  func.func @transform_9(%arg0: i32) -> (i32, i32, i32) {
    %c0_i32 = arith.constant 0 : i32
    %c0_i32_0 = arith.constant 0 : i32
    %c0_i32_1 = arith.constant 0 : i32
    %c0_i32_2 = arith.constant 0 : i32
    return %c0_i32, %c0_i32_0, %c0_i32_1 : i32, i32, i32
  }
  func.func @transform_10(%arg0: i32) -> (i32, i32, i32) {
    %c0_i32 = arith.constant 0 : i32
    %c0_i32_0 = arith.constant 0 : i32
    %c0_i32_1 = arith.constant 0 : i32
    %c0_i32_2 = arith.constant 0 : i32
    return %c0_i32, %c0_i32_0, %c0_i32_1 : i32, i32, i32
  }
  func.func @transform_11(%arg0: i32) -> (i32, i32, i32) {
    %c0_i32 = arith.constant 0 : i32
    %c0_i32_0 = arith.constant 0 : i32
    %c0_i32_1 = arith.constant 0 : i32
    %c0_i32_2 = arith.constant 0 : i32
    return %c0_i32, %c0_i32_0, %c0_i32_1 : i32, i32, i32
  }
  func.func @transform_12(%arg0: i32) -> (i32, i32, i32) {
    %c0_i32 = arith.constant 0 : i32
    %c0_i32_0 = arith.constant 0 : i32
    %c0_i32_1 = arith.constant 0 : i32
    %c0_i32_2 = arith.constant 0 : i32
    return %c0_i32, %c0_i32_0, %c0_i32_1 : i32, i32, i32
  }
  func.func @transform_13(%arg0: i32) -> (i32, i32, i32) {
    %c0_i32 = arith.constant 0 : i32
    %c0_i32_0 = arith.constant 0 : i32
    %c0_i32_1 = arith.constant 0 : i32
    %c0_i32_2 = arith.constant 0 : i32
    return %c0_i32, %c0_i32_0, %c0_i32_1 : i32, i32, i32
  }
  func.func @transform_14(%arg0: i32) -> (i32, i32, i32) {
    %c0_i32 = arith.constant 0 : i32
    %c0_i32_0 = arith.constant 0 : i32
    %c0_i32_1 = arith.constant 0 : i32
    %c0_i32_2 = arith.constant 0 : i32
    return %c0_i32, %c0_i32_0, %c0_i32_1 : i32, i32, i32
  }
  func.func @transform_15(%arg0: i32) -> (i32, i32, i32) {
    %c0_i32 = arith.constant 0 : i32
    %c0_i32_0 = arith.constant 0 : i32
    %c0_i32_1 = arith.constant 0 : i32
    return %arg0, %c0_i32, %c0_i32_0 : i32, i32, i32
  }
}

</mosaic_0001>

<bundles_post_ra>
// kernel: _lambda_.1
= control target key start
LH: loop header
LB: loop body
LE: loop exit
PB: predicated region body
PF: predicated region fallthrough
CT: control target
= control target key end

     0   :  { %20 = vsyncpa [#allocation3], 0  ;;  %s7076_s0 = inlined_call_operand.vmem [shape: f32[1,32,8], index: 0, kind: input, shape index: {}]   ;;  %s7077_s1 = inlined_call_operand.vmem [shape: f32[8,32], index: 1, kind: input, shape index: {}]   ;;  %s7078_s2 = inlined_call_operand.hbm [shape: f32[32,32], index: 2, kind: input, shape index: {}]   ;;  %s7079_s3 = inlined_call_operand.hbm [shape: f32[2,32,96], index: 3, kind: input, shape index: {}]   ;;  %s7080_s4 = inlined_call_operand.vmem [shape: f32[2,1,96], index: 4, kind: input, shape index: {}]   ;;  %s7081_s5 = inlined_call_operand.hbm [shape: f32[2,32,32], index: 5, kind: input, shape index: {}]   ;;  %s7082_s6 = inlined_call_operand.vmem [shape: f32[2,1,32], index: 6, kind: input, shape index: {}, may-alias: {6,8,10,12,14}]   ;;  %s7083_s7 = inlined_call_operand.vmem [shape: f32[2,1,32], index: 7, kind: input, shape index: {}, may-alias: {7,13}]   ;;  %s7084_s8 = inlined_call_operand.vmem [shape: f32[2,1,32], index: 8, kind: input, shape index: {}, may-alias: {6,8,10,12,14}]   ;;  %s7085_s9 = inlined_call_operand.hbm [shape: f32[2,32,32], index: 9, kind: input, shape index: {}]   ;;  %s7086_s10 = inlined_call_operand.vmem [shape: f32[2,1,32], index: 10, kind: input, shape index: {}, may-alias: {6,8,10,12,14}]   ;;  %s7087_s11 = inlined_call_operand.vmem [shape: f32[2,32,32], index: 11, kind: input, shape index: {}]   ;;  %s7088_s12 = inlined_call_operand.vmem [shape: f32[2,1,32], index: 12, kind: input, shape index: {}, may-alias: {6,8,10,12,14}]   ;;  %s7089_s13 = inlined_call_operand.vmem [shape: f32[2,1,32], index: 13, kind: input, shape index: {}, may-alias: {7,13}]   ;;  %s7090_s14 = inlined_call_operand.vmem [shape: f32[2,1,32], index: 14, kind: input, shape index: {}, may-alias: {6,8,10,12,14}]   ;;  %s7091_s15 = inlined_call_operand.hbm [shape: f32[1,32,32], index: 15, kind: output, shape index: {}]  }
   0x1   :  { %21 = vsyncpa [#allocation6], 0 }
   0x2   :  { %22 = vsyncpa [#allocation9], 0 }
   0x3   :  { %23 = vsyncpa [#allocation4], 0  ;;  %s6304_s18 = smov [#allocation5]   ;;  %s6305_s20 = smov [#allocation2]  }
   0x4   :  { %s45_s19 = sshll.u32 %s6304_s18, 4  ;;  %s33_s21 = sshll.u32 %s6305_s20, 4  ;;  %s46_s19 = int_to_ptr.vmem [resolvable:$true] %s45_s19  ;;  %s34_s21 = int_to_ptr.vmem [resolvable:$true] %s33_s21 }
   0x5   :  { %s6204_s22 = scalar_lea.vmem %s46_s19, 1024  ;;  %p6209_p1 = scmp.lt.s32.totalorder %s46_s19, %s46_s19 }
   0x6   :  { %p6205_p0 = scmp.ne.s32.totalorder %s46_s19, %s6204_s22  ;;  %p6210_p2 = scmp.lt.s32.totalorder %s6204_s22, %s6204_s22 }
   0x8   :  { %p6211_p3 = por %p6210_p2, %p6209_p1 }
   0xa   :  { %p6212_p4 = pnand %p6211_p3, %p6205_p0 }
   0xc   :  { %6215 = shalt.err (!%p6212_p4)
}
   0xd   :  { %s6306_s23 = smov 128   ;;  %s6307_s24 = smov 8  }
   0xe   :  { %51 = dma.hbm_to_vmem [thread:$0]  %s7079_s3, 1024, %s46_s19, [#allocation6], %s6306_s23, %s6306_s23, %s6307_s24  }
   0xf   :  { %s6224_s27 = scalar_lea.vmem %s34_s21, 512  ;;  %p6229_p6 = scmp.lt.s32.totalorder %s34_s21, %s34_s21 }
  0x10   :  { %p6225_p5 = scmp.ne.s32.totalorder %s34_s21, %s6224_s27  ;;  %p6230_p7 = scmp.lt.s32.totalorder %s6224_s27, %s6224_s27 }
  0x12   :  { %p6231_p8 = por %p6230_p7, %p6229_p6 }
  0x14   :  { %p6232_p9 = pnand %p6231_p8, %p6225_p5 }
  0x16   :  { %6235 = shalt.err (!%p6232_p9)
}
  0x17   :  { %39 = dma.hbm_to_vmem [thread:$0]  %s7078_s2, 512, %s34_s21, [#allocation3], %s6306_s23, %s6306_s23, %s6307_s24  }
  0x18   :  { %s6308_s30 = smov [#allocation7]   ;;  %s6309_s17 = smov [#allocation8]  }
  0x19   :  { %s59_s16 = sshll.u32 %s6308_s30, 4  ;;  %s77_s18 = sshll.u32 %s6309_s17, 4  ;;  %s60_s16 = int_to_ptr.vmem [resolvable:$true] %s59_s16  ;;  %s78_s18 = int_to_ptr.vmem [resolvable:$true] %s77_s18 }
  0x1a   :  { %s6244_s3 = scalar_lea.vmem %s60_s16, 1024  ;;  %p6249_p11 = scmp.lt.s32.totalorder %s60_s16, %s60_s16 }
  0x1b   :  { %p6245_p10 = scmp.ne.s32.totalorder %s60_s16, %s6244_s3  ;;  %p6250_p12 = scmp.lt.s32.totalorder %s6244_s3, %s6244_s3 }
  0x1d   :  { %p6251_p13 = por %p6250_p12, %p6249_p11 }
  0x1f   :  { %p6252_p0 = pnand %p6251_p13, %p6245_p10 }
  0x21   :  { %6255 = shalt.err (!%p6252_p0)
}
  0x22   :  { %65 = dma.hbm_to_vmem [thread:$0]  %s7081_s5, 1024, %s60_s16, [#allocation6], %s6306_s23, %s6306_s23, %s6307_s24  }
  0x23   :  { %s6264_s2 = scalar_lea.vmem %s78_s18, 1024  ;;  %p6269_p2 = scmp.lt.s32.totalorder %s78_s18, %s78_s18 }
  0x24   :  { %p6265_p1 = scmp.ne.s32.totalorder %s78_s18, %s6264_s2  ;;  %p6270_p3 = scmp.lt.s32.totalorder %s6264_s2, %s6264_s2 }
  0x26   :  { %p6271_p4 = por %p6270_p3, %p6269_p2 }
  0x28   :  { %p6272_p5 = pnand %p6271_p4, %p6265_p1 }
  0x2a   :  { %6275 = shalt.err (!%p6272_p5)
}
  0x2b   :  { %83 = dma.hbm_to_vmem [thread:$0]  %s7085_s9, 1024, %s78_s18, [#allocation9], %s6306_s23, %s6306_s23, %s6307_s24  }
  0x2c   :  { %6296 = dma.done.wait [#allocation3], 512  }
  0x2d   :  { %6297 = vsyncadd [#allocation3], 4294966784 }
  0x2e   :  { %6298 = dma.done.wait [#allocation6], 2048  }
  0x2f   :  { %6299 = vsyncadd [#allocation6], 4294965248 }
  0x30   :  { %6300 = dma.done.wait [#allocation9], 1024  }
  0x31   :  { %6301 = vsyncadd [#allocation9], 4294966272  ;;  %vm115_vm0 = vcmask 64512   ;;  %v110_v0 = vld [vmem:[%s7077_s1] sm:$0xff]  ;;  %v107_v2 = vld [vmem:[%s7076_s0 + $0x8] sm:$0xff]  ;;  %vm224_vm1 = vcmask 261120  }
  0x32   :  { %v106_v1 = vld [vmem:[%s7076_s0] sm:$0xff]  ;;  %5638 = vmatprep.subr.mxu0 %v110_v0  ;;  %v108_v3 = vld [vmem:[%s7076_s0 + $0x10] sm:$0xff]  ;;  %v216_v4 = vld [vmem:[#allocation5 + $0x18] sm:$0xff]  ;;  %s6310_s18 = smov 96   ;;  %s6311_s3 = smov 88   ;;  %vm415_vm2 = vcmask 130048  }
  0x33   :  { %5640 = vmatprep.mubr.msk.f32.mxu0 %vm115_vm0, %v106_v1  ;;  %5639 = vmatpush3.msra.mxu0 %v110_v0  ;;  %v109_v5 = vld [vmem:[%s7076_s0 + $0x18] sm:$0xff]  ;;  %v215_v6 = vld [vmem:[#allocation5 + $0x10] sm:$0xff]  ;;  %v214_v7 = vld [vmem:[#allocation5 + $0x8] sm:$0xff]  ;;  %s6312_s19 = smov 120   ;;  %s6313_s20 = smov 64  }
  0x34   :  { %5646 = vmatprep.subr.mxu1 %v216_v4  ;;  %5641 = vmatmul.mubr.msk.f32.vlgmr.msra.gmra.mxu0 %vm115_vm0, %v107_v2  ;;  %v213_v8 = vld [vmem:[#allocation5] sm:$0xff]  ;;  %v112_v11 = vld [vmem:[#allocation2 + $0x8] sm:$0xff]  ;;  %v114_v14 = vld [vmem:[#allocation2 + $0x18] sm:$0xff]  ;;  %s6314_s2 = smov 56   ;;  %s6315_s21 = smov 80  }
  0x35   :  { %5647 = vmatpush3.msra.mxu1 %v216_v4  ;;  %5643 = vmatprep.mubr.msk.f32.mxu0 %vm115_vm0, %v108_v3  ;;  %v111_v10 = vld [vmem:[#allocation2] sm:$0xff]  ;;  %v113_v17 = vld [vmem:[#allocation2 + $0x10] sm:$0xff]  ;;  %s6316_s22 = smov 112   ;;  %s6317_s5 = smov 72  }
  0x36   :  { %5648 = vmatprep.subr.mxu1 %v215_v6  ;;  %v5237_v21 = vld [vmem:[%s7080_s4] ss:$0 sm:$0xff]  ;;  %s6318_s25 = smov 104   ;;  %s6319_s26 = smov 48  }
  0x37   :  { %5649 = vmatpush3.msra.mxu1 %v215_v6  ;;  %s6320_s27 = smov 40  }
  0x38   :  { %5644 = vmatmul.mubr.msk.f32.gmra.mxu0 %vm115_vm0, %v109_v5  ;;  %5650 = vmatprep.subr.mxu1 %v214_v7 }
  0x39   :  { %5651 = vmatpush3.msra.mxu1 %v214_v7 }
  0x3a   :  { %5652 = vmatprep.subr.mxu1 %v213_v8 }
  0x3b   :  { %5653 = vmatpush3.msra.mxu1 %v213_v8 }
  0xf4   :  { %v5642_v9 = vpop.f32.mrf.mxu0 }
  0xf5   :  { %v6447_v15 = vadd.f32 %v5642_v9, %v112_v11 }
  0xf6   :  { %v194_v12 = vpop.f32.mrf.mxu0 }
  0xf7   :  { %v6445_v13 = vadd.f32 %v194_v12, %v111_v10 }
  0xf8   :  { %v5645_v16 = vpop.f32.mrf.mxu0 }
  0xf9   :  { %5654 = vmatprep.mubr.msk.f32.mxu1 %vm224_vm1, %v6445_v13  ;;  %v6451_v18 = vadd.f32 %v5645_v16, %v114_v14 }
  0xfa   :  { %v204_v19 = vpop.f32.mrf.mxu0  ;;  %5655 = vmatmul.mubr.msk.f32.vlgmr.msra.gmra.mxu1 %vm224_vm1, %v6447_v15 }
  0xfb   :  { %v6455_v20 = vadd.f32 %v204_v19, %v113_v17 }
  0xfd   :  { %5657 = vmatprep.mubr.msk.f32.mxu1 %vm224_vm1, %v6455_v20 }
  0xfe   :  { %5658 = vmatmul.mubr.msk.f32.gmra.mxu1 %vm224_vm1, %v6451_v18 }
 0x1ba   :  { %v5656_v22 = vpop.f32.mrf.mxu1 }
 0x1bb   :  { %v6464_v23 = vadd.f32 %v5656_v22, %v5237_v21 }
 0x1bc   :  { %v303_v24 = vpop.f32.mrf.mxu1 }
 0x1bd   :  { %v6466_v25 = vadd.f32 %v5237_v21, %v303_v24  ;;  %330 = vrot.lane.b32.xlu0 %v6464_v23, %s6310_s18 }
 0x1be   :  { %v5659_v26 = vpop.f32.mrf.mxu1 }
 0x1bf   :  { %v6470_v27 = vadd.f32 %v5659_v26, %v5237_v21  ;;  %328 = vrot.lane.b32.xlu1 %v6466_v25, %s6310_s18  ;;  %5664 = vmatprep.mubr.msk.f32.mxu0 %vm115_vm0, %v6466_v25 }
 0x1c0   :  { %v313_v28 = vpop.f32.mrf.mxu1 }
 0x1c1   :  { %v6476_v29 = vadd.f32 %v5237_v21, %v313_v28  ;;  %529 = vrot.lane.b32.xlu0 %v6470_v27, %s6310_s18 }
 0x1c3   :  { %5678 = vmatprep.mubr.msk.f32.mxu1 %vm115_vm0, %v6476_v29  ;;  %527 = vrot.lane.b32.xlu1 %v6476_v29, %s6310_s18 }
 0x1c5   :  { %729 = vrot.lane.b32.xlu0 %v6464_v23, %s6311_s3 }
 0x1c7   :  { %727 = vrot.lane.b32.xlu1 %v6466_v25, %s6311_s3 }
 0x1c9   :  { %723 = vrot.lane.b32.xlu0 %v6466_v25, %s6312_s19 }
 0x1cb   :  { %725 = vrot.lane.b32.xlu1 %v6464_v23, %s6312_s19 }
 0x22f   :  { %v331_v30 = vpop.permute.xlu0 %330 }
 0x230   :  { %5660 = vmatprep.subr.msk.mxu0 %vm115_vm0, %v331_v30 }
 0x231   :  { %5661 = vmatpush3.xpose.msk.msra.mxu0 %vm115_vm0, %v331_v30  ;;  %v329_v31 = vpop.permute.xlu1 %328 }
 0x232   :  { %5662 = vmatprep.subr.msk.mxu0 %vm115_vm0, %v329_v31 }
 0x233   :  { %v530_v32 = vpop.permute.xlu0 %529 }
 0x234   :  { %5674 = vmatprep.subr.msk.mxu1 %vm115_vm0, %v530_v32 }
 0x235   :  { %5663 = vmatpush3.xpose.msk.msra.mxu0 %vm115_vm0, %v329_v31  ;;  %5675 = vmatpush3.xpose.msk.msra.mxu1 %vm115_vm0, %v530_v32  ;;  %v528_v33 = vpop.permute.xlu1 %527 }
 0x236   :  { %5676 = vmatprep.subr.msk.mxu1 %vm115_vm0, %v528_v33 }
 0x237   :  { %v730_v34 = vpop.permute.xlu0 %729 }
 0x238   :  { %5665 = vmatmul.mubr.msk.f32.vlgmr.msra.gmra.mxu0 %vm115_vm0, %v6464_v23 }
 0x239   :  { %5677 = vmatpush3.xpose.msk.msra.mxu1 %vm115_vm0, %v528_v33  ;;  %v728_v36 = vpop.permute.xlu1 %727 }
 0x23a   :  { %5688 = vmatprep.subr.msk.mxu1 %vm115_vm0, %v730_v34 }
 0x23b   :  { %v724_v35 = vpop.permute.xlu0 %723 }
 0x23c   :  { %5679 = vmatmul.mubr.msk.f32.vlgmr.msra.gmra.mxu1 %vm115_vm0, %v6470_v27 }
 0x23d   :  { %5689 = vmatpush3.xpose.msk.msra.mxu1 %vm115_vm0, %v730_v34  ;;  %5692 = vmatprep.mubr.msk.f32.mxu1 %vm115_vm0, %v724_v35  ;;  %v726_v37 = vpop.permute.xlu1 %725 }
 0x23e   :  { %5690 = vmatprep.subr.msk.mxu1 %vm115_vm0, %v728_v36 }
 0x241   :  { %5691 = vmatpush3.xpose.msk.msra.mxu1 %vm115_vm0, %v728_v36 }
 0x244   :  { %5693 = vmatmul.mubr.msk.f32.vlgmr.msra.gmra.mxu1 %vm115_vm0, %v726_v37 }
 0x2f8   :  { %v5666_v38 = vpop.f32.mrf.mxu0 }
 0x2f9   :  { %v419_v39 = vsel %vm415_vm2, %v5666_v38, -inf }
 0x2fa   :  { %420 = vmax.xlane.f32.xlu1 %v419_v39  ;;  %v406_v40 = vpop.f32.mrf.mxu0 }
 0x2fb   :  { %v416_v41 = vsel %vm415_vm2, %v406_v40, -inf }
 0x2fc   :  { %v5680_v42 = vpop.f32.mrf.mxu1  ;;  %417 = vmax.xlane.f32.xlu0 %v416_v41 }
 0x2fd   :  { %v617_v45 = vsel %vm415_vm2, %v5680_v42, -inf }
 0x2fe   :  { %v605_v43 = vpop.f32.mrf.mxu1 }
 0x2ff   :  { %v614_v44 = vsel %vm415_vm2, %v605_v43, -inf }
 0x300   :  { %615 = vmax.xlane.f32.xlu0 %v614_v44 }
 0x304   :  { %v5694_v46 = vpop.f32.mrf.mxu1  ;;  %618 = vmax.xlane.f32.xlu0 %v617_v45 }
 0x305   :  { %v817_v47 = vsel %vm415_vm2, %v5694_v46, -inf }
 0x306   :  { %v805_v48 = vpop.f32.mrf.mxu1 }
 0x307   :  { %v814_v49 = vsel %vm415_vm2, %v805_v48, -inf }
 0x308   :  { %818 = vmax.xlane.f32.xlu0 %v817_v47 }
 0x30b   :  { %440 = vrot.lane.b32.xlu1 %v6464_v23, %s6313_s20 }
 0x30f   :  { %638 = vrot.lane.b32.xlu1 %v6470_v27, %s6313_s20 }
 0x313   :  { %636 = vrot.lane.b32.xlu1 %v6476_v29, %s6313_s20 }
 0x31e   :  { %438 = vrot.lane.b32.xlu0 %v6466_v25, %s6313_s20 }
 0x322   :  { %838 = vrot.lane.b32.xlu0 %v6464_v23, %s6314_s2 }
 0x337   :  { %815 = vmax.xlane.f32.xlu1 %v814_v49 }
 0x348   :  { %836 = vrot.lane.b32.xlu1 %v6466_v25, %s6314_s2 }
 0x383   :  { %v421_v50 = vpop.xlane.xlu1 %420 }
 0x384   :  { %v423_v51 = vsub.f32 %v5666_v38, %v421_v50 }
 0x385   :  { %v418_v52 = vpop.xlane.xlu0 %417 }
 0x386   :  { %v426_v53 = vmul.f32 1.442695, %v423_v51  ;;  %v422_v54 = vsub.f32 %v406_v40, %v418_v52  ;;  %v322_v52 = vld [vmem:[#allocation7] sm:$0xff] }
 0x387   :  { %v441_v55 = vpop.permute.xlu1 %440 }
 0x388   :  { %6036 = vpow2.f32 %v426_v53  ;;  %v424_v56 = vmul.f32 1.442695, %v422_v54  ;;  %5667 = vmatprep.subr.mxu0 %v441_v55 }
 0x389   :  { %5668 = vmatpush3.msra.mxu0 %v441_v55  ;;  %v616_v57 = vpop.xlane.xlu0 %615 }
 0x38a   :  { %6038 = vpow2.f32 %v424_v56  ;;  %v620_v58 = vsub.f32 %v605_v43, %v616_v57 }
 0x38b   :  { %v639_v6 = vpop.permute.xlu1 %638 }
 0x38c   :  { %v622_v59 = vmul.f32 1.442695, %v620_v58 }
 0x38d   :  { %v619_v60 = vpop.xlane.xlu0 %618 }
 0x38e   :  { %6040 = vpow2.f32 %v622_v59  ;;  %v621_v61 = vsub.f32 %v5680_v42, %v619_v60 }
 0x38f   :  { %v637_v16 = vpop.permute.xlu1 %636 }
 0x390   :  { %v624_v62 = vmul.f32 1.442695, %v621_v61 }
 0x391   :  { %v819_v63 = vpop.xlane.xlu0 %818 }
 0x392   :  { %6042 = vpow2.f32 %v624_v62  ;;  %v821_v0 = vsub.f32 %v5694_v46, %v819_v63 }
 0x394   :  { %v824_v1 = vmul.f32 1.442695, %v821_v0 }
 0x395   :  { %v6037_v2 = vpop.eup %6036  ;;  %v439_v3 = vpop.permute.xlu0 %438 }
 0x396   :  { %6044 = vpow2.f32 %v824_v1  ;;  %5669 = vmatprep.subr.mxu0 %v439_v3  ;;  %v431_v4 = vsel %vm415_vm2, %v6037_v2, 0.0 }
 0x397   :  { %v6039_v5 = vpop.eup %6038  ;;  %432 = vadd.xlane.f32.xlu0 %v431_v4  ;;  %5670 = vmatpush3.msra.mxu0 %v439_v3 }
 0x398   :  { %5681 = vmatprep.subr.mxu0 %v639_v6  ;;  %v428_v7 = vsel %vm415_vm2, %v6039_v5, 0.0 }
 0x399   :  { %429 = vadd.xlane.f32.xlu1 %v428_v7  ;;  %v839_v26 = vpop.permute.xlu0 %838 }
 0x39b   :  { %v6041_v8 = vpop.eup %6040 }
 0x39c   :  { %v626_v9 = vsel %vm415_vm2, %v6041_v8, 0.0 }
 0x39d   :  { %627 = vadd.xlane.f32.xlu1 %v626_v9 }
 0x39f   :  { %v6043_v10 = vpop.eup %6042 }
 0x3a0   :  { %v629_v11 = vsel %vm415_vm2, %v6043_v10, 0.0 }
 0x3a1   :  { %630 = vadd.xlane.f32.xlu0 %v629_v11 }
 0x3a3   :  { %v6045_v12 = vpop.eup %6044 }
 0x3a4   :  { %v829_v14 = vsel %vm415_vm2, %v6045_v12, 0.0 }
 0x3a5   :  { %830 = vadd.xlane.f32.xlu0 %v829_v14  ;;  %v323_v14 = vld [vmem:[#allocation7 + $0x8] sm:$0xff] }
 0x3ae   :  { %927 = vrot.lane.b32.xlu1 %v6476_v29, %s6311_s3 }
 0x3bb   :  { %929 = vrot.lane.b32.xlu0 %v6470_v27, %s6311_s3 }
 0x3bf   :  { %923 = vrot.lane.b32.xlu0 %v6476_v29, %s6312_s19 }
 0x3c0   :  { %v816_v17 = vpop.xlane.xlu1 %815 }
 0x3c1   :  { %v820_v19 = vsub.f32 %v805_v48, %v816_v17 }
 0x3c3   :  { %v822_v21 = vmul.f32 1.442695, %v820_v19 }
 0x3c4   :  { %v837_v28 = vpop.permute.xlu1 %836 }
 0x3c5   :  { %6046 = vpow2.f32 %v822_v21 }
 0x3d2   :  { %v6047_v22 = vpop.eup %6046 }
 0x3d3   :  { %v826_v24 = vsel %vm415_vm2, %v6047_v22, 0.0 }
 0x3d4   :  { %827 = vadd.xlane.f32.xlu1 %v826_v24 }
 0x3e5   :  { %925 = vrot.lane.b32.xlu1 %v6470_v27, %s6312_s19 }
 0x420   :  { %v433_v30 = vpop.xlane.xlu0 %432 }
 0x421   :  { %6048 = vrcp.f32 %v433_v30 }
 0x422   :  { %v430_v31 = vpop.xlane.xlu1 %429 }
 0x423   :  { %6050 = vrcp.f32 %v430_v31 }
 0x426   :  { %v628_v32 = vpop.xlane.xlu1 %627 }
 0x427   :  { %6052 = vrcp.f32 %v628_v32 }
 0x42a   :  { %v631_v33 = vpop.xlane.xlu0 %630  ;;  %v928_v44 = vpop.permute.xlu1 %927 }
 0x42b   :  { %6054 = vrcp.f32 %v631_v33 }
 0x42e   :  { %v6049_v34 = vpop.eup %6048  ;;  %v831_v41 = vpop.xlane.xlu0 %830 }
 0x42f   :  { %v437_v37 = vmul.f32 %v6049_v34, %v6037_v2  ;;  %6056 = vrcp.f32 %v831_v41 }
 0x430   :  { %v6051_v35 = vpop.eup %6050 }
 0x431   :  { %v436_v36 = vmul.f32 %v6051_v35, %v6039_v5 }
 0x432   :  { %v930_v43 = vpop.permute.xlu0 %929 }
 0x433   :  { %5671 = vmatprep.mubr.msk.f32.mxu0 %vm415_vm2, %v436_v36 }
 0x434   :  { %v6053_v38 = vpop.eup %6052  ;;  %5672 = vmatmul.mubr.msk.f32.vlgmr.msra.gmra.mxu0 %vm415_vm2, %v437_v37 }
 0x435   :  { %5682 = vmatpush3.msra.mxu0 %v639_v6  ;;  %v634_v39 = vmul.f32 %v6053_v38, %v6041_v8 }
 0x436   :  { %5683 = vmatprep.subr.mxu0 %v637_v16  ;;  %v924_v50 = vpop.permute.xlu0 %923 }
 0x437   :  { %5684 = vmatpush3.msra.mxu0 %v637_v16  ;;  %5685 = vmatprep.mubr.msk.f32.mxu0 %vm415_vm2, %v634_v39 }
 0x438   :  { %v6055_v40 = vpop.eup %6054  ;;  %5695 = vmatprep.subr.mxu0 %v839_v26 }
 0x439   :  { %v635_v42 = vmul.f32 %v6055_v40, %v6043_v10 }
 0x43b   :  { %5686 = vmatmul.mubr.msk.f32.vlgmr.msra.gmra.mxu0 %vm415_vm2, %v635_v42 }
 0x43c   :  { %5696 = vmatpush3.msra.mxu0 %v839_v26  ;;  %v6057_v46 = vpop.eup %6056 }
 0x43d   :  { %5697 = vmatprep.subr.mxu0 %v837_v28  ;;  %v835_v49 = vmul.f32 %v6057_v46, %v6045_v12 }
 0x43e   :  { %5698 = vmatpush3.msra.mxu0 %v837_v28 }
 0x43f   :  { %5702 = vmatprep.subr.msk.mxu0 %vm115_vm0, %v930_v43 }
 0x45d   :  { %v828_v45 = vpop.xlane.xlu1 %827 }
 0x45e   :  { %6058 = vrcp.f32 %v828_v45 }
 0x461   :  { %v926_v51 = vpop.permute.xlu1 %925 }
 0x46b   :  { %v6059_v47 = vpop.eup %6058 }
 0x46c   :  { %v834_v48 = vmul.f32 %v6059_v47, %v6047_v22 }
 0x46e   :  { %5699 = vmatprep.mubr.msk.f32.mxu0 %vm415_vm2, %v834_v48 }
 0x46f   :  { %5700 = vmatmul.mubr.msk.f32.vlgmr.msra.gmra.mxu0 %vm415_vm2, %v835_v49 }
 0x470   :  { %5703 = vmatpush3.xpose.msk.msra.mxu0 %vm115_vm0, %v930_v43  ;;  %5706 = vmatprep.mubr.msk.f32.mxu0 %vm115_vm0, %v924_v50 }
 0x471   :  { %5704 = vmatprep.subr.msk.mxu0 %vm115_vm0, %v928_v44 }
 0x474   :  { %5705 = vmatpush3.xpose.msk.msra.mxu0 %vm115_vm0, %v928_v44 }
 0x475   :  { %5724 = vmatprep.subr.mxu0 %v322_v52 }
 0x477   :  { %5707 = vmatmul.mubr.msk.f32.vlgmr.msra.gmra.mxu0 %vm115_vm0, %v926_v51 }
 0x478   :  { %5725 = vmatpush3.msra.mxu0 %v322_v52 }
 0x4f4   :  { %v5673_v53 = vpop.f32.mrf.mxu0 }
 0x4f6   :  { %v516_v54 = vpop.f32.mrf.mxu0 }
 0x4f7   :  { %5726 = vmatprep.mubr.msk.f32.mxu0 %vm115_vm0, %v516_v54 }
 0x4f8   :  { %5727 = vmatmul.mubr.msk.f32.vlgmr.msra.gmra.mxu0 %vm115_vm0, %v5673_v53 }
 0x4fb   :  { %v5687_v55 = vpop.f32.mrf.mxu0 }
 0x4fd   :  { %v714_v56 = vpop.f32.mrf.mxu0 }
 0x4fe   :  { %5729 = vmatprep.mubr.msk.f32.mxu0 %vm115_vm0, %v714_v56 }
 0x4ff   :  { %5730 = vmatmul.mubr.msk.f32.gmra.mxu0 %vm115_vm0, %v5687_v55 }
 0x52f   :  { %v6558_v57 = vpop.f32.mrf.mxu0 }
 0x531   :  { %v6560_v58 = vpop.f32.mrf.mxu0 }
 0x537   :  { %v5708_v59 = vpop.f32.mrf.mxu0 }
 0x538   :  { %v1017_v60 = vsel %vm415_vm2, %v5708_v59, -inf }
 0x539   :  { %1018 = vmax.xlane.f32.xlu1 %v1017_v60  ;;  %v1005_v61 = vpop.f32.mrf.mxu0 }
 0x53a   :  { %v1014_v62 = vsel %vm415_vm2, %v1005_v61, -inf }
 0x53b   :  { %1015 = vmax.xlane.f32.xlu0 %v1014_v62 }
 0x54a   :  { %1038 = vrot.lane.b32.xlu1 %v6470_v27, %s6314_s2 }
 0x54e   :  { %1323 = vrot.lane.b32.xlu1 %v6464_v23, %s6315_s21 }
 0x552   :  { %1321 = vrot.lane.b32.xlu1 %v6466_v25, %s6315_s21 }
 0x556   :  { %1523 = vrot.lane.b32.xlu1 %v6470_v27, %s6315_s21 }
 0x55a   :  { %1521 = vrot.lane.b32.xlu1 %v6476_v29, %s6315_s21 }
 0x55e   :  { %1519 = vrot.lane.b32.xlu1 %v6470_v27, %s6316_s22 }
 0x562   :  { %1822 = vrot.lane.b32.xlu1 %v6466_v25, %s6317_s5 }
 0x566   :  { %2024 = vrot.lane.b32.xlu1 %v6470_v27, %s6317_s5 }
 0x56a   :  { %2022 = vrot.lane.b32.xlu1 %v6476_v29, %s6317_s5 }
 0x56e   :  { %2020 = vrot.lane.b32.xlu1 %v6470_v27, %s6318_s25 }
 0x5c2   :  { %v1019_v63 = vpop.xlane.xlu1 %1018 }
 0x5c3   :  { %v1021_v0 = vsub.f32 %v5708_v59, %v1019_v63 }
 0x5c4   :  { %v1016_v1 = vpop.xlane.xlu0 %1015 }
 0x5c5   :  { %v1024_v2 = vmul.f32 1.442695, %v1021_v0  ;;  %v1020_v3 = vsub.f32 %v1005_v61, %v1016_v1 }
 0x5c6   :  { %v1039_v4 = vpop.permute.xlu1 %1038 }
 0x5c7   :  { %6060 = vpow2.f32 %v1024_v2  ;;  %v1022_v5 = vmul.f32 1.442695, %v1020_v3  ;;  %5709 = vmatprep.subr.mxu1 %v1039_v4 }
 0x5c8   :  { %5710 = vmatpush3.msra.mxu1 %v1039_v4 }
 0x5c9   :  { %6062 = vpow2.f32 %v1022_v5 }
 0x5ca   :  { %v1324_v19 = vpop.permute.xlu1 %1323 }
 0x5ce   :  { %v1322_v24 = vpop.permute.xlu1 %1321 }
 0x5d2   :  { %v1524_v26 = vpop.permute.xlu1 %1523 }
 0x5d4   :  { %v6061_v6 = vpop.eup %6060 }
 0x5d5   :  { %v1029_v7 = vsel %vm415_vm2, %v6061_v6, 0.0 }
 0x5d6   :  { %v6063_v8 = vpop.eup %6062  ;;  %1030 = vadd.xlane.f32.xlu0 %v1029_v7  ;;  %v1522_v33 = vpop.permute.xlu1 %1521 }
 0x5d7   :  { %v1026_v9 = vsel %vm415_vm2, %v6063_v8, 0.0 }
 0x5da   :  { %1027 = vadd.xlane.f32.xlu0 %v1026_v9  ;;  %v1520_v36 = vpop.permute.xlu1 %1519 }
 0x5de   :  { %v1823_v38 = vpop.permute.xlu1 %1822 }
 0x5e2   :  { %v2025_v40 = vpop.permute.xlu1 %2024 }
 0x5e6   :  { %v2023_v42 = vpop.permute.xlu1 %2022 }
 0x5ea   :  { %v2021_v43 = vpop.permute.xlu1 %2020 }
 0x5f0   :  { %1036 = vrot.lane.b32.xlu0 %v6476_v29, %s6314_s2 }
 0x5f4   :  { %1317 = vrot.lane.b32.xlu0 %v6466_v25, %s6316_s22 }
 0x5f8   :  { %1319 = vrot.lane.b32.xlu0 %v6464_v23, %s6316_s22 }
 0x5fc   :  { %1517 = vrot.lane.b32.xlu0 %v6476_v29, %s6316_s22 }
 0x600   :  { %1824 = vrot.lane.b32.xlu0 %v6464_v23, %s6317_s5 }
 0x604   :  { %1818 = vrot.lane.b32.xlu0 %v6466_v25, %s6318_s25 }
 0x608   :  { %1820 = vrot.lane.b32.xlu0 %v6464_v23, %s6318_s25 }
 0x60c   :  { %2018 = vrot.lane.b32.xlu0 %v6476_v29, %s6318_s25 }
 0x65f   :  { %v1031_v10 = vpop.xlane.xlu0 %1030 }
 0x660   :  { %6064 = vrcp.f32 %v1031_v10 }
 0x663   :  { %v1028_v11 = vpop.xlane.xlu0 %1027 }
 0x664   :  { %6066 = vrcp.f32 %v1028_v11 }
 0x667   :  { %v1037_v12 = vpop.permute.xlu0 %1036 }
 0x668   :  { %5711 = vmatprep.subr.mxu1 %v1037_v12 }
 0x669   :  { %5712 = vmatpush3.msra.mxu1 %v1037_v12 }
 0x66a   :  { %5716 = vmatprep.subr.mxu1 %v323_v14 }
 0x66b   :  { %v1318_v28 = vpop.permute.xlu0 %1317 }
 0x66d   :  { %v6065_v16 = vpop.eup %6064 }
 0x66e   :  { %v1035_v22 = vmul.f32 %v6065_v16, %v6061_v6 }
 0x66f   :  { %v1320_v30 = vpop.permute.xlu0 %1319 }
 0x671   :  { %v6067_v17 = vpop.eup %6066 }
 0x672   :  { %v1034_v21 = vmul.f32 %v6067_v17, %v6063_v8 }
 0x673   :  { %v1518_v31 = vpop.permute.xlu0 %1517 }
 0x674   :  { %5713 = vmatprep.mubr.msk.f32.mxu1 %vm415_vm2, %v1034_v21 }
 0x675   :  { %5714 = vmatmul.mubr.msk.f32.vlgmr.msra.gmra.mxu1 %vm415_vm2, %v1035_v22 }
 0x676   :  { %5717 = vmatpush3.msra.mxu1 %v323_v14  ;;  %5718 = vmatprep.mubr.msk.f32.mxu1 %vm115_vm0, %v6560_v58 }
 0x677   :  { %5732 = vmatprep.subr.msk.mxu1 %vm115_vm0, %v1324_v19  ;;  %v1825_v35 = vpop.permute.xlu0 %1824 }
 0x679   :  { %5719 = vmatmul.mubr.msk.f32.vlgmr.msra.gmra.mxu1 %vm115_vm0, %v6558_v57 }
 0x67a   :  { %5733 = vmatpush3.xpose.msk.msra.mxu1 %vm115_vm0, %v1324_v19 }
 0x67b   :  { %5734 = vmatprep.subr.msk.mxu1 %vm115_vm0, %v1322_v24  ;;  %v1819_v37 = vpop.permute.xlu0 %1818 }
 0x67e   :  { %5735 = vmatpush3.xpose.msk.msra.mxu1 %vm115_vm0, %v1322_v24 }
 0x67f   :  { %5746 = vmatprep.subr.msk.mxu1 %vm115_vm0, %v1524_v26  ;;  %v1821_v39 = vpop.permute.xlu0 %1820 }
 0x683   :  { %v2019_v41 = vpop.permute.xlu0 %2018 }
 0x735   :  { %v5715_v32 = vpop.f32.mrf.mxu1 }
 0x737   :  { %v1114_v34 = vpop.f32.mrf.mxu1 }
 0x738   :  { %5721 = vmatprep.mubr.msk.f32.mxu1 %vm115_vm0, %v1114_v34 }
 0x739   :  { %5722 = vmatmul.mubr.msk.f32.gmra.mxu1 %vm115_vm0, %v5715_v32  ;;  %v6634_v44 = vpop.f32.mrf.mxu1 }
 0x73a   :  { %5736 = vmatprep.mubr.msk.f32.mxu1 %vm115_vm0, %v1318_v28 }
 0x73b   :  { %v6636_v45 = vpop.f32.mrf.mxu1 }
 0x73d   :  { %5737 = vmatmul.mubr.msk.f32.vlgmr.msra.gmra.mxu1 %vm115_vm0, %v1320_v30 }
 0x73e   :  { %5747 = vmatpush3.xpose.msk.msra.mxu1 %vm115_vm0, %v1524_v26  ;;  %5750 = vmatprep.mubr.msk.f32.mxu1 %vm115_vm0, %v1518_v31 }
 0x73f   :  { %5748 = vmatprep.subr.msk.mxu1 %vm115_vm0, %v1522_v33 }
 0x742   :  { %5749 = vmatpush3.xpose.msk.msra.mxu1 %vm115_vm0, %v1522_v33 }
 0x743   :  { %5768 = vmatprep.subr.msk.mxu1 %vm115_vm0, %v1825_v35 }
 0x745   :  { %5751 = vmatmul.mubr.msk.f32.vlgmr.msra.gmra.mxu1 %vm115_vm0, %v1520_v36 }
 0x746   :  { %5769 = vmatpush3.xpose.msk.msra.mxu1 %vm115_vm0, %v1825_v35  ;;  %5772 = vmatprep.mubr.msk.f32.mxu1 %vm115_vm0, %v1819_v37 }
 0x747   :  { %5770 = vmatprep.subr.msk.mxu1 %vm115_vm0, %v1823_v38 }
 0x74a   :  { %5771 = vmatpush3.xpose.msk.msra.mxu1 %vm115_vm0, %v1823_v38 }
 0x74b   :  { %5782 = vmatprep.subr.msk.mxu1 %vm115_vm0, %v2025_v40 }
 0x74d   :  { %5773 = vmatmul.mubr.msk.f32.vlgmr.msra.gmra.mxu1 %vm115_vm0, %v1821_v39  ;;  %v324_v39 = vld [vmem:[#allocation7 + $0x10] sm:$0xff] }
 0x74e   :  { %5783 = vmatpush3.xpose.msk.msra.mxu1 %vm115_vm0, %v2025_v40  ;;  %5786 = vmatprep.mubr.msk.f32.mxu1 %vm115_vm0, %v2019_v41 }
 0x74f   :  { %5784 = vmatprep.subr.msk.mxu1 %vm115_vm0, %v2023_v42 }
 0x752   :  { %5785 = vmatpush3.xpose.msk.msra.mxu1 %vm115_vm0, %v2023_v42 }
 0x755   :  { %5787 = vmatmul.mubr.msk.f32.vlgmr.msra.gmra.mxu1 %vm115_vm0, %v2021_v43 }
 0x7f9   :  { %v6638_v46 = vpop.f32.mrf.mxu1 }
 0x7fb   :  { %v6640_v47 = vpop.f32.mrf.mxu1 }
 0x7fd   :  { %v5738_v48 = vpop.f32.mrf.mxu1 }
 0x7fe   :  { %v1411_v49 = vsel %vm415_vm2, %v5738_v48, -inf }
 0x7ff   :  { %1412 = vmax.xlane.f32.xlu1 %v1411_v49  ;;  %v1399_v50 = vpop.f32.mrf.mxu1 }
 0x800   :  { %v1408_v51 = vsel %vm415_vm2, %v1399_v50, -inf }
 0x801   :  { %1409 = vmax.xlane.f32.xlu0 %v1408_v51 }
 0x805   :  { %v5752_v52 = vpop.f32.mrf.mxu1 }
 0x806   :  { %v1611_v55 = vsel %vm415_vm2, %v5752_v52, -inf }
 0x807   :  { %v1599_v53 = vpop.f32.mrf.mxu1 }
 0x808   :  { %v1608_v54 = vsel %vm415_vm2, %v1599_v53, -inf }
 0x809   :  { %1609 = vmax.xlane.f32.xlu0 %v1608_v54 }
 0x80d   :  { %1612 = vmax.xlane.f32.xlu0 %v1611_v55  ;;  %v5774_v14 = vpop.f32.mrf.mxu1 }
 0x80e   :  { %v1912_v26 = vsel %vm415_vm2, %v5774_v14, -inf }
 0x80f   :  { %v1900_v16 = vpop.f32.mrf.mxu1 }
 0x810   :  { %1432 = vrot.lane.b32.xlu1 %v6464_v23, %s6319_s26  ;;  %v1909_v19 = vsel %vm415_vm2, %v1900_v16, -inf }
 0x815   :  { %v5788_v17 = vpop.f32.mrf.mxu1 }
 0x816   :  { %v2112_v24 = vsel %vm415_vm2, %v5788_v17, -inf }
 0x817   :  { %v6657_v21 = vpop.f32.mrf.mxu1 }
 0x818   :  { %v2109_v22 = vsel %vm415_vm2, %v6657_v21, -inf }
 0x888   :  { %v1413_v56 = vpop.xlane.xlu1 %1412 }
 0x889   :  { %v1415_v57 = vsub.f32 %v5738_v48, %v1413_v56 }
 0x88a   :  { %v1410_v58 = vpop.xlane.xlu0 %1409 }
 0x88b   :  { %v1418_v59 = vmul.f32 1.442695, %v1415_v57  ;;  %v1414_v60 = vsub.f32 %v1399_v50, %v1410_v58 }
 0x88c   :  { %v1433_v61 = vpop.permute.xlu1 %1432 }
 0x88d   :  { %6068 = vpow2.f32 %v1418_v59  ;;  %v1416_v62 = vmul.f32 1.442695, %v1414_v60  ;;  %5739 = vmatprep.subr.mxu0 %v1433_v61 }
 0x88e   :  { %5740 = vmatpush3.msra.mxu0 %v1433_v61 }
 0x88f   :  { %6070 = vpow2.f32 %v1416_v62 }
 0x892   :  { %v1610_v63 = vpop.xlane.xlu0 %1609 }
 0x893   :  { %v1614_v9 = vsub.f32 %v1599_v53, %v1610_v63 }
 0x895   :  { %v1616_v10 = vmul.f32 1.442695, %v1614_v9 }
 0x896   :  { %v1613_v0 = vpop.xlane.xlu0 %1612 }
 0x897   :  { %v1615_v1 = vsub.f32 %v5752_v52, %v1613_v0 }
 0x899   :  { %v1618_v2 = vmul.f32 1.442695, %v1615_v1 }
 0x89a   :  { %v6069_v3 = vpop.eup %6068 }
 0x89b   :  { %6072 = vpow2.f32 %v1618_v2  ;;  %v1423_v4 = vsel %vm415_vm2, %v6069_v3, 0.0 }
 0x89c   :  { %v6071_v5 = vpop.eup %6070  ;;  %1424 = vadd.xlane.f32.xlu0 %v1423_v4  ;;  %6074 = vpow2.f32 %v1616_v10  ;;  %v5728_v4 = vpop.f32.mrf.mxu0 }
 0x89d   :  { %v1420_v6 = vsel %vm415_vm2, %v6071_v5, 0.0 }
 0x89e   :  { %1421 = vadd.xlane.f32.xlu1 %v1420_v6 }
 0x8a8   :  { %v6073_v7 = vpop.eup %6072 }
 0x8a9   :  { %v1623_v8 = vsel %vm415_vm2, %v6073_v7, 0.0  ;;  %v6075_v11 = vpop.eup %6074 }
 0x8aa   :  { %1624 = vadd.xlane.f32.xlu0 %v1623_v8  ;;  %v1620_v12 = vsel %vm415_vm2, %v6075_v11, 0.0 }
 0x8af   :  { %1632 = vrot.lane.b32.xlu1 %v6470_v27, %s6319_s26 }
 0x8c0   :  { %1430 = vrot.lane.b32.xlu0 %v6466_v25, %s6319_s26 }
 0x8d3   :  { %1621 = vadd.xlane.f32.xlu1 %v1620_v12 }
 0x8df   :  { %1910 = vmax.xlane.f32.xlu0 %v1909_v19 }
 0x8e3   :  { %2110 = vmax.xlane.f32.xlu0 %v2109_v22 }
 0x8e4   :  { %1630 = vrot.lane.b32.xlu1 %v6476_v29, %s6319_s26 }
 0x8e7   :  { %2113 = vmax.xlane.f32.xlu0 %v2112_v24 }
 0x908   :  { %1913 = vmax.xlane.f32.xlu1 %v1912_v26 }
 0x919   :  { %1933 = vrot.lane.b32.xlu1 %v6464_v23, %s6320_s27 }
 0x925   :  { %v1425_v28 = vpop.xlane.xlu0 %1424 }
 0x926   :  { %6076 = vrcp.f32 %v1425_v28 }
 0x927   :  { %v1422_v30 = vpop.xlane.xlu1 %1421 }
 0x928   :  { %6078 = vrcp.f32 %v1422_v30 }
 0x92b   :  { %v1633_v37 = vpop.permute.xlu1 %1632 }
 0x933   :  { %v1625_v31 = vpop.xlane.xlu0 %1624  ;;  %v6077_v32 = vpop.eup %6076 }
 0x934   :  { %v1429_v36 = vmul.f32 %v6077_v32, %v6069_v3  ;;  %6080 = vrcp.f32 %v1625_v31 }
 0x935   :  { %v6079_v33 = vpop.eup %6078 }
 0x936   :  { %v1428_v34 = vmul.f32 %v6079_v33, %v6071_v5  ;;  %v1298_v5 = vpop.f32.mrf.mxu0  ;;  %v325_v33 = vld [vmem:[#allocation7 + $0x18] sm:$0xff] }
 0x937   :  { %v1431_v35 = vpop.permute.xlu0 %1430 }
 0x938   :  { %5741 = vmatprep.subr.mxu0 %v1431_v35  ;;  %5743 = vmatprep.mubr.msk.f32.mxu0 %vm415_vm2, %v1428_v34  ;;  %v5731_v6 = vpop.f32.mrf.mxu0  ;;  %v1304_v34 = vadd.f32 %v5728_v4, %v6634_v44  ;;  %v1299_v44 = vadd.f32 %v1298_v5, %v6636_v45 }
 0x939   :  { %5742 = vmatpush3.msra.mxu0 %v1431_v35 }
 0x93a   :  { %5744 = vmatmul.mubr.msk.f32.vlgmr.msra.gmra.mxu0 %vm415_vm2, %v1429_v36  ;;  %5753 = vmatprep.subr.mxu0 %v1633_v37 }
 0x93b   :  { %5754 = vmatpush3.msra.mxu0 %v1633_v37 }
 0x941   :  { %v6081_v41 = vpop.eup %6080 }
 0x942   :  { %v1629_v50 = vmul.f32 %v6081_v41, %v6073_v7  ;;  %v1308_v7 = vpop.f32.mrf.mxu0 }
 0x95c   :  { %v1622_v23 = vpop.xlane.xlu1 %1621 }
 0x95d   :  { %6082 = vrcp.f32 %v1622_v23  ;;  %v1314_v23 = vadd.f32 %v5731_v6, %v6638_v46 }
 0x960   :  { %v1631_v38 = vpop.permute.xlu1 %1630 }
 0x961   :  { %5755 = vmatprep.subr.mxu0 %v1631_v38 }
 0x962   :  { %5756 = vmatpush3.msra.mxu0 %v1631_v38 }
 0x963   :  { %5760 = vmatprep.subr.mxu0 %v324_v39 }
 0x968   :  { %v1911_v40 = vpop.xlane.xlu0 %1910 }
 0x969   :  { %v1915_v42 = vsub.f32 %v1900_v16, %v1911_v40 }
 0x96a   :  { %v6083_v43 = vpop.eup %6082 }
 0x96b   :  { %v1917_v48 = vmul.f32 1.442695, %v1915_v42  ;;  %v1628_v49 = vmul.f32 %v6083_v43, %v6075_v11 }
 0x96c   :  { %v2111_v53 = vpop.xlane.xlu0 %2110 }
 0x96d   :  { %6084 = vpow2.f32 %v1917_v48  ;;  %5757 = vmatprep.mubr.msk.f32.mxu0 %vm415_vm2, %v1628_v49  ;;  %v2115_v61 = vsub.f32 %v6657_v21, %v2111_v53  ;;  %v5306_v53 = vld [vmem:[%s7082_s6] ss:$0 sm:$0xff] }
 0x96e   :  { %5758 = vmatmul.mubr.msk.f32.vlgmr.msra.gmra.mxu0 %vm415_vm2, %v1629_v50 }
 0x96f   :  { %5761 = vmatpush3.msra.mxu0 %v324_v39  ;;  %v2117_v62 = vmul.f32 1.442695, %v2115_v61  ;;  %v1309_v39 = vadd.f32 %v1308_v7, %v6640_v47 }
 0x970   :  { %v2114_v54 = vpop.xlane.xlu0 %2113 }
 0x971   :  { %v2116_v55 = vsub.f32 %v5788_v17, %v2114_v54 }
 0x973   :  { %v2119_v58 = vmul.f32 1.442695, %v2116_v55 }
 0x97a   :  { %v6085_v51 = vpop.eup %6084 }
 0x97b   :  { %v1921_v52 = vsel %vm415_vm2, %v6085_v51, 0.0 }
 0x97c   :  { %1922 = vadd.xlane.f32.xlu1 %v1921_v52 }
 0x98d   :  { %2133 = vrot.lane.b32.xlu1 %v6470_v27, %s6320_s27 }
 0x991   :  { %v1914_v56 = vpop.xlane.xlu1 %1913 }
 0x992   :  { %v1916_v57 = vsub.f32 %v5774_v14, %v1914_v56 }
 0x994   :  { %v1919_v59 = vmul.f32 1.442695, %v1916_v57 }
 0x995   :  { %v1934_v60 = vpop.permute.xlu1 %1933 }
 0x996   :  { %6086 = vpow2.f32 %v1919_v59  ;;  %5775 = vmatprep.subr.mxu0 %v1934_v60 }
 0x997   :  { %6088 = vpow2.f32 %v2119_v58 }
 0x998   :  { %6090 = vpow2.f32 %v2117_v62 }
 0x9a3   :  { %v6087_v63 = vpop.eup %6086 }
 0x9a4   :  { %v1924_v0 = vsel %vm415_vm2, %v6087_v63, 0.0  ;;  %v6089_v1 = vpop.eup %6088 }
 0x9a5   :  { %1925 = vadd.xlane.f32.xlu0 %v1924_v0  ;;  %v2124_v27 = vsel %vm415_vm2, %v6089_v1, 0.0  ;;  %v6091_v2 = vpop.eup %6090 }
 0x9a6   :  { %v2121_v3 = vsel %vm415_vm2, %v6091_v2, 0.0 }
 0x9a9   :  { %2125 = vadd.xlane.f32.xlu0 %v2124_v27 }
 0x9b1   :  { %2122 = vadd.xlane.f32.xlu1 %v2121_v3 }
 0x9bf   :  { %1931 = vrot.lane.b32.xlu0 %v6466_v25, %s6320_s27 }
 0x9c2   :  { %2131 = vrot.lane.b32.xlu1 %v6476_v29, %s6320_s27 }
 0x9fa   :  { %v5745_v8 = vpop.f32.mrf.mxu0 }
 0x9fc   :  { %v1508_v9 = vpop.f32.mrf.mxu0 }
 0x9fd   :  { %5762 = vmatprep.mubr.msk.f32.mxu0 %vm115_vm0, %v1508_v9 }
 0x9fe   :  { %5763 = vmatmul.mubr.msk.f32.vlgmr.msra.gmra.mxu0 %vm115_vm0, %v5745_v8 }
 0x9ff   :  { %5776 = vmatpush3.msra.mxu0 %v1934_v60 }
 0xa05   :  { %v1923_v10 = vpop.xlane.xlu1 %1922 }
 0xa06   :  { %6092 = vrcp.f32 %v1923_v10 }
 0xa09   :  { %v2134_v17 = vpop.permute.xlu1 %2133 }
 0xa13   :  { %v6093_v11 = vpop.eup %6092 }
 0xa14   :  { %v1929_v29 = vmul.f32 %v6093_v11, %v6085_v51 }
 0xa2e   :  { %v5759_v12 = vpop.f32.mrf.mxu0  ;;  %v1926_v14 = vpop.xlane.xlu0 %1925 }
 0xa2f   :  { %6094 = vrcp.f32 %v1926_v14 }
 0xa30   :  { %v1708_v25 = vpop.f32.mrf.mxu0 }
 0xa31   :  { %5765 = vmatprep.mubr.msk.f32.mxu0 %vm115_vm0, %v1708_v25 }
 0xa32   :  { %5766 = vmatmul.mubr.msk.f32.gmra.mxu0 %vm115_vm0, %v5759_v12  ;;  %v2126_v16 = vpop.xlane.xlu0 %2125 }
 0xa33   :  { %5779 = vmatprep.mubr.msk.f32.mxu0 %vm415_vm2, %v1929_v29  ;;  %6096 = vrcp.f32 %v2126_v16 }
 0xa36   :  { %v1932_v19 = vpop.permute.xlu0 %1931 }
 0xa37   :  { %5777 = vmatprep.subr.mxu0 %v1932_v19 }
 0xa38   :  { %5778 = vmatpush3.msra.mxu0 %v1932_v19 }
 0xa39   :  { %5789 = vmatprep.subr.mxu0 %v2134_v17 }
 0xa3a   :  { %v2123_v21 = vpop.xlane.xlu1 %2122 }
 0xa3b   :  { %6098 = vrcp.f32 %v2123_v21 }
 0xa3c   :  { %v6095_v22 = vpop.eup %6094 }
 0xa3d   :  { %v1930_v24 = vmul.f32 %v6095_v22, %v6087_v63 }
 0xa3e   :  { %v2132_v26 = vpop.permute.xlu1 %2131 }
 0xa3f   :  { %5780 = vmatmul.mubr.msk.f32.vlgmr.msra.gmra.mxu0 %vm415_vm2, %v1930_v24  ;;  %v2412_v24 = vld [vmem:[#allocation8 + $0x18] sm:$0xff] }
 0xa40   :  { %5790 = vmatpush3.msra.mxu0 %v2134_v17  ;;  %v6097_v28 = vpop.eup %6096  ;;  %5804 = vmatprep.subr.mxu1 %v2412_v24 }
 0xa41   :  { %5791 = vmatprep.subr.mxu0 %v2132_v26  ;;  %v2130_v32 = vmul.f32 %v6097_v28, %v6089_v1  ;;  %5805 = vmatpush3.msra.mxu1 %v2412_v24  ;;  %v2410_v28 = vld [vmem:[#allocation8 + $0x8] sm:$0xff] }
 0xa42   :  { %5792 = vmatpush3.msra.mxu0 %v2132_v26  ;;  %v2411_v26 = vld [vmem:[#allocation8 + $0x10] sm:$0xff] }
 0xa43   :  { %5796 = vmatprep.subr.mxu0 %v325_v33  ;;  %5806 = vmatprep.subr.mxu1 %v2411_v26 }
 0xa44   :  { %5807 = vmatpush3.msra.mxu1 %v2411_v26 }
 0xa45   :  { %5808 = vmatprep.subr.mxu1 %v2410_v28 }
 0xa46   :  { %5809 = vmatpush3.msra.mxu1 %v2410_v28 }
 0xa48   :  { %v6099_v30 = vpop.eup %6098 }
 0xa49   :  { %v2129_v31 = vmul.f32 %v6099_v30, %v6091_v2  ;;  %v2409_v30 = vld [vmem:[#allocation8] sm:$0xff] }
 0xa4a   :  { %5810 = vmatprep.subr.mxu1 %v2409_v30 }
 0xa4b   :  { %5793 = vmatprep.mubr.msk.f32.mxu0 %vm415_vm2, %v2129_v31  ;;  %5811 = vmatpush3.msra.mxu1 %v2409_v30 }
 0xa4c   :  { %5794 = vmatmul.mubr.msk.f32.vlgmr.msra.gmra.mxu0 %vm415_vm2, %v2130_v32 }
 0xa4d   :  { %5797 = vmatpush3.msra.mxu0 %v325_v33 }
 0xabe   :  { %v5764_v35 = vpop.f32.mrf.mxu0 }
 0xabf   :  { %v1815_v36 = vadd.f32 %v5764_v35, %v1304_v34 }
 0xac0   :  { %v1795_v37 = vpop.f32.mrf.mxu0 }
 0xac1   :  { %v1814_v51 = vadd.f32 %v1795_v37, %v1299_v44 }
 0xaf2   :  { %v5767_v38 = vpop.f32.mrf.mxu0 }
 0xaf3   :  { %v1817_v40 = vadd.f32 %v5767_v38, %v1314_v23 }
 0xaf4   :  { %v1805_v41 = vpop.f32.mrf.mxu0 }
 0xaf5   :  { %v1816_v42 = vadd.f32 %v1805_v41, %v1309_v39  ;;  %v5307_v41 = vld [vmem:[%s7083_s7] ss:$0 sm:$0xff] }
 0xaff   :  { %v5781_v43 = vpop.f32.mrf.mxu0 }
 0xb01   :  { %v2009_v48 = vpop.f32.mrf.mxu0 }
 0xb02   :  { %5798 = vmatprep.mubr.msk.f32.mxu0 %vm115_vm0, %v2009_v48 }
 0xb03   :  { %5799 = vmatmul.mubr.msk.f32.vlgmr.msra.gmra.mxu0 %vm115_vm0, %v5781_v43 }
 0xb0c   :  { %v5795_v49 = vpop.f32.mrf.mxu0 }
 0xb0e   :  { %v2209_v50 = vpop.f32.mrf.mxu0 }
 0xb0f   :  { %5801 = vmatprep.mubr.msk.f32.mxu0 %vm115_vm0, %v2209_v50 }
 0xb10   :  { %5802 = vmatmul.mubr.msk.f32.gmra.mxu0 %vm115_vm0, %v5795_v49 }
 0xbc3   :  { %v5800_v46 = vpop.f32.mrf.mxu0 }
 0xbc4   :  { %v2316_v47 = vadd.f32 %v5800_v46, %v1815_v36  ;;  %v5308_v46 = vld [vmem:[%s7084_s8] ss:$0 sm:$0xff] }
 0xbc5   :  { %v2296_v52 = vpop.f32.mrf.mxu0 }
 0xbc6   :  { %v2320_v54 = vadd.f32 %v2316_v47, %v6447_v15  ;;  %v2315_v55 = vadd.f32 %v2296_v52, %v1814_v51 }
 0xbc8   :  { %v2319_v56 = vadd.f32 %v2315_v55, %v6445_v13  ;;  %v2331_v57 = vadd.f32 %v5306_v53, %v2320_v54 }
 0xbca   :  { %v2339_v58 = vsel %vm224_vm1, %v2331_v57, 0.0  ;;  %v2330_v59 = vadd.f32 %v5306_v53, %v2319_v56 }
 0xbcb   :  { %2340 = vadd.xlane.f32.xlu1 %v2339_v58 }
 0xbcc   :  { %v2336_v45 = vsel %vm224_vm1, %v2330_v59, 0.0 }
 0xbcd   :  { %2337 = vadd.xlane.f32.xlu0 %v2336_v45 }
 0xbd0   :  { %v5803_v60 = vpop.f32.mrf.mxu0 }
 0xbd1   :  { %v2318_v61 = vadd.f32 %v5803_v60, %v1817_v40  ;;  %v2524_v60 = vld [vmem:[%s7087_s11 + $0x18] sm:$0xff] }
 0xbd2   :  { %v2306_v62 = vpop.f32.mrf.mxu0  ;;  %5818 = vmatprep.subr.mxu0 %v2524_v60 }
 0xbd3   :  { %v2317_v63 = vadd.f32 %v2306_v62, %v1816_v42  ;;  %v2322_v0 = vadd.f32 %v2318_v61, %v6451_v18  ;;  %5819 = vmatpush3.msra.mxu0 %v2524_v60  ;;  %v2523_v61 = vld [vmem:[%s7087_s11 + $0x10] sm:$0xff]  ;;  %v2522_v62 = vld [vmem:[%s7087_s11 + $0x8] sm:$0xff] }
 0xbd4   :  { %5820 = vmatprep.subr.mxu0 %v2523_v61 }
 0xbd5   :  { %v2321_v1 = vadd.f32 %v2317_v63, %v6455_v20  ;;  %v2333_v13 = vadd.f32 %v5306_v53, %v2322_v0  ;;  %5821 = vmatpush3.msra.mxu0 %v2523_v61  ;;  %v2521_v63 = vld [vmem:[%s7087_s11] sm:$0xff] }
 0xbd6   :  { %5822 = vmatprep.subr.mxu0 %v2522_v62  ;;  %v5309_v0 = vld [vmem:[%s7086_s10] ss:$0 sm:$0xff] }
 0xbd7   :  { %v2332_v15 = vadd.f32 %v5306_v53, %v2321_v1  ;;  %v2345_v2 = vsel %vm224_vm1, %v2333_v13, 0.0  ;;  %5823 = vmatpush3.msra.mxu0 %v2522_v62 }
 0xbd8   :  { %5824 = vmatprep.subr.mxu0 %v2521_v63 }
 0xbd9   :  { %v2342_v27 = vsel %vm224_vm1, %v2332_v15, 0.0  ;;  %5825 = vmatpush3.msra.mxu0 %v2521_v63 }
 0xbda   :  { %2343 = vadd.xlane.f32.xlu0 %v2342_v27 }
 0xbde   :  { %2346 = vadd.xlane.f32.xlu0 %v2345_v2 }
 0xc54   :  { %v2341_v3 = vpop.xlane.xlu1 %2340 }
 0xc55   :  { %v2350_v4 = vmul.f32 0.03125, %v2341_v3 }
 0xc56   :  { %v2338_v5 = vpop.xlane.xlu0 %2337 }
 0xc57   :  { %v2354_v6 = vsub.f32 %v2331_v57, %v2350_v4  ;;  %v2349_v7 = vmul.f32 0.03125, %v2338_v5 }
 0xc59   :  { %v2353_v8 = vsub.f32 %v2330_v59, %v2349_v7  ;;  %v2358_v9 = vmul.f32 %v2354_v6, %v2354_v6 }
 0xc5b   :  { %v2364_v10 = vsel %vm224_vm1, %v2358_v9, 0.0  ;;  %v2357_v18 = vmul.f32 %v2353_v8, %v2353_v8 }
 0xc5c   :  { %2365 = vadd.xlane.f32.xlu0 %v2364_v10  ;;  %v5314_v10 = vld [vmem:[%s7088_s12] ss:$0 sm:$0xff] }
 0xc5d   :  { %v2361_v20 = vsel %vm224_vm1, %v2357_v18, 0.0 }
 0xc5e   :  { %2362 = vadd.xlane.f32.xlu1 %v2361_v20 }
 0xc63   :  { %v2344_v11 = vpop.xlane.xlu0 %2343 }
 0xc64   :  { %v2351_v12 = vmul.f32 0.03125, %v2344_v11 }
 0xc66   :  { %v2355_v14 = vsub.f32 %v2332_v15, %v2351_v12 }
 0xc67   :  { %v2347_v25 = vpop.xlane.xlu0 %2346 }
 0xc68   :  { %v2352_v29 = vmul.f32 0.03125, %v2347_v25  ;;  %v2359_v16 = vmul.f32 %v2355_v14, %v2355_v14 }
 0xc6a   :  { %v2356_v17 = vsub.f32 %v2333_v13, %v2352_v29  ;;  %v2367_v19 = vsel %vm224_vm1, %v2359_v16, 0.0 }
 0xc6b   :  { %2368 = vadd.xlane.f32.xlu1 %v2367_v19 }
 0xc6c   :  { %v2360_v21 = vmul.f32 %v2356_v17, %v2356_v17 }
 0xc6e   :  { %v2370_v22 = vsel %vm224_vm1, %v2360_v21, 0.0 }
 0xc6f   :  { %2371 = vadd.xlane.f32.xlu0 %v2370_v22 }
 0xce5   :  { %v2366_v31 = vpop.xlane.xlu0 %2365 }
 0xce6   :  { %v2374_v32 = vmul.f32 0.03125, %v2366_v31 }
 0xce7   :  { %v2363_v33 = vpop.xlane.xlu1 %2362 }
 0xce8   :  { %v2378_v34 = vadd.f32 1e-05, %v2374_v32  ;;  %v2373_v35 = vmul.f32 0.03125, %v2363_v33 }
 0xcea   :  { %6100 = vrsqrt.f32 %v2378_v34  ;;  %v2377_v36 = vadd.f32 1e-05, %v2373_v35 }
 0xcec   :  { %6102 = vrsqrt.f32 %v2377_v36 }
 0xcf4   :  { %v2369_v37 = vpop.xlane.xlu1 %2368 }
 0xcf5   :  { %v2375_v23 = vmul.f32 0.03125, %v2369_v37 }
 0xcf7   :  { %v6101_v38 = vpop.eup %6100  ;;  %v2379_v39 = vadd.f32 1e-05, %v2375_v23 }
 0xcf8   :  { %v2372_v40 = vpop.xlane.xlu0 %2371  ;;  %v2386_v42 = vmul.f32 %v6101_v38, %v2354_v6 }
 0xcf9   :  { %v6103_v43 = vpop.eup %6102  ;;  %6104 = vrsqrt.f32 %v2379_v39  ;;  %v2376_v48 = vmul.f32 0.03125, %v2372_v40 }
 0xcfa   :  { %v2385_v49 = vmul.f32 %v6103_v43, %v2353_v8  ;;  %v2396_v44 = vmul.f32 %v5307_v41, %v2386_v42 }
 0xcfb   :  { %v2380_v50 = vadd.f32 1e-05, %v2376_v48 }
 0xcfc   :  { %v2395_v51 = vmul.f32 %v5307_v41, %v2385_v49  ;;  %v2406_v52 = vadd.f32 %v5308_v46, %v2396_v44 }
 0xcfd   :  { %6106 = vrsqrt.f32 %v2380_v50 }
 0xcfe   :  { %v2405_v47 = vadd.f32 %v5308_v46, %v2395_v51 }
 0xd00   :  { %5812 = vmatprep.mubr.msk.f32.mxu1 %vm224_vm1, %v2405_v47 }
 0xd01   :  { %5813 = vmatmul.mubr.msk.f32.vlgmr.msra.gmra.mxu1 %vm224_vm1, %v2406_v52 }
 0xd06   :  { %v6105_v53 = vpop.eup %6104 }
 0xd07   :  { %v2387_v54 = vmul.f32 %v6105_v53, %v2355_v14  ;;  %v2709_v53 = vld [vmem:[#allocation5 + $0x28] sm:$0xff] }
 0xd09   :  { %v2397_v55 = vmul.f32 %v5307_v41, %v2387_v54  ;;  %v2708_v54 = vld [vmem:[#allocation5 + $0x20] sm:$0xff] }
 0xd0a   :  { %v6107_v56 = vpop.eup %6106 }
 0xd0b   :  { %v2407_v57 = vadd.f32 %v5308_v46, %v2397_v55  ;;  %v2388_v58 = vmul.f32 %v6107_v56, %v2356_v17 }
 0xd0d   :  { %5815 = vmatprep.mubr.msk.f32.mxu1 %vm224_vm1, %v2407_v57  ;;  %v2398_v59 = vmul.f32 %v5307_v41, %v2388_v58 }
 0xd0f   :  { %v2408_v45 = vadd.f32 %v5308_v46, %v2398_v59 }
 0xd11   :  { %5816 = vmatmul.mubr.msk.f32.gmra.mxu1 %vm224_vm1, %v2408_v45 }
 0xdc1   :  { %v5814_v1 = vpop.f32.mrf.mxu1 }
 0xdc2   :  { %v2504_v15 = vadd.f32 %v5814_v1, %v5309_v0 }
 0xdc3   :  { %v2498_v27 = vpop.f32.mrf.mxu1 }
 0xdc4   :  { %v2499_v13 = vadd.f32 %v5309_v0, %v2498_v27  ;;  %v2518_v3 = vmax.f32 %v2504_v15, 0.0  ;;  %v5319_v27 = vld [vmem:[%s7089_s13] ss:$0 sm:$0xff] }
 0xdc6   :  { %v2517_v2 = vmax.f32 %v2499_v13, 0.0 }
 0xdc8   :  { %5826 = vmatprep.mubr.msk.f32.mxu0 %vm224_vm1, %v2517_v2 }
 0xdc9   :  { %5827 = vmatmul.mubr.msk.f32.vlgmr.msra.gmra.mxu0 %vm224_vm1, %v2518_v3 }
 0xdd1   :  { %v5817_v4 = vpop.f32.mrf.mxu1 }
 0xdd2   :  { %v2514_v5 = vadd.f32 %v5817_v4, %v5309_v0 }
 0xdd3   :  { %v2508_v6 = vpop.f32.mrf.mxu1 }
 0xdd4   :  { %v2509_v7 = vadd.f32 %v5309_v0, %v2508_v6  ;;  %v2520_v9 = vmax.f32 %v2514_v5, 0.0  ;;  %v5320_v5 = vld [vmem:[%s7090_s14] ss:$0 sm:$0xff] }
 0xdd6   :  { %v2519_v8 = vmax.f32 %v2509_v7, 0.0 }
 0xdd8   :  { %5829 = vmatprep.mubr.msk.f32.mxu0 %vm224_vm1, %v2519_v8 }
 0xdd9   :  { %5830 = vmatmul.mubr.msk.f32.gmra.mxu0 %vm224_vm1, %v2520_v9 }
 0xe89   :  { %v5828_v18 = vpop.f32.mrf.mxu0 }
 0xe8a   :  { %v2616_v20 = vadd.f32 %v5828_v18, %v5314_v10 }
 0xe8b   :  { %v2610_v11 = vpop.f32.mrf.mxu0 }
 0xe8c   :  { %v2611_v12 = vadd.f32 %v5314_v10, %v2610_v11  ;;  %v2630_v14 = vadd.f32 %v2616_v20, %v2406_v52  ;;  %v2710_v52 = vld [vmem:[#allocation5 + $0x30] sm:$0xff] }
 0xe8e   :  { %v2638_v25 = vsel %vm224_vm1, %v2630_v14, 0.0  ;;  %v2629_v29 = vadd.f32 %v2611_v12, %v2405_v47  ;;  %v2711_v47 = vld [vmem:[#allocation5 + $0x38] sm:$0xff] }
 0xe8f   :  { %2639 = vadd.xlane.f32.xlu0 %v2638_v25  ;;  %5832 = vmatprep.subr.mxu1 %v2711_v47 }
 0xe90   :  { %v2635_v16 = vsel %vm224_vm1, %v2629_v29, 0.0  ;;  %5833 = vmatpush3.msra.mxu1 %v2711_v47 }
 0xe91   :  { %2636 = vadd.xlane.f32.xlu1 %v2635_v16  ;;  %5834 = vmatprep.subr.mxu1 %v2710_v52 }
 0xe92   :  { %5835 = vmatpush3.msra.mxu1 %v2710_v52 }
 0xe93   :  { %5836 = vmatprep.subr.mxu1 %v2709_v53 }
 0xe94   :  { %5837 = vmatpush3.msra.mxu1 %v2709_v53 }
 0xe95   :  { %5838 = vmatprep.subr.mxu1 %v2708_v54 }
 0xe96   :  { %5839 = vmatpush3.msra.mxu1 %v2708_v54 }
 0xe99   :  { %v5831_v17 = vpop.f32.mrf.mxu0 }
 0xe9a   :  { %v2626_v19 = vadd.f32 %v5831_v17, %v5314_v10 }
 0xe9b   :  { %v2620_v21 = vpop.f32.mrf.mxu0 }
 0xe9c   :  { %v2621_v22 = vadd.f32 %v5314_v10, %v2620_v21  ;;  %v2632_v24 = vadd.f32 %v2626_v19, %v2408_v45 }
 0xe9e   :  { %v2644_v26 = vsel %vm224_vm1, %v2632_v24, 0.0  ;;  %v2631_v28 = vadd.f32 %v2621_v22, %v2407_v57 }
 0xe9f   :  { %2645 = vadd.xlane.f32.xlu0 %v2644_v26 }
 0xea0   :  { %v2641_v30 = vsel %vm224_vm1, %v2631_v28, 0.0 }
 0xea1   :  { %2642 = vadd.xlane.f32.xlu1 %v2641_v30 }
 0xf18   :  { %v2640_v31 = vpop.xlane.xlu0 %2639 }
 0xf19   :  { %v2648_v32 = vmul.f32 0.03125, %v2640_v31 }
 0xf1a   :  { %v2637_v33 = vpop.xlane.xlu1 %2636 }
 0xf1b   :  { %v2652_v34 = vsub.f32 %v2630_v14, %v2648_v32  ;;  %v2647_v35 = vmul.f32 0.03125, %v2637_v33 }
 0xf1d   :  { %v2651_v36 = vsub.f32 %v2629_v29, %v2647_v35  ;;  %v2656_v37 = vmul.f32 %v2652_v34, %v2652_v34  ;;  %v5322_v29 = vld [vmem:[%s7080_s4 + $0x1] ss:$0 sm:$0xff] }
 0xf1f   :  { %v2662_v23 = vsel %vm224_vm1, %v2656_v37, 0.0  ;;  %v2655_v38 = vmul.f32 %v2651_v36, %v2651_v36 }
 0xf20   :  { %2663 = vadd.xlane.f32.xlu0 %v2662_v23 }
 0xf21   :  { %v2659_v39 = vsel %vm224_vm1, %v2655_v38, 0.0 }
 0xf22   :  { %2660 = vadd.xlane.f32.xlu1 %v2659_v39 }
 0xf28   :  { %v2646_v40 = vpop.xlane.xlu0 %2645 }
 0xf29   :  { %v2650_v41 = vmul.f32 0.03125, %v2646_v40 }
 0xf2a   :  { %v2643_v42 = vpop.xlane.xlu1 %2642 }
 0xf2b   :  { %v2654_v43 = vsub.f32 %v2632_v24, %v2650_v41  ;;  %v2649_v48 = vmul.f32 0.03125, %v2643_v42 }
 0xf2d   :  { %v2653_v49 = vsub.f32 %v2631_v28, %v2649_v48  ;;  %v2658_v50 = vmul.f32 %v2654_v43, %v2654_v43 }
 0xf2f   :  { %v2668_v44 = vsel %vm224_vm1, %v2658_v50, 0.0  ;;  %v2657_v46 = vmul.f32 %v2653_v49, %v2653_v49 }
 0xf30   :  { %2669 = vadd.xlane.f32.xlu0 %v2668_v44 }
 0xf31   :  { %v2665_v51 = vsel %vm224_vm1, %v2657_v46, 0.0 }
 0xf32   :  { %2666 = vadd.xlane.f32.xlu1 %v2665_v51 }
 0xfa9   :  { %v2664_v55 = vpop.xlane.xlu0 %2663 }
 0xfaa   :  { %v2672_v56 = vmul.f32 0.03125, %v2664_v55 }
 0xfab   :  { %v2661_v57 = vpop.xlane.xlu1 %2660 }
 0xfac   :  { %v2676_v58 = vadd.f32 1e-05, %v2672_v56  ;;  %v2671_v59 = vmul.f32 0.03125, %v2661_v57 }
 0xfae   :  { %6108 = vrsqrt.f32 %v2676_v58  ;;  %v2675_v45 = vadd.f32 1e-05, %v2671_v59 }
 0xfb0   :  { %6110 = vrsqrt.f32 %v2675_v45 }
 0xfb9   :  { %v2670_v60 = vpop.xlane.xlu0 %2669 }
 0xfba   :  { %v2674_v61 = vmul.f32 0.03125, %v2670_v60 }
 0xfbb   :  { %v6109_v62 = vpop.eup %6108  ;;  %v2667_v63 = vpop.xlane.xlu1 %2666 }
 0xfbc   :  { %v2684_v0 = vmul.f32 %v6109_v62, %v2652_v34  ;;  %v2678_v1 = vadd.f32 1e-05, %v2674_v61  ;;  %v2673_v15 = vmul.f32 0.03125, %v2667_v63 }
 0xfbd   :  { %v6111_v13 = vpop.eup %6110 }
 0xfbe   :  { %6112 = vrsqrt.f32 %v2678_v1  ;;  %v2677_v2 = vadd.f32 1e-05, %v2673_v15  ;;  %v2683_v3 = vmul.f32 %v6111_v13, %v2651_v36  ;;  %v2694_v4 = vmul.f32 %v5319_v27, %v2684_v0 }
 0xfc0   :  { %6114 = vrsqrt.f32 %v2677_v2  ;;  %v2693_v6 = vmul.f32 %v5319_v27, %v2683_v3  ;;  %v6761_v8 = vadd.f32 %v5320_v5, %v2694_v4 }
 0xfc2   :  { %v6759_v7 = vadd.f32 %v5320_v5, %v2693_v6 }
 0xfc4   :  { %5840 = vmatprep.mubr.msk.f32.mxu1 %vm224_vm1, %v6759_v7 }
 0xfc5   :  { %5841 = vmatmul.mubr.msk.f32.vlgmr.msra.gmra.mxu1 %vm224_vm1, %v6761_v8 }
 0xfcb   :  { %v6113_v9 = vpop.eup %6112 }
 0xfcc   :  { %v2686_v10 = vmul.f32 %v6113_v9, %v2654_v43 }
 0xfcd   :  { %v6115_v18 = vpop.eup %6114 }
 0xfce   :  { %v2685_v20 = vmul.f32 %v6115_v18, %v2653_v49  ;;  %v2696_v11 = vmul.f32 %v5319_v27, %v2686_v10 }
 0xfd0   :  { %v2695_v12 = vmul.f32 %v5319_v27, %v2685_v20  ;;  %v6769_v25 = vadd.f32 %v5320_v5, %v2696_v11 }
 0xfd2   :  { %v6767_v14 = vadd.f32 %v5320_v5, %v2695_v12 }
 0xfd4   :  { %5843 = vmatprep.mubr.msk.f32.mxu1 %vm224_vm1, %v6767_v14 }
 0xfd5   :  { %5844 = vmatmul.mubr.msk.f32.gmra.mxu1 %vm224_vm1, %v6769_v25 }
0x1085   :  { %v5842_v16 = vpop.f32.mrf.mxu1 }
0x1086   :  { %v6778_v17 = vadd.f32 %v5842_v16, %v5322_v29 }
0x1087   :  { %v2798_v19 = vpop.f32.mrf.mxu1 }
0x1088   :  { %v6780_v21 = vadd.f32 %v5322_v29, %v2798_v19  ;;  %2826 = vrot.lane.b32.xlu1 %v6778_v17, %s6310_s18 }
0x108a   :  { %5850 = vmatprep.mubr.msk.f32.mxu0 %vm115_vm0, %v6780_v21 }
0x108c   :  { %2824 = vrot.lane.b32.xlu1 %v6780_v21, %s6310_s18 }
0x1095   :  { %v5845_v22 = vpop.f32.mrf.mxu1 }
0x1096   :  { %v6788_v24 = vadd.f32 %v5845_v22, %v5322_v29 }
0x1097   :  { %v2808_v26 = vpop.f32.mrf.mxu1 }
0x1098   :  { %v6790_v28 = vadd.f32 %v5322_v29, %v2808_v26  ;;  %3024 = vrot.lane.b32.xlu0 %v6788_v24, %s6310_s18 }
0x109a   :  { %3022 = vrot.lane.b32.xlu1 %v6790_v28, %s6310_s18  ;;  %5864 = vmatprep.mubr.msk.f32.mxu1 %vm115_vm0, %v6790_v28 }
0x109c   :  { %3224 = vrot.lane.b32.xlu0 %v6778_v17, %s6311_s3 }
0x109e   :  { %3222 = vrot.lane.b32.xlu1 %v6780_v21, %s6311_s3 }
0x10a0   :  { %3218 = vrot.lane.b32.xlu0 %v6780_v21, %s6312_s19 }
0x10a2   :  { %3220 = vrot.lane.b32.xlu1 %v6778_v17, %s6312_s19 }
0x10fa   :  { %v2827_v30 = vpop.permute.xlu1 %2826 }
0x10fb   :  { %5846 = vmatprep.subr.msk.mxu0 %vm115_vm0, %v2827_v30 }
0x10fc   :  { %5847 = vmatpush3.xpose.msk.msra.mxu0 %vm115_vm0, %v2827_v30 }
0x10fe   :  { %v2825_v31 = vpop.permute.xlu1 %2824 }
0x10ff   :  { %5848 = vmatprep.subr.msk.mxu0 %vm115_vm0, %v2825_v31 }
0x1100   :  { %5849 = vmatpush3.xpose.msk.msra.mxu0 %vm115_vm0, %v2825_v31 }
0x1103   :  { %5851 = vmatmul.mubr.msk.f32.vlgmr.msra.gmra.mxu0 %vm115_vm0, %v6778_v17 }
0x110a   :  { %v3025_v32 = vpop.permute.xlu0 %3024 }
0x110b   :  { %5860 = vmatprep.subr.msk.mxu1 %vm115_vm0, %v3025_v32 }
0x110c   :  { %5861 = vmatpush3.xpose.msk.msra.mxu1 %vm115_vm0, %v3025_v32  ;;  %v3023_v33 = vpop.permute.xlu1 %3022 }
0x110d   :  { %5862 = vmatprep.subr.msk.mxu1 %vm115_vm0, %v3023_v33 }
0x110e   :  { %v3225_v34 = vpop.permute.xlu0 %3224 }
0x1110   :  { %5863 = vmatpush3.xpose.msk.msra.mxu1 %vm115_vm0, %v3023_v33  ;;  %v3223_v36 = vpop.permute.xlu1 %3222 }
0x1111   :  { %5874 = vmatprep.subr.msk.mxu1 %vm115_vm0, %v3225_v34 }
0x1112   :  { %v3219_v35 = vpop.permute.xlu0 %3218 }
0x1113   :  { %5865 = vmatmul.mubr.msk.f32.vlgmr.msra.gmra.mxu1 %vm115_vm0, %v6788_v24 }
0x1114   :  { %5875 = vmatpush3.xpose.msk.msra.mxu1 %vm115_vm0, %v3225_v34  ;;  %5878 = vmatprep.mubr.msk.f32.mxu1 %vm115_vm0, %v3219_v35  ;;  %v3221_v37 = vpop.permute.xlu1 %3220 }
0x1115   :  { %5876 = vmatprep.subr.msk.mxu1 %vm115_vm0, %v3223_v36 }
0x1118   :  { %5877 = vmatpush3.xpose.msk.msra.mxu1 %vm115_vm0, %v3223_v36 }
0x111b   :  { %5879 = vmatmul.mubr.msk.f32.vlgmr.msra.gmra.mxu1 %vm115_vm0, %v3221_v37 }
0x11c3   :  { %v5852_v23 = vpop.f32.mrf.mxu0 }
0x11c4   :  { %v2914_v38 = vsel %vm415_vm2, %v5852_v23, -inf }
0x11c5   :  { %v2902_v39 = vpop.f32.mrf.mxu0  ;;  %2915 = vmax.xlane.f32.xlu1 %v2914_v38 }
0x11c6   :  { %v2911_v40 = vsel %vm415_vm2, %v2902_v39, -inf }
0x11c7   :  { %2912 = vmax.xlane.f32.xlu0 %v2911_v40 }
0x11d3   :  { %v5866_v41 = vpop.f32.mrf.mxu1 }
0x11d4   :  { %v3112_v48 = vsel %vm415_vm2, %v5866_v41, -inf }
0x11d5   :  { %v3100_v42 = vpop.f32.mrf.mxu1 }
0x11d6   :  { %2935 = vrot.lane.b32.xlu1 %v6778_v17, %s6313_s20  ;;  %v3109_v43 = vsel %vm415_vm2, %v3100_v42, -inf }
0x11d7   :  { %3110 = vmax.xlane.f32.xlu0 %v3109_v43 }
0x11da   :  { %3133 = vrot.lane.b32.xlu1 %v6788_v24, %s6313_s20 }
0x11db   :  { %v5880_v49 = vpop.f32.mrf.mxu1  ;;  %3113 = vmax.xlane.f32.xlu0 %v3112_v48 }
0x11dc   :  { %v3312_v50 = vsel %vm415_vm2, %v5880_v49, -inf }
0x11dd   :  { %v3300_v44 = vpop.f32.mrf.mxu1 }
0x11de   :  { %3131 = vrot.lane.b32.xlu1 %v6790_v28, %s6313_s20  ;;  %v3309_v46 = vsel %vm415_vm2, %v3300_v44, -inf }
0x11df   :  { %3313 = vmax.xlane.f32.xlu0 %v3312_v50 }
0x11f5   :  { %2933 = vrot.lane.b32.xlu0 %v6780_v21, %s6313_s20 }
0x11f9   :  { %3333 = vrot.lane.b32.xlu0 %v6778_v17, %s6314_s2 }
0x1202   :  { %3310 = vmax.xlane.f32.xlu1 %v3309_v46 }
0x1213   :  { %3331 = vrot.lane.b32.xlu1 %v6780_v21, %s6314_s2 }
0x124e   :  { %v2916_v51 = vpop.xlane.xlu1 %2915 }
0x124f   :  { %v2918_v47 = vsub.f32 %v5852_v23, %v2916_v51 }
0x1250   :  { %v2913_v52 = vpop.xlane.xlu0 %2912 }
0x1251   :  { %v2921_v53 = vmul.f32 1.442695, %v2918_v47  ;;  %v2917_v54 = vsub.f32 %v2902_v39, %v2913_v52  ;;  %v2818_v47 = vld [vmem:[#allocation7 + $0x20] sm:$0xff] }
0x1252   :  { %v2936_v55 = vpop.permute.xlu1 %2935 }
0x1253   :  { %6116 = vpow2.f32 %v2921_v53  ;;  %v2919_v56 = vmul.f32 1.442695, %v2917_v54  ;;  %5853 = vmatprep.subr.mxu0 %v2936_v55 }
0x1254   :  { %5854 = vmatpush3.msra.mxu0 %v2936_v55 }
0x1255   :  { %6118 = vpow2.f32 %v2919_v56 }
0x1256   :  { %v3134_v3 = vpop.permute.xlu1 %3133 }
0x125a   :  { %v3132_v20 = vpop.permute.xlu1 %3131 }
0x1260   :  { %v6117_v57 = vpop.eup %6116  ;;  %v3111_v58 = vpop.xlane.xlu0 %3110 }
0x1261   :  { %v3115_v59 = vsub.f32 %v3100_v42, %v3111_v58  ;;  %v2926_v45 = vsel %vm415_vm2, %v6117_v57, 0.0 }
0x1262   :  { %v6119_v60 = vpop.eup %6118  ;;  %2927 = vadd.xlane.f32.xlu0 %v2926_v45 }
0x1263   :  { %v3117_v61 = vmul.f32 1.442695, %v3115_v59  ;;  %v2923_v62 = vsel %vm415_vm2, %v6119_v60, 0.0 }
0x1264   :  { %v3114_v63 = vpop.xlane.xlu0 %3113  ;;  %2924 = vadd.xlane.f32.xlu1 %v2923_v62 }
0x1265   :  { %6120 = vpow2.f32 %v3117_v61  ;;  %v3116_v0 = vsub.f32 %v5866_v41, %v3114_v63 }
0x1267   :  { %v3119_v1 = vmul.f32 1.442695, %v3116_v0 }
0x1268   :  { %v3314_v15 = vpop.xlane.xlu0 %3313 }
0x1269   :  { %6122 = vpow2.f32 %v3119_v1  ;;  %v3316_v27 = vsub.f32 %v5880_v49, %v3314_v15 }
0x126b   :  { %v3319_v13 = vmul.f32 1.442695, %v3316_v27 }
0x126c   :  { %v2934_v2 = vpop.permute.xlu0 %2933 }
0x126d   :  { %6124 = vpow2.f32 %v3319_v13  ;;  %5855 = vmatprep.subr.mxu0 %v2934_v2 }
0x126e   :  { %5856 = vmatpush3.msra.mxu0 %v2934_v2 }
0x126f   :  { %5867 = vmatprep.subr.mxu0 %v3134_v3 }
0x1270   :  { %v3334_v22 = vpop.permute.xlu0 %3333 }
0x1272   :  { %v6121_v4 = vpop.eup %6120 }
0x1273   :  { %v3121_v5 = vsel %vm415_vm2, %v6121_v4, 0.0 }
0x1274   :  { %3122 = vadd.xlane.f32.xlu1 %v3121_v5 }
0x1276   :  { %v6123_v6 = vpop.eup %6122 }
0x1277   :  { %v3124_v9 = vsel %vm415_vm2, %v6123_v6, 0.0 }
0x1278   :  { %3125 = vadd.xlane.f32.xlu0 %v3124_v9 }
0x127a   :  { %v6125_v10 = vpop.eup %6124 }
0x127b   :  { %v3324_v18 = vsel %vm415_vm2, %v6125_v10, 0.0 }
0x127c   :  { %3325 = vadd.xlane.f32.xlu0 %v3324_v18  ;;  %v2819_v18 = vld [vmem:[#allocation7 + $0x28] sm:$0xff] }
0x1285   :  { %3422 = vrot.lane.b32.xlu1 %v6790_v28, %s6311_s3 }
0x128b   :  { %v3311_v11 = vpop.xlane.xlu1 %3310 }
0x128c   :  { %v3315_v12 = vsub.f32 %v3300_v44, %v3311_v11 }
0x128e   :  { %v3317_v29 = vmul.f32 1.442695, %v3315_v12 }
0x128f   :  { %v3332_v26 = vpop.permute.xlu1 %3331 }
0x1290   :  { %6126 = vpow2.f32 %v3317_v29 }
0x1292   :  { %3424 = vrot.lane.b32.xlu0 %v6788_v24, %s6311_s3 }
0x1296   :  { %3418 = vrot.lane.b32.xlu0 %v6790_v28, %s6312_s19 }
0x129d   :  { %v6127_v16 = vpop.eup %6126 }
0x129e   :  { %v3321_v19 = vsel %vm415_vm2, %v6127_v16, 0.0 }
0x12a9   :  { %3322 = vadd.xlane.f32.xlu1 %v3321_v19 }
0x12ba   :  { %3420 = vrot.lane.b32.xlu1 %v6788_v24, %s6312_s19 }
0x12eb   :  { %v2928_v30 = vpop.xlane.xlu0 %2927 }
0x12ec   :  { %6128 = vrcp.f32 %v2928_v30 }
0x12ed   :  { %v2925_v31 = vpop.xlane.xlu1 %2924 }
0x12ee   :  { %6130 = vrcp.f32 %v2925_v31 }
0x12f9   :  { %v6129_v32 = vpop.eup %6128 }
0x12fa   :  { %v2932_v36 = vmul.f32 %v6129_v32, %v6117_v57 }
0x12fb   :  { %v6131_v33 = vpop.eup %6130 }
0x12fc   :  { %v2931_v34 = vmul.f32 %v6131_v33, %v6119_v60 }
0x12fd   :  { %v3123_v35 = vpop.xlane.xlu1 %3122 }
0x12fe   :  { %6132 = vrcp.f32 %v3123_v35  ;;  %5857 = vmatprep.mubr.msk.f32.mxu0 %vm415_vm2, %v2931_v34 }
0x12ff   :  { %5858 = vmatmul.mubr.msk.f32.vlgmr.msra.gmra.mxu0 %vm415_vm2, %v2932_v36 }
0x1300   :  { %5868 = vmatpush3.msra.mxu0 %v3134_v3 }
0x1301   :  { %5869 = vmatprep.subr.mxu0 %v3132_v20  ;;  %v3126_v37 = vpop.xlane.xlu0 %3125  ;;  %v3423_v43 = vpop.permute.xlu1 %3422 }
0x1302   :  { %6134 = vrcp.f32 %v3126_v37  ;;  %5870 = vmatpush3.msra.mxu0 %v3132_v20 }
0x1303   :  { %5881 = vmatprep.subr.mxu0 %v3334_v22 }
0x1305   :  { %v3326_v40 = vpop.xlane.xlu0 %3325 }
0x1306   :  { %6136 = vrcp.f32 %v3326_v40 }
0x1309   :  { %v3425_v42 = vpop.permute.xlu0 %3424 }
0x130b   :  { %v6133_v23 = vpop.eup %6132 }
0x130c   :  { %v3129_v38 = vmul.f32 %v6133_v23, %v6121_v4 }
0x130d   :  { %v3419_v51 = vpop.permute.xlu0 %3418 }
0x130e   :  { %5871 = vmatprep.mubr.msk.f32.mxu0 %vm415_vm2, %v3129_v38 }
0x130f   :  { %v6135_v39 = vpop.eup %6134 }
0x1310   :  { %v3130_v41 = vmul.f32 %v6135_v39, %v6123_v6 }
0x1312   :  { %5872 = vmatmul.mubr.msk.f32.vlgmr.msra.gmra.mxu0 %vm415_vm2, %v3130_v41 }
0x1313   :  { %5882 = vmatpush3.msra.mxu0 %v3334_v22  ;;  %v6137_v49 = vpop.eup %6136 }
0x1314   :  { %5883 = vmatprep.subr.mxu0 %v3332_v26  ;;  %v3330_v46 = vmul.f32 %v6137_v49, %v6125_v10 }
0x1315   :  { %5884 = vmatpush3.msra.mxu0 %v3332_v26 }
0x1316   :  { %5888 = vmatprep.subr.msk.mxu0 %vm115_vm0, %v3425_v42 }
0x1332   :  { %v3323_v48 = vpop.xlane.xlu1 %3322 }
0x1333   :  { %6138 = vrcp.f32 %v3323_v48 }
0x1336   :  { %v3421_v52 = vpop.permute.xlu1 %3420 }
0x1340   :  { %v6139_v50 = vpop.eup %6138 }
0x1341   :  { %v3329_v44 = vmul.f32 %v6139_v50, %v6127_v16 }
0x1343   :  { %5885 = vmatprep.mubr.msk.f32.mxu0 %vm415_vm2, %v3329_v44 }
0x1344   :  { %5886 = vmatmul.mubr.msk.f32.vlgmr.msra.gmra.mxu0 %vm415_vm2, %v3330_v46 }
0x1345   :  { %5889 = vmatpush3.xpose.msk.msra.mxu0 %vm115_vm0, %v3425_v42  ;;  %5892 = vmatprep.mubr.msk.f32.mxu0 %vm115_vm0, %v3419_v51 }
0x1346   :  { %5890 = vmatprep.subr.msk.mxu0 %vm115_vm0, %v3423_v43 }
0x1349   :  { %5891 = vmatpush3.xpose.msk.msra.mxu0 %vm115_vm0, %v3423_v43 }
0x134a   :  { %5910 = vmatprep.subr.mxu0 %v2818_v47 }
0x134c   :  { %5893 = vmatmul.mubr.msk.f32.vlgmr.msra.gmra.mxu0 %vm115_vm0, %v3421_v52 }
0x134d   :  { %5911 = vmatpush3.msra.mxu0 %v2818_v47 }
0x13bf   :  { %v5859_v53 = vpop.f32.mrf.mxu0 }
0x13c1   :  { %v3011_v54 = vpop.f32.mrf.mxu0 }
0x13c2   :  { %5912 = vmatprep.mubr.msk.f32.mxu0 %vm115_vm0, %v3011_v54 }
0x13c3   :  { %5913 = vmatmul.mubr.msk.f32.vlgmr.msra.gmra.mxu0 %vm115_vm0, %v5859_v53 }
0x13d2   :  { %v5873_v55 = vpop.f32.mrf.mxu0 }
0x13d4   :  { %v3209_v56 = vpop.f32.mrf.mxu0 }
0x13d5   :  { %5915 = vmatprep.mubr.msk.f32.mxu0 %vm115_vm0, %v3209_v56 }
0x13d6   :  { %5916 = vmatmul.mubr.msk.f32.gmra.mxu0 %vm115_vm0, %v5873_v55 }
0x1404   :  { %v6872_v57 = vpop.f32.mrf.mxu0 }
0x1406   :  { %v3409_v58 = vpop.f32.mrf.mxu0 }
0x140c   :  { %v5894_v59 = vpop.f32.mrf.mxu0 }
0x140d   :  { %v3512_v45 = vsel %vm415_vm2, %v5894_v59, -inf }
0x140e   :  { %3513 = vmax.xlane.f32.xlu1 %v3512_v45  ;;  %v3500_v60 = vpop.f32.mrf.mxu0 }
0x140f   :  { %v3509_v61 = vsel %vm415_vm2, %v3500_v60, -inf }
0x1410   :  { %3510 = vmax.xlane.f32.xlu0 %v3509_v61 }
0x141f   :  { %3533 = vrot.lane.b32.xlu1 %v6788_v24, %s6314_s2 }
0x1423   :  { %3818 = vrot.lane.b32.xlu1 %v6778_v17, %s6315_s21 }
0x1427   :  { %3816 = vrot.lane.b32.xlu1 %v6780_v21, %s6315_s21 }
0x142b   :  { %4018 = vrot.lane.b32.xlu1 %v6788_v24, %s6315_s21 }
0x142f   :  { %4016 = vrot.lane.b32.xlu1 %v6790_v28, %s6315_s21 }
0x1433   :  { %4014 = vrot.lane.b32.xlu1 %v6788_v24, %s6316_s22 }
0x1437   :  { %4317 = vrot.lane.b32.xlu1 %v6780_v21, %s6317_s5 }
0x143b   :  { %4519 = vrot.lane.b32.xlu1 %v6788_v24, %s6317_s5 }
0x143f   :  { %4517 = vrot.lane.b32.xlu1 %v6790_v28, %s6317_s5 }
0x1443   :  { %4515 = vrot.lane.b32.xlu1 %v6788_v24, %s6318_s25 }
0x1497   :  { %v3514_v62 = vpop.xlane.xlu1 %3513 }
0x1498   :  { %v3516_v63 = vsub.f32 %v5894_v59, %v3514_v62 }
0x1499   :  { %v3511_v0 = vpop.xlane.xlu0 %3510 }
0x149a   :  { %v3519_v1 = vmul.f32 1.442695, %v3516_v63  ;;  %v3515_v15 = vsub.f32 %v3500_v60, %v3511_v0 }
0x149b   :  { %v3534_v27 = vpop.permute.xlu1 %3533 }
0x149c   :  { %6140 = vpow2.f32 %v3519_v1  ;;  %v3517_v13 = vmul.f32 1.442695, %v3515_v15  ;;  %5895 = vmatprep.subr.mxu1 %v3534_v27 }
0x149d   :  { %5896 = vmatpush3.msra.mxu1 %v3534_v27 }
0x149e   :  { %6142 = vpow2.f32 %v3517_v13 }
0x149f   :  { %v3819_v12 = vpop.permute.xlu1 %3818 }
0x14a3   :  { %v3817_v19 = vpop.permute.xlu1 %3816 }
0x14a7   :  { %v4019_v22 = vpop.permute.xlu1 %4018 }
0x14a9   :  { %v6141_v2 = vpop.eup %6140 }
0x14aa   :  { %v3524_v3 = vsel %vm415_vm2, %v6141_v2, 0.0 }
0x14ab   :  { %v6143_v4 = vpop.eup %6142  ;;  %3525 = vadd.xlane.f32.xlu0 %v3524_v3  ;;  %v4017_v33 = vpop.permute.xlu1 %4016 }
0x14ac   :  { %v3521_v5 = vsel %vm415_vm2, %v6143_v4, 0.0 }
0x14af   :  { %3522 = vadd.xlane.f32.xlu0 %v3521_v5  ;;  %v4015_v36 = vpop.permute.xlu1 %4014 }
0x14b3   :  { %v4318_v23 = vpop.permute.xlu1 %4317 }
0x14b7   :  { %v4520_v39 = vpop.permute.xlu1 %4519 }
0x14bb   :  { %v4518_v41 = vpop.permute.xlu1 %4517 }
0x14bf   :  { %v4516_v42 = vpop.permute.xlu1 %4515 }
0x14c5   :  { %3531 = vrot.lane.b32.xlu0 %v6790_v28, %s6314_s2 }
0x14c9   :  { %3812 = vrot.lane.b32.xlu0 %v6780_v21, %s6316_s22 }
0x14cd   :  { %3814 = vrot.lane.b32.xlu0 %v6778_v17, %s6316_s22 }
0x14d1   :  { %4012 = vrot.lane.b32.xlu0 %v6790_v28, %s6316_s22 }
0x14d5   :  { %4319 = vrot.lane.b32.xlu0 %v6778_v17, %s6317_s5 }
0x14d9   :  { %4313 = vrot.lane.b32.xlu0 %v6780_v21, %s6318_s25 }
0x14dd   :  { %4315 = vrot.lane.b32.xlu0 %v6778_v17, %s6318_s25 }
0x14e1   :  { %4513 = vrot.lane.b32.xlu0 %v6790_v28, %s6318_s25 }
0x1534   :  { %v3526_v6 = vpop.xlane.xlu0 %3525 }
0x1535   :  { %6144 = vrcp.f32 %v3526_v6 }
0x1538   :  { %v3523_v9 = vpop.xlane.xlu0 %3522 }
0x1539   :  { %6146 = vrcp.f32 %v3523_v9 }
0x153c   :  { %v3532_v10 = vpop.permute.xlu0 %3531 }
0x153d   :  { %5897 = vmatprep.subr.mxu1 %v3532_v10 }
0x153e   :  { %5898 = vmatpush3.msra.mxu1 %v3532_v10 }
0x153f   :  { %5902 = vmatprep.subr.mxu1 %v2819_v18 }
0x1540   :  { %v3813_v26 = vpop.permute.xlu0 %3812 }
0x1542   :  { %v6145_v20 = vpop.eup %6144 }
0x1543   :  { %v3530_v16 = vmul.f32 %v6145_v20, %v6141_v2 }
0x1544   :  { %v3815_v30 = vpop.permute.xlu0 %3814 }
0x1546   :  { %v6147_v11 = vpop.eup %6146 }
0x1547   :  { %v3529_v29 = vmul.f32 %v6147_v11, %v6143_v4 }
0x1548   :  { %v4013_v31 = vpop.permute.xlu0 %4012 }
0x1549   :  { %5899 = vmatprep.mubr.msk.f32.mxu1 %vm415_vm2, %v3529_v29 }
0x154a   :  { %5900 = vmatmul.mubr.msk.f32.vlgmr.msra.gmra.mxu1 %vm415_vm2, %v3530_v16 }
0x154b   :  { %5903 = vmatpush3.msra.mxu1 %v2819_v18  ;;  %5904 = vmatprep.mubr.msk.f32.mxu1 %vm115_vm0, %v3409_v58 }
0x154c   :  { %5918 = vmatprep.subr.msk.mxu1 %vm115_vm0, %v3819_v12  ;;  %v4320_v35 = vpop.permute.xlu0 %4319 }
0x154e   :  { %5905 = vmatmul.mubr.msk.f32.vlgmr.msra.gmra.mxu1 %vm115_vm0, %v6872_v57 }
0x154f   :  { %5919 = vmatpush3.xpose.msk.msra.mxu1 %vm115_vm0, %v3819_v12 }
0x1550   :  { %5920 = vmatprep.subr.msk.mxu1 %vm115_vm0, %v3817_v19  ;;  %v4314_v37 = vpop.permute.xlu0 %4313 }
0x1553   :  { %5921 = vmatpush3.xpose.msk.msra.mxu1 %vm115_vm0, %v3817_v19 }
0x1554   :  { %5932 = vmatprep.subr.msk.mxu1 %vm115_vm0, %v4019_v22  ;;  %v4316_v38 = vpop.permute.xlu0 %4315 }
0x1558   :  { %v4514_v40 = vpop.permute.xlu0 %4513 }
0x160a   :  { %v5901_v32 = vpop.f32.mrf.mxu1 }
0x160c   :  { %v3609_v34 = vpop.f32.mrf.mxu1 }
0x160d   :  { %5907 = vmatprep.mubr.msk.f32.mxu1 %vm115_vm0, %v3609_v34 }
0x160e   :  { %5908 = vmatmul.mubr.msk.f32.gmra.mxu1 %vm115_vm0, %v5901_v32  ;;  %v6945_v43 = vpop.f32.mrf.mxu1 }
0x160f   :  { %5922 = vmatprep.mubr.msk.f32.mxu1 %vm115_vm0, %v3813_v26 }
0x1610   :  { %v6947_v48 = vpop.f32.mrf.mxu1 }
0x1612   :  { %5923 = vmatmul.mubr.msk.f32.vlgmr.msra.gmra.mxu1 %vm115_vm0, %v3815_v30 }
0x1613   :  { %5933 = vmatpush3.xpose.msk.msra.mxu1 %vm115_vm0, %v4019_v22  ;;  %5936 = vmatprep.mubr.msk.f32.mxu1 %vm115_vm0, %v4013_v31 }
0x1614   :  { %5934 = vmatprep.subr.msk.mxu1 %vm115_vm0, %v4017_v33 }
0x1617   :  { %5935 = vmatpush3.xpose.msk.msra.mxu1 %vm115_vm0, %v4017_v33 }
0x1618   :  { %5954 = vmatprep.subr.msk.mxu1 %vm115_vm0, %v4320_v35 }
0x161a   :  { %5937 = vmatmul.mubr.msk.f32.vlgmr.msra.gmra.mxu1 %vm115_vm0, %v4015_v36 }
0x161b   :  { %5955 = vmatpush3.xpose.msk.msra.mxu1 %vm115_vm0, %v4320_v35  ;;  %5958 = vmatprep.mubr.msk.f32.mxu1 %vm115_vm0, %v4314_v37 }
0x161c   :  { %5956 = vmatprep.subr.msk.mxu1 %vm115_vm0, %v4318_v23 }
0x161f   :  { %5957 = vmatpush3.xpose.msk.msra.mxu1 %vm115_vm0, %v4318_v23 }
0x1620   :  { %5968 = vmatprep.subr.msk.mxu1 %vm115_vm0, %v4520_v39 }
0x1622   :  { %5959 = vmatmul.mubr.msk.f32.vlgmr.msra.gmra.mxu1 %vm115_vm0, %v4316_v38  ;;  %v2820_v38 = vld [vmem:[#allocation7 + $0x30] sm:$0xff] }
0x1623   :  { %5969 = vmatpush3.xpose.msk.msra.mxu1 %vm115_vm0, %v4520_v39  ;;  %5972 = vmatprep.mubr.msk.f32.mxu1 %vm115_vm0, %v4514_v40 }
0x1624   :  { %5970 = vmatprep.subr.msk.mxu1 %vm115_vm0, %v4518_v41 }
0x1627   :  { %5971 = vmatpush3.xpose.msk.msra.mxu1 %vm115_vm0, %v4518_v41 }
0x162a   :  { %5973 = vmatmul.mubr.msk.f32.vlgmr.msra.gmra.mxu1 %vm115_vm0, %v4516_v42 }
0x16ce   :  { %v6949_v49 = vpop.f32.mrf.mxu1 }
0x16d0   :  { %v6951_v50 = vpop.f32.mrf.mxu1 }
0x16d2   :  { %v5924_v44 = vpop.f32.mrf.mxu1 }
0x16d3   :  { %v3906_v46 = vsel %vm415_vm2, %v5924_v44, -inf }
0x16d4   :  { %3907 = vmax.xlane.f32.xlu1 %v3906_v46  ;;  %v3894_v51 = vpop.f32.mrf.mxu1 }
0x16d5   :  { %v3903_v47 = vsel %vm415_vm2, %v3894_v51, -inf }
0x16d6   :  { %3904 = vmax.xlane.f32.xlu0 %v3903_v47 }
0x16da   :  { %v5938_v52 = vpop.f32.mrf.mxu1 }
0x16db   :  { %v4106_v55 = vsel %vm415_vm2, %v5938_v52, -inf }
0x16dc   :  { %v4094_v53 = vpop.f32.mrf.mxu1 }
0x16dd   :  { %v4103_v54 = vsel %vm415_vm2, %v4094_v53, -inf }
0x16de   :  { %4104 = vmax.xlane.f32.xlu0 %v4103_v54 }
0x16e2   :  { %4107 = vmax.xlane.f32.xlu0 %v4106_v55  ;;  %v5960_v18 = vpop.f32.mrf.mxu1 }
0x16e3   :  { %v4407_v22 = vsel %vm415_vm2, %v5960_v18, -inf }
0x16e4   :  { %v4395_v20 = vpop.f32.mrf.mxu1 }
0x16e5   :  { %3927 = vrot.lane.b32.xlu1 %v6778_v17, %s6319_s26  ;;  %v4404_v12 = vsel %vm415_vm2, %v4395_v20, -inf }
0x16ea   :  { %v5974_v11 = vpop.f32.mrf.mxu1 }
0x16eb   :  { %v4607_v19 = vsel %vm415_vm2, %v5974_v11, -inf }
0x16ec   :  { %v4595_v29 = vpop.f32.mrf.mxu1 }
0x16ed   :  { %v4604_v16 = vsel %vm415_vm2, %v4595_v29, -inf }
0x175d   :  { %v3908_v56 = vpop.xlane.xlu1 %3907 }
0x175e   :  { %v3910_v57 = vsub.f32 %v5924_v44, %v3908_v56 }
0x175f   :  { %v3905_v58 = vpop.xlane.xlu0 %3904 }
0x1760   :  { %v3913_v59 = vmul.f32 1.442695, %v3910_v57  ;;  %v3909_v45 = vsub.f32 %v3894_v51, %v3905_v58 }
0x1761   :  { %v3928_v60 = vpop.permute.xlu1 %3927 }
0x1762   :  { %6148 = vpow2.f32 %v3913_v59  ;;  %v3911_v61 = vmul.f32 1.442695, %v3909_v45  ;;  %5925 = vmatprep.subr.mxu0 %v3928_v60 }
0x1763   :  { %5926 = vmatpush3.msra.mxu0 %v3928_v60 }
0x1764   :  { %6150 = vpow2.f32 %v3911_v61 }
0x1767   :  { %v4105_v62 = vpop.xlane.xlu0 %4104 }
0x1768   :  { %v4109_v5 = vsub.f32 %v4094_v53, %v4105_v62 }
0x176a   :  { %v4111_v6 = vmul.f32 1.442695, %v4109_v5 }
0x176b   :  { %v4108_v63 = vpop.xlane.xlu0 %4107 }
0x176c   :  { %v4110_v0 = vsub.f32 %v5938_v52, %v4108_v63 }
0x176e   :  { %v4113_v1 = vmul.f32 1.442695, %v4110_v0 }
0x176f   :  { %v6149_v15 = vpop.eup %6148 }
0x1770   :  { %6152 = vpow2.f32 %v4113_v1  ;;  %v3918_v27 = vsel %vm415_vm2, %v6149_v15, 0.0 }
0x1771   :  { %v6151_v13 = vpop.eup %6150  ;;  %3919 = vadd.xlane.f32.xlu0 %v3918_v27  ;;  %6154 = vpow2.f32 %v4111_v6  ;;  %v5914_v27 = vpop.f32.mrf.mxu0 }
0x1772   :  { %v3915_v2 = vsel %vm415_vm2, %v6151_v13, 0.0 }
0x1773   :  { %3916 = vadd.xlane.f32.xlu1 %v3915_v2 }
0x177d   :  { %v6153_v3 = vpop.eup %6152 }
0x177e   :  { %v4118_v4 = vsel %vm415_vm2, %v6153_v3, 0.0  ;;  %v6155_v9 = vpop.eup %6154 }
0x177f   :  { %4119 = vadd.xlane.f32.xlu0 %v4118_v4  ;;  %v4115_v10 = vsel %vm415_vm2, %v6155_v9, 0.0 }
0x1784   :  { %4127 = vrot.lane.b32.xlu1 %v6788_v24, %s6319_s26 }
0x1795   :  { %3925 = vrot.lane.b32.xlu0 %v6780_v21, %s6319_s26 }
0x17a8   :  { %4116 = vadd.xlane.f32.xlu1 %v4115_v10 }
0x17b4   :  { %4405 = vmax.xlane.f32.xlu0 %v4404_v12 }
0x17b8   :  { %4605 = vmax.xlane.f32.xlu0 %v4604_v16 }
0x17b9   :  { %4125 = vrot.lane.b32.xlu1 %v6790_v28, %s6319_s26 }
0x17bc   :  { %4608 = vmax.xlane.f32.xlu0 %v4607_v19 }
0x17dd   :  { %4408 = vmax.xlane.f32.xlu1 %v4407_v22 }
0x17ee   :  { %4428 = vrot.lane.b32.xlu1 %v6778_v17, %s6320_s27 }
0x17fa   :  { %v3920_v26 = vpop.xlane.xlu0 %3919 }
0x17fb   :  { %6156 = vrcp.f32 %v3920_v26 }
0x17fc   :  { %v3917_v30 = vpop.xlane.xlu1 %3916 }
0x17fd   :  { %6158 = vrcp.f32 %v3917_v30 }
0x1800   :  { %v4128_v37 = vpop.permute.xlu1 %4127 }
0x1808   :  { %v4120_v31 = vpop.xlane.xlu0 %4119  ;;  %v6157_v32 = vpop.eup %6156 }
0x1809   :  { %v3924_v36 = vmul.f32 %v6157_v32, %v6149_v15  ;;  %6160 = vrcp.f32 %v4120_v31 }
0x180a   :  { %v6159_v33 = vpop.eup %6158 }
0x180b   :  { %v3923_v34 = vmul.f32 %v6159_v33, %v6151_v13  ;;  %v3793_v13 = vpop.f32.mrf.mxu0  ;;  %v2821_v33 = vld [vmem:[#allocation7 + $0x38] sm:$0xff] }
0x180c   :  { %v3926_v35 = vpop.permute.xlu0 %3925 }
0x180d   :  { %5927 = vmatprep.subr.mxu0 %v3926_v35  ;;  %5929 = vmatprep.mubr.msk.f32.mxu0 %vm415_vm2, %v3923_v34  ;;  %v5917_v2 = vpop.f32.mrf.mxu0  ;;  %v3799_v34 = vadd.f32 %v5914_v27, %v6945_v43  ;;  %v3794_v43 = vadd.f32 %v3793_v13, %v6947_v48 }
0x180e   :  { %5928 = vmatpush3.msra.mxu0 %v3926_v35 }
0x180f   :  { %5930 = vmatmul.mubr.msk.f32.vlgmr.msra.gmra.mxu0 %vm415_vm2, %v3924_v36  ;;  %5939 = vmatprep.subr.mxu0 %v4128_v37 }
0x1810   :  { %5940 = vmatpush3.msra.mxu0 %v4128_v37 }
0x1816   :  { %v6161_v40 = vpop.eup %6160 }
0x1817   :  { %v4124_v51 = vmul.f32 %v6161_v40, %v6153_v3  ;;  %v3803_v3 = vpop.f32.mrf.mxu0 }
0x1831   :  { %v4117_v17 = vpop.xlane.xlu1 %4116 }
0x1832   :  { %6162 = vrcp.f32 %v4117_v17  ;;  %v3809_v17 = vadd.f32 %v5917_v2, %v6949_v49 }
0x1835   :  { %v4126_v23 = vpop.permute.xlu1 %4125 }
0x1836   :  { %5941 = vmatprep.subr.mxu0 %v4126_v23 }
0x1837   :  { %5942 = vmatpush3.msra.mxu0 %v4126_v23 }
0x1838   :  { %5946 = vmatprep.subr.mxu0 %v2820_v38 }
0x183d   :  { %v4406_v39 = vpop.xlane.xlu0 %4405 }
0x183e   :  { %v4410_v41 = vsub.f32 %v4395_v20, %v4406_v39 }
0x183f   :  { %v6163_v42 = vpop.eup %6162 }
0x1840   :  { %v4412_v44 = vmul.f32 1.442695, %v4410_v41  ;;  %v4123_v46 = vmul.f32 %v6163_v42, %v6155_v9 }
0x1841   :  { %v4606_v53 = vpop.xlane.xlu0 %4605 }
0x1842   :  { %6164 = vpow2.f32 %v4412_v44  ;;  %5943 = vmatprep.mubr.msk.f32.mxu0 %vm415_vm2, %v4123_v46  ;;  %v4610_v60 = vsub.f32 %v4595_v29, %v4606_v53  ;;  %v5392_v53 = vld [vmem:[%s7082_s6 + $0x1] ss:$0 sm:$0xff] }
0x1843   :  { %5944 = vmatmul.mubr.msk.f32.vlgmr.msra.gmra.mxu0 %vm415_vm2, %v4124_v51 }
0x1844   :  { %5947 = vmatpush3.msra.mxu0 %v2820_v38  ;;  %v4612_v61 = vmul.f32 1.442695, %v4610_v60  ;;  %v3804_v38 = vadd.f32 %v3803_v3, %v6951_v50 }
0x1845   :  { %v4609_v54 = vpop.xlane.xlu0 %4608 }
0x1846   :  { %v4611_v55 = vsub.f32 %v5974_v11, %v4609_v54 }
0x1848   :  { %v4614_v58 = vmul.f32 1.442695, %v4611_v55 }
0x184f   :  { %v6165_v47 = vpop.eup %6164 }
0x1850   :  { %v4416_v52 = vsel %vm415_vm2, %v6165_v47, 0.0 }
0x1851   :  { %4417 = vadd.xlane.f32.xlu1 %v4416_v52 }
0x1862   :  { %4628 = vrot.lane.b32.xlu1 %v6788_v24, %s6320_s27 }
0x1866   :  { %v4409_v56 = vpop.xlane.xlu1 %4408 }
0x1867   :  { %v4411_v57 = vsub.f32 %v5960_v18, %v4409_v56 }
0x1869   :  { %v4414_v59 = vmul.f32 1.442695, %v4411_v57 }
0x186a   :  { %v4429_v45 = vpop.permute.xlu1 %4428 }
0x186b   :  { %6166 = vpow2.f32 %v4414_v59  ;;  %5961 = vmatprep.subr.mxu0 %v4429_v45 }
0x186c   :  { %6168 = vpow2.f32 %v4614_v58 }
0x186d   :  { %6170 = vpow2.f32 %v4612_v61 }
0x1878   :  { %v6167_v62 = vpop.eup %6166 }
0x1879   :  { %v4419_v63 = vsel %vm415_vm2, %v6167_v62, 0.0  ;;  %v6169_v0 = vpop.eup %6168 }
0x187a   :  { %4420 = vadd.xlane.f32.xlu0 %v4419_v63  ;;  %v4619_v1 = vsel %vm415_vm2, %v6169_v0, 0.0  ;;  %v6171_v24 = vpop.eup %6170 }
0x187b   :  { %v4616_v15 = vsel %vm415_vm2, %v6171_v24, 0.0 }
0x187e   :  { %4620 = vadd.xlane.f32.xlu0 %v4619_v1 }
0x1886   :  { %4617 = vadd.xlane.f32.xlu1 %v4616_v15 }
0x1894   :  { %4426 = vrot.lane.b32.xlu0 %v6780_v21, %s6320_s27 }
0x1897   :  { %4626 = vrot.lane.b32.xlu1 %v6790_v28, %s6320_s27 }
0x18cf   :  { %v5931_v4 = vpop.f32.mrf.mxu0 }
0x18d1   :  { %v4003_v5 = vpop.f32.mrf.mxu0 }
0x18d2   :  { %5948 = vmatprep.mubr.msk.f32.mxu0 %vm115_vm0, %v4003_v5 }
0x18d3   :  { %5949 = vmatmul.mubr.msk.f32.vlgmr.msra.gmra.mxu0 %vm115_vm0, %v5931_v4 }
0x18d4   :  { %5962 = vmatpush3.msra.mxu0 %v4429_v45 }
0x18da   :  { %v4418_v6 = vpop.xlane.xlu1 %4417 }
0x18db   :  { %6172 = vrcp.f32 %v4418_v6 }
0x18de   :  { %v4629_v11 = vpop.permute.xlu1 %4628 }
0x18e8   :  { %v6173_v9 = vpop.eup %6172 }
0x18e9   :  { %v4424_v28 = vmul.f32 %v6173_v9, %v6165_v47 }
0x1903   :  { %v5945_v10 = vpop.f32.mrf.mxu0  ;;  %v4421_v18 = vpop.xlane.xlu0 %4420 }
0x1904   :  { %6174 = vrcp.f32 %v4421_v18 }
0x1905   :  { %v4203_v21 = vpop.f32.mrf.mxu0 }
0x1906   :  { %5951 = vmatprep.mubr.msk.f32.mxu0 %vm115_vm0, %v4203_v21 }
0x1907   :  { %5952 = vmatmul.mubr.msk.f32.gmra.mxu0 %vm115_vm0, %v5945_v10  ;;  %v4621_v20 = vpop.xlane.xlu0 %4620 }
0x1908   :  { %5965 = vmatprep.mubr.msk.f32.mxu0 %vm415_vm2, %v4424_v28  ;;  %6176 = vrcp.f32 %v4621_v20 }
0x190b   :  { %v4427_v12 = vpop.permute.xlu0 %4426 }
0x190c   :  { %5963 = vmatprep.subr.mxu0 %v4427_v12 }
0x190d   :  { %5964 = vmatpush3.msra.mxu0 %v4427_v12 }
0x190e   :  { %5975 = vmatprep.subr.mxu0 %v4629_v11 }
0x190f   :  { %v4618_v29 = vpop.xlane.xlu1 %4617 }
0x1910   :  { %6178 = vrcp.f32 %v4618_v29 }
0x1911   :  { %v6175_v16 = vpop.eup %6174 }
0x1912   :  { %v4425_v19 = vmul.f32 %v6175_v16, %v6167_v62 }
0x1913   :  { %v4627_v22 = vpop.permute.xlu1 %4626 }
0x1914   :  { %5966 = vmatmul.mubr.msk.f32.vlgmr.msra.gmra.mxu0 %vm415_vm2, %v4425_v19  ;;  %v4910_v19 = vld [vmem:[#allocation8 + $0x38] sm:$0xff] }
0x1915   :  { %5976 = vmatpush3.msra.mxu0 %v4629_v11  ;;  %v6177_v26 = vpop.eup %6176  ;;  %5990 = vmatprep.subr.mxu1 %v4910_v19 }
0x1916   :  { %5977 = vmatprep.subr.mxu0 %v4627_v22  ;;  %v4625_v32 = vmul.f32 %v6177_v26, %v6169_v0  ;;  %5991 = vmatpush3.msra.mxu1 %v4910_v19  ;;  %v4908_v26 = vld [vmem:[#allocation8 + $0x28] sm:$0xff] }
0x1917   :  { %5978 = vmatpush3.msra.mxu0 %v4627_v22  ;;  %v4909_v22 = vld [vmem:[#allocation8 + $0x30] sm:$0xff] }
0x1918   :  { %5982 = vmatprep.subr.mxu0 %v2821_v33  ;;  %5992 = vmatprep.subr.mxu1 %v4909_v22 }
0x1919   :  { %5993 = vmatpush3.msra.mxu1 %v4909_v22 }
0x191a   :  { %5994 = vmatprep.subr.mxu1 %v4908_v26 }
0x191b   :  { %5995 = vmatpush3.msra.mxu1 %v4908_v26 }
0x191d   :  { %v6179_v30 = vpop.eup %6178 }
0x191e   :  { %v4624_v31 = vmul.f32 %v6179_v30, %v6171_v24  ;;  %v4907_v30 = vld [vmem:[#allocation8 + $0x20] sm:$0xff] }
0x191f   :  { %5996 = vmatprep.subr.mxu1 %v4907_v30 }
0x1920   :  { %5979 = vmatprep.mubr.msk.f32.mxu0 %vm415_vm2, %v4624_v31  ;;  %5997 = vmatpush3.msra.mxu1 %v4907_v30 }
0x1921   :  { %5980 = vmatmul.mubr.msk.f32.vlgmr.msra.gmra.mxu0 %vm415_vm2, %v4625_v32 }
0x1922   :  { %5983 = vmatpush3.msra.mxu0 %v2821_v33 }
0x1993   :  { %v5950_v35 = vpop.f32.mrf.mxu0 }
0x1994   :  { %v4310_v36 = vadd.f32 %v5950_v35, %v3799_v34 }
0x1995   :  { %v4290_v37 = vpop.f32.mrf.mxu0 }
0x1996   :  { %v4309_v47 = vadd.f32 %v4290_v37, %v3794_v43 }
0x19c7   :  { %v5953_v23 = vpop.f32.mrf.mxu0 }
0x19c8   :  { %v4312_v39 = vadd.f32 %v5953_v23, %v3809_v17 }
0x19c9   :  { %v4300_v40 = vpop.f32.mrf.mxu0 }
0x19ca   :  { %v4311_v41 = vadd.f32 %v4300_v40, %v3804_v38 }
0x19d4   :  { %v5967_v42 = vpop.f32.mrf.mxu0 }
0x19d6   :  { %v4504_v44 = vpop.f32.mrf.mxu0 }
0x19d7   :  { %5984 = vmatprep.mubr.msk.f32.mxu0 %vm115_vm0, %v4504_v44 }
0x19d8   :  { %5985 = vmatmul.mubr.msk.f32.vlgmr.msra.gmra.mxu0 %vm115_vm0, %v5967_v42 }
0x19e1   :  { %v5981_v46 = vpop.f32.mrf.mxu0 }
0x19e3   :  { %v4704_v51 = vpop.f32.mrf.mxu0 }
0x19e4   :  { %5987 = vmatprep.mubr.msk.f32.mxu0 %vm115_vm0, %v4704_v51 }
0x19e5   :  { %5988 = vmatmul.mubr.msk.f32.gmra.mxu0 %vm115_vm0, %v5981_v46 }
0x1a98   :  { %v5986_v49 = vpop.f32.mrf.mxu0 }
0x1a99   :  { %v4811_v50 = vadd.f32 %v5986_v49, %v4310_v36  ;;  %v5396_v49 = vld [vmem:[%s7084_s8 + $0x1] ss:$0 sm:$0xff] }
0x1a9a   :  { %v4791_v52 = vpop.f32.mrf.mxu0 }
0x1a9b   :  { %v4815_v54 = vadd.f32 %v4811_v50, %v6761_v8  ;;  %v4810_v55 = vadd.f32 %v4791_v52, %v4309_v47 }
0x1a9d   :  { %v4814_v56 = vadd.f32 %v4810_v55, %v6759_v7  ;;  %v4827_v57 = vadd.f32 %v5392_v53, %v4815_v54 }
0x1a9f   :  { %v4837_v58 = vsel %vm224_vm1, %v4827_v57, 0.0  ;;  %v4826_v59 = vadd.f32 %v5392_v53, %v4814_v56 }
0x1aa0   :  { %4838 = vadd.xlane.f32.xlu1 %v4837_v58 }
0x1aa1   :  { %v4834_v48 = vsel %vm224_vm1, %v4826_v59, 0.0 }
0x1aa2   :  { %4835 = vadd.xlane.f32.xlu0 %v4834_v48 }
0x1aa5   :  { %v5989_v45 = vpop.f32.mrf.mxu0 }
0x1aa6   :  { %v4813_v60 = vadd.f32 %v5989_v45, %v4312_v39  ;;  %v5406_v45 = vld [vmem:[%s7087_s11 + $0x38] sm:$0xff] }
0x1aa7   :  { %v4801_v61 = vpop.f32.mrf.mxu0  ;;  %6004 = vmatprep.subr.mxu0 %v5406_v45 }
0x1aa8   :  { %v4812_v62 = vadd.f32 %v4801_v61, %v4311_v41  ;;  %v4817_v63 = vadd.f32 %v4813_v60, %v6769_v25  ;;  %v5395_v41 = vld [vmem:[%s7083_s7 + $0x1] ss:$0 sm:$0xff]  ;;  %6005 = vmatpush3.msra.mxu0 %v5406_v45  ;;  %v5405_v60 = vld [vmem:[%s7087_s11 + $0x30] sm:$0xff]  ;;  %v5404_v61 = vld [vmem:[%s7087_s11 + $0x28] sm:$0xff] }
0x1aa9   :  { %6006 = vmatprep.subr.mxu0 %v5405_v60  ;;  %v5415_v45 = vld [vmem:[%s7089_s13 + $0x1] ss:$0 sm:$0xff]  ;;  %s6321_s13 = smov [#allocation10]  }
0x1aaa   :  { %v4816_v0 = vadd.f32 %v4812_v62, %v6767_v14  ;;  %v4829_v7 = vadd.f32 %v5392_v53, %v4817_v63  ;;  %6007 = vmatpush3.msra.mxu0 %v5405_v60  ;;  %v5403_v62 = vld [vmem:[%s7087_s11 + $0x20] sm:$0xff]  ;;  %s5219_s1 = sshll.u32 %s6321_s13, 4  ;;  %s5220_s1 = int_to_ptr.vmem [resolvable:$true] %s5219_s1 }
0x1aab   :  { %6008 = vmatprep.subr.mxu0 %v5404_v61  ;;  %v5398_v63 = vld [vmem:[%s7086_s10 + $0x1] ss:$0 sm:$0xff]  ;;  %p6281_p7 = scmp.lt.s32.totalorder %s5220_s1, %s5220_s1 }
0x1aac   :  { %v4828_v8 = vadd.f32 %v5392_v53, %v4816_v0  ;;  %v4843_v24 = vsel %vm224_vm1, %v4829_v7, 0.0  ;;  %6009 = vmatpush3.msra.mxu0 %v5404_v61 }
0x1aad   :  { %6010 = vmatprep.subr.mxu0 %v5403_v62 }
0x1aae   :  { %v4840_v1 = vsel %vm224_vm1, %v4828_v8, 0.0  ;;  %6011 = vmatpush3.msra.mxu0 %v5403_v62 }
0x1aaf   :  { %4841 = vadd.xlane.f32.xlu0 %v4840_v1 }
0x1ab3   :  { %4844 = vadd.xlane.f32.xlu0 %v4843_v24 }
0x1b29   :  { %v4839_v15 = vpop.xlane.xlu1 %4838 }
0x1b2a   :  { %v4847_v27 = vmul.f32 0.03125, %v4839_v15 }
0x1b2b   :  { %v4836_v13 = vpop.xlane.xlu0 %4835 }
0x1b2c   :  { %v4851_v2 = vsub.f32 %v4827_v57, %v4847_v27  ;;  %v4846_v3 = vmul.f32 0.03125, %v4836_v13 }
0x1b2e   :  { %v4850_v4 = vsub.f32 %v4826_v59, %v4846_v3  ;;  %v4855_v5 = vmul.f32 %v4851_v2, %v4851_v2 }
0x1b30   :  { %v4861_v6 = vsel %vm224_vm1, %v4855_v5, 0.0  ;;  %v4854_v25 = vmul.f32 %v4850_v4, %v4850_v4 }
0x1b31   :  { %4862 = vadd.xlane.f32.xlu0 %v4861_v6  ;;  %v5408_v6 = vld [vmem:[%s7088_s12 + $0x1] ss:$0 sm:$0xff] }
0x1b32   :  { %v4858_v14 = vsel %vm224_vm1, %v4854_v25, 0.0 }
0x1b33   :  { %4859 = vadd.xlane.f32.xlu1 %v4858_v14 }
0x1b38   :  { %v4842_v9 = vpop.xlane.xlu0 %4841 }
0x1b39   :  { %v4848_v10 = vmul.f32 0.03125, %v4842_v9 }
0x1b3b   :  { %v4852_v18 = vsub.f32 %v4828_v8, %v4848_v10 }
0x1b3c   :  { %v4845_v21 = vpop.xlane.xlu0 %4844 }
0x1b3d   :  { %v4849_v28 = vmul.f32 0.03125, %v4845_v21  ;;  %v4856_v20 = vmul.f32 %v4852_v18, %v4852_v18 }
0x1b3f   :  { %v4853_v11 = vsub.f32 %v4829_v7, %v4849_v28  ;;  %v4864_v12 = vsel %vm224_vm1, %v4856_v20, 0.0 }
0x1b40   :  { %4865 = vadd.xlane.f32.xlu1 %v4864_v12 }
0x1b41   :  { %v4857_v29 = vmul.f32 %v4853_v11, %v4853_v11 }
0x1b43   :  { %v4867_v16 = vsel %vm224_vm1, %v4857_v29, 0.0 }
0x1b44   :  { %4868 = vadd.xlane.f32.xlu0 %v4867_v16 }
0x1bba   :  { %v4863_v31 = vpop.xlane.xlu0 %4862 }
0x1bbb   :  { %v4871_v32 = vmul.f32 0.03125, %v4863_v31 }
0x1bbc   :  { %v4860_v33 = vpop.xlane.xlu1 %4859 }
0x1bbd   :  { %v4875_v34 = vadd.f32 1e-05, %v4871_v32  ;;  %v4870_v35 = vmul.f32 0.03125, %v4860_v33 }
0x1bbf   :  { %6180 = vrsqrt.f32 %v4875_v34  ;;  %v4874_v36 = vadd.f32 1e-05, %v4870_v35 }
0x1bc1   :  { %6182 = vrsqrt.f32 %v4874_v36 }
0x1bc9   :  { %v4866_v37 = vpop.xlane.xlu1 %4865 }
0x1bca   :  { %v4872_v17 = vmul.f32 0.03125, %v4866_v37 }
0x1bcc   :  { %v6181_v23 = vpop.eup %6180  ;;  %v4876_v38 = vadd.f32 1e-05, %v4872_v17 }
0x1bcd   :  { %v4883_v39 = vmul.f32 %v6181_v23, %v4851_v2  ;;  %v4869_v40 = vpop.xlane.xlu0 %4868 }
0x1bce   :  { %v6183_v42 = vpop.eup %6182  ;;  %6184 = vrsqrt.f32 %v4876_v38  ;;  %v4873_v44 = vmul.f32 0.03125, %v4869_v40 }
0x1bcf   :  { %v4882_v46 = vmul.f32 %v6183_v42, %v4850_v4  ;;  %v4893_v43 = vmul.f32 %v5395_v41, %v4883_v39 }
0x1bd0   :  { %v4877_v51 = vadd.f32 1e-05, %v4873_v44 }
0x1bd1   :  { %v4892_v47 = vmul.f32 %v5395_v41, %v4882_v46  ;;  %v4903_v52 = vadd.f32 %v5396_v49, %v4893_v43 }
0x1bd2   :  { %6186 = vrsqrt.f32 %v4877_v51 }
0x1bd3   :  { %v4902_v50 = vadd.f32 %v5396_v49, %v4892_v47 }
0x1bd5   :  { %5998 = vmatprep.mubr.msk.f32.mxu1 %vm224_vm1, %v4902_v50 }
0x1bd6   :  { %5999 = vmatmul.mubr.msk.f32.vlgmr.msra.gmra.mxu1 %vm224_vm1, %v4903_v52 }
0x1bdb   :  { %v6185_v53 = vpop.eup %6184 }
0x1bdc   :  { %v4884_v54 = vmul.f32 %v6185_v53, %v4852_v18 }
0x1bde   :  { %v4894_v55 = vmul.f32 %v5395_v41, %v4884_v54 }
0x1bdf   :  { %v6187_v56 = vpop.eup %6186 }
0x1be0   :  { %v4904_v57 = vadd.f32 %v5396_v49, %v4894_v55  ;;  %v4885_v58 = vmul.f32 %v6187_v56, %v4853_v11 }
0x1be2   :  { %6001 = vmatprep.mubr.msk.f32.mxu1 %vm224_vm1, %v4904_v57  ;;  %v4895_v59 = vmul.f32 %v5395_v41, %v4885_v58 }
0x1be4   :  { %v4905_v48 = vadd.f32 %v5396_v49, %v4895_v59 }
0x1be6   :  { %6002 = vmatmul.mubr.msk.f32.gmra.mxu1 %vm224_vm1, %v4905_v48 }
0x1c96   :  { %v6000_v0 = vpop.f32.mrf.mxu1 }
0x1c97   :  { %v5003_v8 = vadd.f32 %v6000_v0, %v5398_v63  ;;  %v5416_v0 = vld [vmem:[%s7090_s14 + $0x1] ss:$0 sm:$0xff]  ;;  %s6276_s14 = scalar_lea.vmem %s5220_s1, 512 }
0x1c98   :  { %v4997_v1 = vpop.f32.mrf.mxu1  ;;  %p6277_p6 = scmp.ne.s32.totalorder %s5220_s1, %s6276_s14  ;;  %p6282_p8 = scmp.lt.s32.totalorder %s6276_s14, %s6276_s14 }
0x1c99   :  { %v4998_v7 = vadd.f32 %v5398_v63, %v4997_v1  ;;  %v5017_v15 = vmax.f32 %v5003_v8, 0.0 }
0x1c9a   :  { %p6283_p9 = por %p6282_p8, %p6281_p7 }
0x1c9b   :  { %v5016_v24 = vmax.f32 %v4998_v7, 0.0 }
0x1c9c   :  { %p6284_p10 = pnand %p6283_p9, %p6277_p6 }
0x1c9d   :  { %6012 = vmatprep.mubr.msk.f32.mxu0 %vm224_vm1, %v5016_v24 }
0x1c9e   :  { %6013 = vmatmul.mubr.msk.f32.vlgmr.msra.gmra.mxu0 %vm224_vm1, %v5017_v15 }
0x1ca6   :  { %v6003_v27 = vpop.f32.mrf.mxu1 }
0x1ca7   :  { %v5013_v13 = vadd.f32 %v6003_v27, %v5398_v63 }
0x1ca8   :  { %v5007_v2 = vpop.f32.mrf.mxu1 }
0x1ca9   :  { %v5008_v3 = vadd.f32 %v5398_v63, %v5007_v2  ;;  %v5019_v5 = vmax.f32 %v5013_v13, 0.0 }
0x1cab   :  { %v5018_v4 = vmax.f32 %v5008_v3, 0.0 }
0x1cad   :  { %6015 = vmatprep.mubr.msk.f32.mxu0 %vm224_vm1, %v5018_v4 }
0x1cae   :  { %6016 = vmatmul.mubr.msk.f32.gmra.mxu0 %vm224_vm1, %v5019_v5 }
0x1d5e   :  { %v6014_v25 = vpop.f32.mrf.mxu0 }
0x1d5f   :  { %v5117_v14 = vadd.f32 %v6014_v25, %v5408_v6 }
0x1d60   :  { %v5111_v9 = vpop.f32.mrf.mxu0 }
0x1d61   :  { %v5131_v10 = vadd.f32 %v5117_v14, %v4903_v52  ;;  %v5112_v18 = vadd.f32 %v5408_v6, %v5111_v9 }
0x1d63   :  { %v5130_v21 = vadd.f32 %v5112_v18, %v4902_v50  ;;  %v5141_v28 = vsel %vm224_vm1, %v5131_v10, 0.0 }
0x1d64   :  { %5142 = vadd.xlane.f32.xlu0 %v5141_v28 }
0x1d65   :  { %v5138_v20 = vsel %vm224_vm1, %v5130_v21, 0.0 }
0x1d66   :  { %5139 = vadd.xlane.f32.xlu1 %v5138_v20 }
0x1d6e   :  { %v6017_v11 = vpop.f32.mrf.mxu0 }
0x1d6f   :  { %v5127_v12 = vadd.f32 %v6017_v11, %v5408_v6 }
0x1d70   :  { %v5121_v29 = vpop.f32.mrf.mxu0 }
0x1d71   :  { %v5133_v16 = vadd.f32 %v5127_v12, %v4905_v48  ;;  %v5122_v19 = vadd.f32 %v5408_v6, %v5121_v29 }
0x1d73   :  { %v5132_v22 = vadd.f32 %v5122_v19, %v4904_v57  ;;  %v5147_v26 = vsel %vm224_vm1, %v5133_v16, 0.0 }
0x1d74   :  { %5148 = vadd.xlane.f32.xlu0 %v5147_v26 }
0x1d75   :  { %v5144_v30 = vsel %vm224_vm1, %v5132_v22, 0.0 }
0x1d76   :  { %5145 = vadd.xlane.f32.xlu1 %v5144_v30 }
0x1ded   :  { %v5143_v31 = vpop.xlane.xlu0 %5142 }
0x1dee   :  { %v5151_v32 = vmul.f32 0.03125, %v5143_v31 }
0x1def   :  { %v5140_v33 = vpop.xlane.xlu1 %5139 }
0x1df0   :  { %v5155_v34 = vsub.f32 %v5131_v10, %v5151_v32  ;;  %v5150_v35 = vmul.f32 0.03125, %v5140_v33 }
0x1df2   :  { %v5154_v36 = vsub.f32 %v5130_v21, %v5150_v35  ;;  %v5159_v37 = vmul.f32 %v5155_v34, %v5155_v34 }
0x1df4   :  { %v5165_v17 = vsel %vm224_vm1, %v5159_v37, 0.0  ;;  %v5158_v23 = vmul.f32 %v5154_v36, %v5154_v36 }
0x1df5   :  { %5166 = vadd.xlane.f32.xlu0 %v5165_v17 }
0x1df6   :  { %v5162_v38 = vsel %vm224_vm1, %v5158_v23, 0.0 }
0x1df7   :  { %5163 = vadd.xlane.f32.xlu1 %v5162_v38 }
0x1dfd   :  { %v5149_v39 = vpop.xlane.xlu0 %5148 }
0x1dfe   :  { %v5153_v40 = vmul.f32 0.03125, %v5149_v39 }
0x1dff   :  { %v5146_v41 = vpop.xlane.xlu1 %5145 }
0x1e00   :  { %v5157_v42 = vsub.f32 %v5133_v16, %v5153_v40  ;;  %v5152_v44 = vmul.f32 0.03125, %v5146_v41 }
0x1e02   :  { %v5156_v46 = vsub.f32 %v5132_v22, %v5152_v44  ;;  %v5161_v51 = vmul.f32 %v5157_v42, %v5157_v42 }
0x1e04   :  { %v5171_v43 = vsel %vm224_vm1, %v5161_v51, 0.0  ;;  %v5160_v49 = vmul.f32 %v5156_v46, %v5156_v46 }
0x1e05   :  { %5172 = vadd.xlane.f32.xlu0 %v5171_v43 }
0x1e06   :  { %v5168_v47 = vsel %vm224_vm1, %v5160_v49, 0.0 }
0x1e07   :  { %5169 = vadd.xlane.f32.xlu1 %v5168_v47 }
0x1e7e   :  { %v5167_v50 = vpop.xlane.xlu0 %5166 }
0x1e7f   :  { %v5175_v52 = vmul.f32 0.03125, %v5167_v50 }
0x1e80   :  { %v5164_v53 = vpop.xlane.xlu1 %5163 }
0x1e81   :  { %v5179_v54 = vadd.f32 1e-05, %v5175_v52  ;;  %v5174_v55 = vmul.f32 0.03125, %v5164_v53 }
0x1e83   :  { %6188 = vrsqrt.f32 %v5179_v54  ;;  %v5178_v56 = vadd.f32 1e-05, %v5174_v55 }
0x1e85   :  { %6190 = vrsqrt.f32 %v5178_v56 }
0x1e8e   :  { %v5173_v57 = vpop.xlane.xlu0 %5172 }
0x1e8f   :  { %v5177_v58 = vmul.f32 0.03125, %v5173_v57 }
0x1e90   :  { %v6189_v59 = vpop.eup %6188  ;;  %v5170_v48 = vpop.xlane.xlu1 %5169 }
0x1e91   :  { %v5187_v60 = vmul.f32 %v6189_v59, %v5155_v34  ;;  %v5181_v61 = vadd.f32 1e-05, %v5177_v58  ;;  %v5176_v62 = vmul.f32 0.03125, %v5170_v48 }
0x1e92   :  { %v6191_v63 = vpop.eup %6190 }
0x1e93   :  { %v5186_v8 = vmul.f32 %v6191_v63, %v5154_v36  ;;  %6192 = vrsqrt.f32 %v5181_v61  ;;  %v5180_v1 = vadd.f32 1e-05, %v5176_v62  ;;  %v5197_v7 = vmul.f32 %v5415_v45, %v5187_v60 }
0x1e95   :  { %6194 = vrsqrt.f32 %v5180_v1  ;;  %v5196_v24 = vmul.f32 %v5415_v45, %v5186_v8  ;;  %v5207_v15 = vadd.f32 %v5416_v0, %v5197_v7 }
0x1e97   :  { %v5206_v27 = vadd.f32 %v5416_v0, %v5196_v24  ;;  %5211 = vst.msk [vmem:[#allocation10 + $0x8] sm:$0xff] %vm224_vm1, %v5207_v15 }
0x1e99   :  { %5210 = vst.msk [vmem:[#allocation10] sm:$0xff] %vm224_vm1, %v5206_v27 }
0x1ea0   :  { %v6193_v13 = vpop.eup %6192 }
0x1ea1   :  { %v5189_v2 = vmul.f32 %v6193_v13, %v5157_v42 }
0x1ea2   :  { %v6195_v3 = vpop.eup %6194 }
0x1ea3   :  { %v5188_v4 = vmul.f32 %v6195_v3, %v5156_v46  ;;  %v5199_v5 = vmul.f32 %v5415_v45, %v5189_v2 }
0x1ea5   :  { %v5198_v6 = vmul.f32 %v5415_v45, %v5188_v4  ;;  %v5209_v25 = vadd.f32 %v5416_v0, %v5199_v5 }
0x1ea7   :  { %v5208_v14 = vadd.f32 %v5416_v0, %v5198_v6  ;;  %5213 = vst.msk [vmem:[#allocation10 + $0x18] sm:$0xff] %vm224_vm1, %v5209_v25 }
0x1ea9   :  { %5212 = vst.msk [vmem:[#allocation10 + $0x10] sm:$0xff] %vm224_vm1, %v5208_v14 }
0x1eaa   :  { %6287 = shalt.err (!%p6284_p10)
}
0x1eab   :  { %5225 = dma.vmem_to_hbm [thread:$0]  %s5220_s1, 512, %s7091_s15, [#allocation4], %s6306_s23, %s6306_s23, %s6307_s24  }
0x1eac   :  { %6302 = dma.done.wait [#allocation4], 512  }
0x1ead   :  { %6303 = vsyncadd [#allocation4], 4294966784 }
0x1eae   :  { %5229 = vsyncpa [#allocation3], 1 }
0x1eaf   :  { %5230 = vsyncpa [#allocation6], 1 }
0x1eb0   :  { %5231 = vsyncpa [#allocation9], 1 }
0x1eb1   :  { %5232 = vsyncpa [#allocation4], 1 }

</bundles_post_ra>
